<compile_context>
chip_gen: v6e
topology: v6e:2x2x1
jax: 0.10.0
libtpu: 0.0.40
codegen_flags: <defaults>
</compile_context>

<pallas_src>
import math

import jax
import jax.numpy as jnp
from jax.experimental import pallas as pl
from jax.experimental.pallas import tpu as pltpu

# ---- small stand-ins for CLIP's (n_vocab=49408, n_embd=768, n_token=77, 12 heads, 12 layers)
N_VOCAB = 256
N_EMBD = 128
N_TOKEN = 16
N_HEAD = 4
N_LAYERS = 2
D_HEAD = N_EMBD // N_HEAD
EPS = 1e-5                 # torch.nn.LayerNorm default eps
EMB_ROWS = N_TOKEN         # one full sequence of rows per embedding grid step
NEG_BIAS = -1e9            # finite additive causal bias (no -inf / NaN path)


# ----------------------------------------------------------------------------
# Embedding kernel: x = token_embedding[tokens] + position_embedding
# Row gather via manual DMA from HBM (table never staged in VMEM), double-buffered
# across grid steps: group g+1's row DMAs are issued before waiting on group g.
# ----------------------------------------------------------------------------
def _embedding_kernel(tokens_ref, table_ref, pos_ref, out_ref, row_buf, sems):
    # tokens_ref : SMEM (B*T,) int32           (scalar prefetch)
    # table_ref  : HBM  (V, D) f32             (memory_space=pl.ANY, manual DMA gather)
    # pos_ref    : VMEM (T, D) f32             (resident)
    # out_ref    : VMEM (EMB_ROWS, D) f32      output tile (one sequence)
    # row_buf    : VMEM (2, EMB_ROWS, D) f32   double-buffered gather landing buffer
    # sems       : DMA semaphores (2, EMB_ROWS)
    g = pl.program_id(0)
    n = pl.num_programs(0)

    def issue(group, slot):
        base = group * EMB_ROWS
        for j in range(EMB_ROWS):
            tok = tokens_ref[base + j]
            pltpu.make_async_copy(
                table_ref.at[pl.ds(tok, 1)],
                row_buf.at[slot, pl.ds(j, 1), :],
                sems.at[slot, j],
            ).start()

    @pl.when(g == 0)
    def _():
        issue(0, 0)                          # prime slot 0

    @pl.when(g + 1 < n)
    def _():
        issue(g + 1, (g + 1) % 2)            # prefetch next group while this one is consumed

    slot = g % 2
    for j in range(EMB_ROWS):                # wait on this group's row DMAs
        pltpu.make_async_copy(
            table_ref.at[pl.ds(0, 1)],
            row_buf.at[slot, pl.ds(j, 1), :],
            sems.at[slot, j],
        ).wait()

    out_ref[...] = row_buf[slot] + pos_ref[...]   # vectorized add, full-tile store


def clip_embedding(tokens, table, pos_emb):
    B, T = tokens.shape
    V, D = table.shape
    assert T == EMB_ROWS and pos_emb.shape == (T, D)
    # clamp ids: VMEM/HBM refs have no runtime OOB check (PyTorch would raise instead)
    flat_tokens = jnp.clip(tokens.reshape(B * T), 0, V - 1).astype(jnp.int32)
    return pl.pallas_call(
        _embedding_kernel,
        out_shape=jax.ShapeDtypeStruct((B * T, D), jnp.float32),
        grid_spec=pltpu.PrefetchScalarGridSpec(
            num_scalar_prefetch=1,
            grid=(B,),
            in_specs=[
                pl.BlockSpec(memory_space=pl.ANY),             # token table stays in HBM
                pl.BlockSpec((T, D), lambda g, tok: (0, 0)),   # position embedding, resident
            ],
            out_specs=pl.BlockSpec((EMB_ROWS, D), lambda g, tok: (g, 0)),
            scratch_shapes=[
                pltpu.VMEM((2, EMB_ROWS, D), table.dtype),
                pltpu.SemaphoreType.DMA((2, EMB_ROWS)),
            ],
        ),
        compiler_params=pltpu.CompilerParams(dimension_semantics=("arbitrary",)),
    )(flat_tokens, table, pos_emb)                              # (B*T, D) f32


# ----------------------------------------------------------------------------
# Fused transformer stack: grid=(B, N_LAYERS).
# Per layer: LN1 -> causal MHA -> residual -> LN2 -> Linear -> quickGELU -> Linear
#            -> residual; final LayerNorm applied on the last layer step.
# Hidden state carried in a VMEM scratch across the layer axis; weights are stacked with a
# leading layer axis so their DMAs pipeline under the previous layer's MXU work.
# ----------------------------------------------------------------------------
def _layernorm(v, g, b):
    mu = jnp.mean(v, axis=-1, keepdims=True)
    var = jnp.mean(jnp.square(v - mu), axis=-1, keepdims=True)
    return (v - mu) * jax.lax.rsqrt(var + EPS) * g + b


def _clip_layers_kernel(x_ref, mask_ref,
                        ln1_g, ln1_b, w_qkv, b_qkv, w_o, b_o,
                        ln2_g, ln2_b, w_1, b_1, w_2, b_2,
                        lnf_g, lnf_b,
                        out_ref, state_ref):
    l = pl.program_id(1)
    n_layers = pl.num_programs(1)

    @pl.when(l == 0)
    def _():
        state_ref[...] = x_ref[...]          # load embedding output once per sequence

    x = state_ref[...]                       # (T, D) f32 — one sequence
    T, D = x.shape

    # ---- residual 1: LayerNorm -> causal self-attention -> add ----
    h = _layernorm(x, ln1_g[...], ln1_b[...]).astype(jnp.bfloat16)
    # one full-width qkv projection (N = 3D on the MXU); q scale folded into weights at init
    qkv = jnp.dot(h, w_qkv[...], preferred_element_type=jnp.float32) + b_qkv[...]   # (T, 3D)
    q, k, v = qkv[:, :D], qkv[:, D:2 * D], qkv[:, 2 * D:]
    mask = mask_ref[...]                     # precomputed additive causal bias (T, T)

    heads = []
    for hd in range(N_HEAD):                 # TODO(synk): at 12 heads use lax.fori_loop(unroll=2)
        c0 = hd * D_HEAD
        qh = q[:, c0:c0 + D_HEAD].astype(jnp.bfloat16)
        kh = k[:, c0:c0 + D_HEAD].astype(jnp.bfloat16)
        vh = v[:, c0:c0 + D_HEAD].astype(jnp.bfloat16)
        s = jnp.einsum('qd,kd->qk', qh, kh, preferred_element_type=jnp.float32) + mask
        s = s - jnp.max(s, axis=-1, keepdims=True)
        e = jnp.exp(s)
        p = e * pl.reciprocal(jnp.sum(e, axis=-1, keepdims=True), approx=True)
        heads.append(jnp.dot(p.astype(jnp.bfloat16), vh, preferred_element_type=jnp.float32))
    o = jnp.concatenate(heads, axis=-1).astype(jnp.bfloat16)    # (T, D)
    # single output projection with K = D (not per-head K = d_head accumulation)
    x = x + jnp.dot(o, w_o[...], preferred_element_type=jnp.float32) + b_o[...]

    # ---- residual 2: LayerNorm -> Linear -> quickGELU -> Linear -> add ----
    h = _layernorm(x, ln2_g[...], ln2_b[...]).astype(jnp.bfloat16)
    m = jnp.dot(h, w_1[...], preferred_element_type=jnp.float32) + b_1[...]
    m = m * pl.reciprocal(1.0 + jnp.exp(-1.702 * m), approx=True)   # x * sigmoid(1.702 x)
    y = x + jnp.dot(m.astype(jnp.bfloat16), w_2[...], preferred_element_type=jnp.float32) + b_2[...]

    state_ref[...] = y                       # carry to next layer step

    @pl.when(l == n_layers - 1)
    def _():
        out_ref[...] = _layernorm(y, lnf_g[...], lnf_b[...])    # fused final LayerNorm


def clip_layers(x_flat, params, seq_len):
    N, D = x_flat.shape
    B = N // seq_len
    L = params['w_qkv'].shape[0]

    # additive causal bias, built once (strictly-upper triangle masked with a finite value)
    q_idx = jax.lax.broadcasted_iota(jnp.int32, (seq_len, seq_len), 0)
    k_idx = jax.lax.broadcasted_iota(jnp.int32, (seq_len, seq_len), 1)
    mask = jnp.where(k_idx > q_idx, jnp.float32(NEG_BIAS), jnp.float32(0.0))

    layer_args = [params[name] for name in
                  ('ln1_g', 'ln1_b', 'w_qkv', 'b_qkv', 'w_o', 'b_o',
                   'ln2_g', 'ln2_b', 'w_1', 'b_1', 'w_2', 'b_2')]

    def per_layer(a):                        # leading layer axis squeezed; block index = l
        rest = tuple(int(s) for s in a.shape[1:])
        zeros = (0,) * len(rest)
        return pl.BlockSpec((None,) + rest, lambda b, l, z=zeros: (l,) + z)

    def resident(a):                         # full block, same index every step -> DMA once
        shp = tuple(int(s) for s in a.shape)
        zeros = (0,) * len(shp)
        return pl.BlockSpec(shp, lambda b, l, z=zeros: z)

    in_specs = ([pl.BlockSpec((seq_len, D), lambda b, l: (b, 0)),   # hidden state (per b)
                 resident(mask)]
                + [per_layer(a) for a in layer_args]
                + [resident(params['ln_f_g']), resident(params['ln_f_b'])])

    return pl.pallas_call(
        _clip_layers_kernel,
        out_shape=jax.ShapeDtypeStruct((N, D), jnp.float32),
        grid=(B, L),
        in_specs=in_specs,
        out_specs=pl.BlockSpec((seq_len, D), lambda b, l: (b, 0)),
        scratch_shapes=[pltpu.VMEM((seq_len, D), jnp.float32)],     # hidden-state carry
        compiler_params=pltpu.CompilerParams(
            dimension_semantics=("parallel", "arbitrary"),
            vmem_limit_bytes=64 * 1024 * 1024),
    )(x_flat, mask, *layer_args, params['ln_f_g'], params['ln_f_b'])


# ----------------------------------------------------------------------------
# Parameter init (deterministic, synthetic).  Linear weights stored transposed
# (x @ w + b), stacked with a leading layer axis, and cast to bf16; biases / LN in f32.
# ----------------------------------------------------------------------------
def init_clip_params(key):
    kt, kp, kl = jax.random.split(key, 3)
    s = 0.02
    d = N_EMBD
    L = N_LAYERS
    ks = jax.random.split(kl, 8)

    w_qkv = jax.random.normal(ks[0], (L, d, 3 * d), jnp.float32) * s
    b_qkv = jax.random.normal(ks[1], (L, 1, 3 * d), jnp.float32) * s
    scale = 1.0 / math.sqrt(D_HEAD)          # fold attention scale into the q projection
    w_qkv = w_qkv.at[:, :, :d].multiply(scale)
    b_qkv = b_qkv.at[:, :, :d].multiply(scale)

    return dict(
        token_embedding=jax.random.normal(kt, (N_VOCAB, N_EMBD), jnp.float32) * 0.02,
        # nn.Parameter(torch.zeros(...)) in __init__; random here so the add path is exercised.
        position_embedding=jax.random.normal(kp, (N_TOKEN, N_EMBD), jnp.float32) * 0.01,
        ln1_g=jnp.ones((L, 1, d), jnp.float32),
        ln1_b=jnp.zeros((L, 1, d), jnp.float32),
        w_qkv=w_qkv.astype(jnp.bfloat16),
        b_qkv=b_qkv,
        w_o=(jax.random.normal(ks[2], (L, d, d), jnp.float32) * s).astype(jnp.bfloat16),
        b_o=jax.random.normal(ks[3], (L, 1, d), jnp.float32) * s,
        ln2_g=jnp.ones((L, 1, d), jnp.float32),
        ln2_b=jnp.zeros((L, 1, d), jnp.float32),
        w_1=(jax.random.normal(ks[4], (L, d, 4 * d), jnp.float32) * s).astype(jnp.bfloat16),
        b_1=jax.random.normal(ks[5], (L, 1, 4 * d), jnp.float32) * s,
        w_2=(jax.random.normal(ks[6], (L, 4 * d, d), jnp.float32) * s).astype(jnp.bfloat16),
        b_2=jax.random.normal(ks[7], (L, 1, d), jnp.float32) * s,
        ln_f_g=jnp.ones((1, d), jnp.float32),
        ln_f_b=jnp.zeros((1, d), jnp.float32),
    )


def clip_forward(tokens, params):
    B, T = tokens.shape
    state = clip_embedding(tokens, params['token_embedding'], params['position_embedding'])
    state = clip_layers(state, params, T)    # all layers + final LN in one pallas_call
    return state.reshape(B, T, N_EMBD)


if __name__ == "__main__":
    key = jax.random.PRNGKey(0)
    tok_key, param_key = jax.random.split(key)
    tokens = jax.random.randint(tok_key, (2, N_TOKEN), 0, N_VOCAB, dtype=jnp.int32)
    params = init_clip_params(param_key)

    out = clip_forward(tokens, params)
    out = jax.block_until_ready(out)

    assert out.shape == (2, N_TOKEN, N_EMBD), out.shape
    assert out.dtype == jnp.float32
    assert bool(jnp.isfinite(out).all())
    print("KERNEL_OK")
</pallas_src>

<mosaic_0001>
module attributes {stable_mosaic.version = 11 : i64} {
  func.func @_embedding_kernel(%arg0: i32, %arg1: memref<32xi32, #tpu.memory_space<smem>>, %arg2: memref<256x128xf32, #tpu.memory_space<any>>, %arg3: memref<16x128xf32, #tpu.memory_space<vmem>>, %arg4: memref<16x128xf32, #tpu.memory_space<vmem>>, %arg5: memref<2x16x128xf32, #tpu.memory_space<vmem>>, %arg6: memref<2x16x!tpu.dma_semaphore, #tpu.memory_space<semaphore_mem>>) attributes {dimension_semantics = [#tpu.dimension_semantics<arbitrary>], iteration_bounds = array<i64: 2>, scalar_prefetch = 1 : i64, scratch_operands = 2 : i64, tpu.core_type = #tpu.core_type<tc>, window_params = [{}, {pipeline_mode = #tpu.pipeline_mode<synchronous>, transform_indices = @transform_1, window_bounds = array<i64: 16, 128>}, {transform_indices = @transform_2, window_bounds = array<i64: 16, 128>}]} {
    %c0_i32 = arith.constant 0 : i32
    %0 = arith.cmpi eq, %arg0, %c0_i32 : i32
    %1 = arith.extui %0 : i1 to i32
    %c0_i32_0 = arith.constant 0 : i32
    %2 = arith.cmpi ne, %1, %c0_i32_0 : i32
    scf.if %2 {
      %c0_80 = arith.constant 0 : index
      %103 = memref.load %arg1[%c0_80] : memref<32xi32, #tpu.memory_space<smem>>
      %c0_i32_81 = arith.constant 0 : i32
      %c0_i32_82 = arith.constant 0 : i32
      %c0_i32_83 = arith.constant 0 : i32
      %c0_i32_84 = arith.constant 0 : i32
      %104 = tpu.memref_slice %arg2[%103, %c0_i32_84] : memref<256x128xf32, #tpu.memory_space<any>> -> memref<1x128xf32, #tpu.memory_space<any>>
      %c0_i32_85 = arith.constant 0 : i32
      %c0_i32_86 = arith.constant 0 : i32
      %105 = tpu.memref_slice %arg5[%c0_i32_81, %c0_i32_85, %c0_i32_86] : memref<2x16x128xf32, #tpu.memory_space<vmem>> -> memref<1x1x128xf32, #tpu.memory_space<vmem>>
      %106 = tpu.memref_squeeze %105 : memref<1x1x128xf32, #tpu.memory_space<vmem>> -> memref<1x128xf32, #tpu.memory_space<vmem>>
      %107 = tpu.memref_slice %arg6[%c0_i32_82, %c0_i32_83] : memref<2x16x!tpu.dma_semaphore, #tpu.memory_space<semaphore_mem>> -> memref<1x1x!tpu.dma_semaphore, #tpu.memory_space<semaphore_mem>>
      %108 = tpu.memref_squeeze %107 : memref<1x1x!tpu.dma_semaphore, #tpu.memory_space<semaphore_mem>> -> memref<!tpu.dma_semaphore, #tpu.memory_space<semaphore_mem>>
      tpu.enqueue_dma source(%104 : memref<1x128xf32, #tpu.memory_space<any>>) target(%106 : memref<1x128xf32, #tpu.memory_space<vmem>>) target_semaphore(%108 : memref<!tpu.dma_semaphore, #tpu.memory_space<semaphore_mem>>)
      %c1 = arith.constant 1 : index
      %109 = memref.load %arg1[%c1] : memref<32xi32, #tpu.memory_space<smem>>
      %c0_i32_87 = arith.constant 0 : i32
      %c0_i32_88 = arith.constant 0 : i32
      %c1_i32_89 = arith.constant 1 : i32
      %c0_i32_90 = arith.constant 0 : i32
      %110 = tpu.memref_slice %arg2[%109, %c0_i32_90] : memref<256x128xf32, #tpu.memory_space<any>> -> memref<1x128xf32, #tpu.memory_space<any>>
      %c1_i32_91 = arith.constant 1 : i32
      %c0_i32_92 = arith.constant 0 : i32
      %111 = tpu.memref_slice %arg5[%c0_i32_87, %c1_i32_91, %c0_i32_92] : memref<2x16x128xf32, #tpu.memory_space<vmem>> -> memref<1x1x128xf32, #tpu.memory_space<vmem>>
      %112 = tpu.memref_squeeze %111 : memref<1x1x128xf32, #tpu.memory_space<vmem>> -> memref<1x128xf32, #tpu.memory_space<vmem>>
      %113 = tpu.memref_slice %arg6[%c0_i32_88, %c1_i32_89] : memref<2x16x!tpu.dma_semaphore, #tpu.memory_space<semaphore_mem>> -> memref<1x1x!tpu.dma_semaphore, #tpu.memory_space<semaphore_mem>>
      %114 = tpu.memref_squeeze %113 : memref<1x1x!tpu.dma_semaphore, #tpu.memory_space<semaphore_mem>> -> memref<!tpu.dma_semaphore, #tpu.memory_space<semaphore_mem>>
      tpu.enqueue_dma source(%110 : memref<1x128xf32, #tpu.memory_space<any>>) target(%112 : memref<1x128xf32, #tpu.memory_space<vmem>>) target_semaphore(%114 : memref<!tpu.dma_semaphore, #tpu.memory_space<semaphore_mem>>)
      %c2 = arith.constant 2 : index
      %115 = memref.load %arg1[%c2] : memref<32xi32, #tpu.memory_space<smem>>
      %c0_i32_93 = arith.constant 0 : i32
      %c0_i32_94 = arith.constant 0 : i32
      %c2_i32_95 = arith.constant 2 : i32
      %c0_i32_96 = arith.constant 0 : i32
      %116 = tpu.memref_slice %arg2[%115, %c0_i32_96] : memref<256x128xf32, #tpu.memory_space<any>> -> memref<1x128xf32, #tpu.memory_space<any>>
      %c2_i32_97 = arith.constant 2 : i32
      %c0_i32_98 = arith.constant 0 : i32
      %117 = tpu.memref_slice %arg5[%c0_i32_93, %c2_i32_97, %c0_i32_98] : memref<2x16x128xf32, #tpu.memory_space<vmem>> -> memref<1x1x128xf32, #tpu.memory_space<vmem>>
      %118 = tpu.memref_squeeze %117 : memref<1x1x128xf32, #tpu.memory_space<vmem>> -> memref<1x128xf32, #tpu.memory_space<vmem>>
      %119 = tpu.memref_slice %arg6[%c0_i32_94, %c2_i32_95] : memref<2x16x!tpu.dma_semaphore, #tpu.memory_space<semaphore_mem>> -> memref<1x1x!tpu.dma_semaphore, #tpu.memory_space<semaphore_mem>>
      %120 = tpu.memref_squeeze %119 : memref<1x1x!tpu.dma_semaphore, #tpu.memory_space<semaphore_mem>> -> memref<!tpu.dma_semaphore, #tpu.memory_space<semaphore_mem>>
      tpu.enqueue_dma source(%116 : memref<1x128xf32, #tpu.memory_space<any>>) target(%118 : memref<1x128xf32, #tpu.memory_space<vmem>>) target_semaphore(%120 : memref<!tpu.dma_semaphore, #tpu.memory_space<semaphore_mem>>)
      %c3 = arith.constant 3 : index
      %121 = memref.load %arg1[%c3] : memref<32xi32, #tpu.memory_space<smem>>
      %c0_i32_99 = arith.constant 0 : i32
      %c0_i32_100 = arith.constant 0 : i32
      %c3_i32_101 = arith.constant 3 : i32
      %c0_i32_102 = arith.constant 0 : i32
      %122 = tpu.memref_slice %arg2[%121, %c0_i32_102] : memref<256x128xf32, #tpu.memory_space<any>> -> memref<1x128xf32, #tpu.memory_space<any>>
      %c3_i32_103 = arith.constant 3 : i32
      %c0_i32_104 = arith.constant 0 : i32
      %123 = tpu.memref_slice %arg5[%c0_i32_99, %c3_i32_103, %c0_i32_104] : memref<2x16x128xf32, #tpu.memory_space<vmem>> -> memref<1x1x128xf32, #tpu.memory_space<vmem>>
      %124 = tpu.memref_squeeze %123 : memref<1x1x128xf32, #tpu.memory_space<vmem>> -> memref<1x128xf32, #tpu.memory_space<vmem>>
      %125 = tpu.memref_slice %arg6[%c0_i32_100, %c3_i32_101] : memref<2x16x!tpu.dma_semaphore, #tpu.memory_space<semaphore_mem>> -> memref<1x1x!tpu.dma_semaphore, #tpu.memory_space<semaphore_mem>>
      %126 = tpu.memref_squeeze %125 : memref<1x1x!tpu.dma_semaphore, #tpu.memory_space<semaphore_mem>> -> memref<!tpu.dma_semaphore, #tpu.memory_space<semaphore_mem>>
      tpu.enqueue_dma source(%122 : memref<1x128xf32, #tpu.memory_space<any>>) target(%124 : memref<1x128xf32, #tpu.memory_space<vmem>>) target_semaphore(%126 : memref<!tpu.dma_semaphore, #tpu.memory_space<semaphore_mem>>)
      %c4 = arith.constant 4 : index
      %127 = memref.load %arg1[%c4] : memref<32xi32, #tpu.memory_space<smem>>
      %c0_i32_105 = arith.constant 0 : i32
      %c0_i32_106 = arith.constant 0 : i32
      %c4_i32_107 = arith.constant 4 : i32
      %c0_i32_108 = arith.constant 0 : i32
      %128 = tpu.memref_slice %arg2[%127, %c0_i32_108] : memref<256x128xf32, #tpu.memory_space<any>> -> memref<1x128xf32, #tpu.memory_space<any>>
      %c4_i32_109 = arith.constant 4 : i32
      %c0_i32_110 = arith.constant 0 : i32
      %129 = tpu.memref_slice %arg5[%c0_i32_105, %c4_i32_109, %c0_i32_110] : memref<2x16x128xf32, #tpu.memory_space<vmem>> -> memref<1x1x128xf32, #tpu.memory_space<vmem>>
      %130 = tpu.memref_squeeze %129 : memref<1x1x128xf32, #tpu.memory_space<vmem>> -> memref<1x128xf32, #tpu.memory_space<vmem>>
      %131 = tpu.memref_slice %arg6[%c0_i32_106, %c4_i32_107] : memref<2x16x!tpu.dma_semaphore, #tpu.memory_space<semaphore_mem>> -> memref<1x1x!tpu.dma_semaphore, #tpu.memory_space<semaphore_mem>>
      %132 = tpu.memref_squeeze %131 : memref<1x1x!tpu.dma_semaphore, #tpu.memory_space<semaphore_mem>> -> memref<!tpu.dma_semaphore, #tpu.memory_space<semaphore_mem>>
      tpu.enqueue_dma source(%128 : memref<1x128xf32, #tpu.memory_space<any>>) target(%130 : memref<1x128xf32, #tpu.memory_space<vmem>>) target_semaphore(%132 : memref<!tpu.dma_semaphore, #tpu.memory_space<semaphore_mem>>)
      %c5 = arith.constant 5 : index
      %133 = memref.load %arg1[%c5] : memref<32xi32, #tpu.memory_space<smem>>
      %c0_i32_111 = arith.constant 0 : i32
      %c0_i32_112 = arith.constant 0 : i32
      %c5_i32_113 = arith.constant 5 : i32
      %c0_i32_114 = arith.constant 0 : i32
      %134 = tpu.memref_slice %arg2[%133, %c0_i32_114] : memref<256x128xf32, #tpu.memory_space<any>> -> memref<1x128xf32, #tpu.memory_space<any>>
      %c5_i32_115 = arith.constant 5 : i32
      %c0_i32_116 = arith.constant 0 : i32
      %135 = tpu.memref_slice %arg5[%c0_i32_111, %c5_i32_115, %c0_i32_116] : memref<2x16x128xf32, #tpu.memory_space<vmem>> -> memref<1x1x128xf32, #tpu.memory_space<vmem>>
      %136 = tpu.memref_squeeze %135 : memref<1x1x128xf32, #tpu.memory_space<vmem>> -> memref<1x128xf32, #tpu.memory_space<vmem>>
      %137 = tpu.memref_slice %arg6[%c0_i32_112, %c5_i32_113] : memref<2x16x!tpu.dma_semaphore, #tpu.memory_space<semaphore_mem>> -> memref<1x1x!tpu.dma_semaphore, #tpu.memory_space<semaphore_mem>>
      %138 = tpu.memref_squeeze %137 : memref<1x1x!tpu.dma_semaphore, #tpu.memory_space<semaphore_mem>> -> memref<!tpu.dma_semaphore, #tpu.memory_space<semaphore_mem>>
      tpu.enqueue_dma source(%134 : memref<1x128xf32, #tpu.memory_space<any>>) target(%136 : memref<1x128xf32, #tpu.memory_space<vmem>>) target_semaphore(%138 : memref<!tpu.dma_semaphore, #tpu.memory_space<semaphore_mem>>)
      %c6 = arith.constant 6 : index
      %139 = memref.load %arg1[%c6] : memref<32xi32, #tpu.memory_space<smem>>
      %c0_i32_117 = arith.constant 0 : i32
      %c0_i32_118 = arith.constant 0 : i32
      %c6_i32_119 = arith.constant 6 : i32
      %c0_i32_120 = arith.constant 0 : i32
      %140 = tpu.memref_slice %arg2[%139, %c0_i32_120] : memref<256x128xf32, #tpu.memory_space<any>> -> memref<1x128xf32, #tpu.memory_space<any>>
      %c6_i32_121 = arith.constant 6 : i32
      %c0_i32_122 = arith.constant 0 : i32
      %141 = tpu.memref_slice %arg5[%c0_i32_117, %c6_i32_121, %c0_i32_122] : memref<2x16x128xf32, #tpu.memory_space<vmem>> -> memref<1x1x128xf32, #tpu.memory_space<vmem>>
      %142 = tpu.memref_squeeze %141 : memref<1x1x128xf32, #tpu.memory_space<vmem>> -> memref<1x128xf32, #tpu.memory_space<vmem>>
      %143 = tpu.memref_slice %arg6[%c0_i32_118, %c6_i32_119] : memref<2x16x!tpu.dma_semaphore, #tpu.memory_space<semaphore_mem>> -> memref<1x1x!tpu.dma_semaphore, #tpu.memory_space<semaphore_mem>>
      %144 = tpu.memref_squeeze %143 : memref<1x1x!tpu.dma_semaphore, #tpu.memory_space<semaphore_mem>> -> memref<!tpu.dma_semaphore, #tpu.memory_space<semaphore_mem>>
      tpu.enqueue_dma source(%140 : memref<1x128xf32, #tpu.memory_space<any>>) target(%142 : memref<1x128xf32, #tpu.memory_space<vmem>>) target_semaphore(%144 : memref<!tpu.dma_semaphore, #tpu.memory_space<semaphore_mem>>)
      %c7 = arith.constant 7 : index
      %145 = memref.load %arg1[%c7] : memref<32xi32, #tpu.memory_space<smem>>
      %c0_i32_123 = arith.constant 0 : i32
      %c0_i32_124 = arith.constant 0 : i32
      %c7_i32_125 = arith.constant 7 : i32
      %c0_i32_126 = arith.constant 0 : i32
      %146 = tpu.memref_slice %arg2[%145, %c0_i32_126] : memref<256x128xf32, #tpu.memory_space<any>> -> memref<1x128xf32, #tpu.memory_space<any>>
      %c7_i32_127 = arith.constant 7 : i32
      %c0_i32_128 = arith.constant 0 : i32
      %147 = tpu.memref_slice %arg5[%c0_i32_123, %c7_i32_127, %c0_i32_128] : memref<2x16x128xf32, #tpu.memory_space<vmem>> -> memref<1x1x128xf32, #tpu.memory_space<vmem>>
      %148 = tpu.memref_squeeze %147 : memref<1x1x128xf32, #tpu.memory_space<vmem>> -> memref<1x128xf32, #tpu.memory_space<vmem>>
      %149 = tpu.memref_slice %arg6[%c0_i32_124, %c7_i32_125] : memref<2x16x!tpu.dma_semaphore, #tpu.memory_space<semaphore_mem>> -> memref<1x1x!tpu.dma_semaphore, #tpu.memory_space<semaphore_mem>>
      %150 = tpu.memref_squeeze %149 : memref<1x1x!tpu.dma_semaphore, #tpu.memory_space<semaphore_mem>> -> memref<!tpu.dma_semaphore, #tpu.memory_space<semaphore_mem>>
      tpu.enqueue_dma source(%146 : memref<1x128xf32, #tpu.memory_space<any>>) target(%148 : memref<1x128xf32, #tpu.memory_space<vmem>>) target_semaphore(%150 : memref<!tpu.dma_semaphore, #tpu.memory_space<semaphore_mem>>)
      %c8 = arith.constant 8 : index
      %151 = memref.load %arg1[%c8] : memref<32xi32, #tpu.memory_space<smem>>
      %c0_i32_129 = arith.constant 0 : i32
      %c0_i32_130 = arith.constant 0 : i32
      %c8_i32_131 = arith.constant 8 : i32
      %c0_i32_132 = arith.constant 0 : i32
      %152 = tpu.memref_slice %arg2[%151, %c0_i32_132] : memref<256x128xf32, #tpu.memory_space<any>> -> memref<1x128xf32, #tpu.memory_space<any>>
      %c8_i32_133 = arith.constant 8 : i32
      %c0_i32_134 = arith.constant 0 : i32
      %153 = tpu.memref_slice %arg5[%c0_i32_129, %c8_i32_133, %c0_i32_134] : memref<2x16x128xf32, #tpu.memory_space<vmem>> -> memref<1x1x128xf32, #tpu.memory_space<vmem>>
      %154 = tpu.memref_squeeze %153 : memref<1x1x128xf32, #tpu.memory_space<vmem>> -> memref<1x128xf32, #tpu.memory_space<vmem>>
      %155 = tpu.memref_slice %arg6[%c0_i32_130, %c8_i32_131] : memref<2x16x!tpu.dma_semaphore, #tpu.memory_space<semaphore_mem>> -> memref<1x1x!tpu.dma_semaphore, #tpu.memory_space<semaphore_mem>>
      %156 = tpu.memref_squeeze %155 : memref<1x1x!tpu.dma_semaphore, #tpu.memory_space<semaphore_mem>> -> memref<!tpu.dma_semaphore, #tpu.memory_space<semaphore_mem>>
      tpu.enqueue_dma source(%152 : memref<1x128xf32, #tpu.memory_space<any>>) target(%154 : memref<1x128xf32, #tpu.memory_space<vmem>>) target_semaphore(%156 : memref<!tpu.dma_semaphore, #tpu.memory_space<semaphore_mem>>)
      %c9 = arith.constant 9 : index
      %157 = memref.load %arg1[%c9] : memref<32xi32, #tpu.memory_space<smem>>
      %c0_i32_135 = arith.constant 0 : i32
      %c0_i32_136 = arith.constant 0 : i32
      %c9_i32_137 = arith.constant 9 : i32
      %c0_i32_138 = arith.constant 0 : i32
      %158 = tpu.memref_slice %arg2[%157, %c0_i32_138] : memref<256x128xf32, #tpu.memory_space<any>> -> memref<1x128xf32, #tpu.memory_space<any>>
      %c9_i32_139 = arith.constant 9 : i32
      %c0_i32_140 = arith.constant 0 : i32
      %159 = tpu.memref_slice %arg5[%c0_i32_135, %c9_i32_139, %c0_i32_140] : memref<2x16x128xf32, #tpu.memory_space<vmem>> -> memref<1x1x128xf32, #tpu.memory_space<vmem>>
      %160 = tpu.memref_squeeze %159 : memref<1x1x128xf32, #tpu.memory_space<vmem>> -> memref<1x128xf32, #tpu.memory_space<vmem>>
      %161 = tpu.memref_slice %arg6[%c0_i32_136, %c9_i32_137] : memref<2x16x!tpu.dma_semaphore, #tpu.memory_space<semaphore_mem>> -> memref<1x1x!tpu.dma_semaphore, #tpu.memory_space<semaphore_mem>>
      %162 = tpu.memref_squeeze %161 : memref<1x1x!tpu.dma_semaphore, #tpu.memory_space<semaphore_mem>> -> memref<!tpu.dma_semaphore, #tpu.memory_space<semaphore_mem>>
      tpu.enqueue_dma source(%158 : memref<1x128xf32, #tpu.memory_space<any>>) target(%160 : memref<1x128xf32, #tpu.memory_space<vmem>>) target_semaphore(%162 : memref<!tpu.dma_semaphore, #tpu.memory_space<semaphore_mem>>)
      %c10 = arith.constant 10 : index
      %163 = memref.load %arg1[%c10] : memref<32xi32, #tpu.memory_space<smem>>
      %c0_i32_141 = arith.constant 0 : i32
      %c0_i32_142 = arith.constant 0 : i32
      %c10_i32_143 = arith.constant 10 : i32
      %c0_i32_144 = arith.constant 0 : i32
      %164 = tpu.memref_slice %arg2[%163, %c0_i32_144] : memref<256x128xf32, #tpu.memory_space<any>> -> memref<1x128xf32, #tpu.memory_space<any>>
      %c10_i32_145 = arith.constant 10 : i32
      %c0_i32_146 = arith.constant 0 : i32
      %165 = tpu.memref_slice %arg5[%c0_i32_141, %c10_i32_145, %c0_i32_146] : memref<2x16x128xf32, #tpu.memory_space<vmem>> -> memref<1x1x128xf32, #tpu.memory_space<vmem>>
      %166 = tpu.memref_squeeze %165 : memref<1x1x128xf32, #tpu.memory_space<vmem>> -> memref<1x128xf32, #tpu.memory_space<vmem>>
      %167 = tpu.memref_slice %arg6[%c0_i32_142, %c10_i32_143] : memref<2x16x!tpu.dma_semaphore, #tpu.memory_space<semaphore_mem>> -> memref<1x1x!tpu.dma_semaphore, #tpu.memory_space<semaphore_mem>>
      %168 = tpu.memref_squeeze %167 : memref<1x1x!tpu.dma_semaphore, #tpu.memory_space<semaphore_mem>> -> memref<!tpu.dma_semaphore, #tpu.memory_space<semaphore_mem>>
      tpu.enqueue_dma source(%164 : memref<1x128xf32, #tpu.memory_space<any>>) target(%166 : memref<1x128xf32, #tpu.memory_space<vmem>>) target_semaphore(%168 : memref<!tpu.dma_semaphore, #tpu.memory_space<semaphore_mem>>)
      %c11 = arith.constant 11 : index
      %169 = memref.load %arg1[%c11] : memref<32xi32, #tpu.memory_space<smem>>
      %c0_i32_147 = arith.constant 0 : i32
      %c0_i32_148 = arith.constant 0 : i32
      %c11_i32_149 = arith.constant 11 : i32
      %c0_i32_150 = arith.constant 0 : i32
      %170 = tpu.memref_slice %arg2[%169, %c0_i32_150] : memref<256x128xf32, #tpu.memory_space<any>> -> memref<1x128xf32, #tpu.memory_space<any>>
      %c11_i32_151 = arith.constant 11 : i32
      %c0_i32_152 = arith.constant 0 : i32
      %171 = tpu.memref_slice %arg5[%c0_i32_147, %c11_i32_151, %c0_i32_152] : memref<2x16x128xf32, #tpu.memory_space<vmem>> -> memref<1x1x128xf32, #tpu.memory_space<vmem>>
      %172 = tpu.memref_squeeze %171 : memref<1x1x128xf32, #tpu.memory_space<vmem>> -> memref<1x128xf32, #tpu.memory_space<vmem>>
      %173 = tpu.memref_slice %arg6[%c0_i32_148, %c11_i32_149] : memref<2x16x!tpu.dma_semaphore, #tpu.memory_space<semaphore_mem>> -> memref<1x1x!tpu.dma_semaphore, #tpu.memory_space<semaphore_mem>>
      %174 = tpu.memref_squeeze %173 : memref<1x1x!tpu.dma_semaphore, #tpu.memory_space<semaphore_mem>> -> memref<!tpu.dma_semaphore, #tpu.memory_space<semaphore_mem>>
      tpu.enqueue_dma source(%170 : memref<1x128xf32, #tpu.memory_space<any>>) target(%172 : memref<1x128xf32, #tpu.memory_space<vmem>>) target_semaphore(%174 : memref<!tpu.dma_semaphore, #tpu.memory_space<semaphore_mem>>)
      %c12 = arith.constant 12 : index
      %175 = memref.load %arg1[%c12] : memref<32xi32, #tpu.memory_space<smem>>
      %c0_i32_153 = arith.constant 0 : i32
      %c0_i32_154 = arith.constant 0 : i32
      %c12_i32_155 = arith.constant 12 : i32
      %c0_i32_156 = arith.constant 0 : i32
      %176 = tpu.memref_slice %arg2[%175, %c0_i32_156] : memref<256x128xf32, #tpu.memory_space<any>> -> memref<1x128xf32, #tpu.memory_space<any>>
      %c12_i32_157 = arith.constant 12 : i32
      %c0_i32_158 = arith.constant 0 : i32
      %177 = tpu.memref_slice %arg5[%c0_i32_153, %c12_i32_157, %c0_i32_158] : memref<2x16x128xf32, #tpu.memory_space<vmem>> -> memref<1x1x128xf32, #tpu.memory_space<vmem>>
      %178 = tpu.memref_squeeze %177 : memref<1x1x128xf32, #tpu.memory_space<vmem>> -> memref<1x128xf32, #tpu.memory_space<vmem>>
      %179 = tpu.memref_slice %arg6[%c0_i32_154, %c12_i32_155] : memref<2x16x!tpu.dma_semaphore, #tpu.memory_space<semaphore_mem>> -> memref<1x1x!tpu.dma_semaphore, #tpu.memory_space<semaphore_mem>>
      %180 = tpu.memref_squeeze %179 : memref<1x1x!tpu.dma_semaphore, #tpu.memory_space<semaphore_mem>> -> memref<!tpu.dma_semaphore, #tpu.memory_space<semaphore_mem>>
      tpu.enqueue_dma source(%176 : memref<1x128xf32, #tpu.memory_space<any>>) target(%178 : memref<1x128xf32, #tpu.memory_space<vmem>>) target_semaphore(%180 : memref<!tpu.dma_semaphore, #tpu.memory_space<semaphore_mem>>)
      %c13 = arith.constant 13 : index
      %181 = memref.load %arg1[%c13] : memref<32xi32, #tpu.memory_space<smem>>
      %c0_i32_159 = arith.constant 0 : i32
      %c0_i32_160 = arith.constant 0 : i32
      %c13_i32_161 = arith.constant 13 : i32
      %c0_i32_162 = arith.constant 0 : i32
      %182 = tpu.memref_slice %arg2[%181, %c0_i32_162] : memref<256x128xf32, #tpu.memory_space<any>> -> memref<1x128xf32, #tpu.memory_space<any>>
      %c13_i32_163 = arith.constant 13 : i32
      %c0_i32_164 = arith.constant 0 : i32
      %183 = tpu.memref_slice %arg5[%c0_i32_159, %c13_i32_163, %c0_i32_164] : memref<2x16x128xf32, #tpu.memory_space<vmem>> -> memref<1x1x128xf32, #tpu.memory_space<vmem>>
      %184 = tpu.memref_squeeze %183 : memref<1x1x128xf32, #tpu.memory_space<vmem>> -> memref<1x128xf32, #tpu.memory_space<vmem>>
      %185 = tpu.memref_slice %arg6[%c0_i32_160, %c13_i32_161] : memref<2x16x!tpu.dma_semaphore, #tpu.memory_space<semaphore_mem>> -> memref<1x1x!tpu.dma_semaphore, #tpu.memory_space<semaphore_mem>>
      %186 = tpu.memref_squeeze %185 : memref<1x1x!tpu.dma_semaphore, #tpu.memory_space<semaphore_mem>> -> memref<!tpu.dma_semaphore, #tpu.memory_space<semaphore_mem>>
      tpu.enqueue_dma source(%182 : memref<1x128xf32, #tpu.memory_space<any>>) target(%184 : memref<1x128xf32, #tpu.memory_space<vmem>>) target_semaphore(%186 : memref<!tpu.dma_semaphore, #tpu.memory_space<semaphore_mem>>)
      %c14 = arith.constant 14 : index
      %187 = memref.load %arg1[%c14] : memref<32xi32, #tpu.memory_space<smem>>
      %c0_i32_165 = arith.constant 0 : i32
      %c0_i32_166 = arith.constant 0 : i32
      %c14_i32_167 = arith.constant 14 : i32
      %c0_i32_168 = arith.constant 0 : i32
      %188 = tpu.memref_slice %arg2[%187, %c0_i32_168] : memref<256x128xf32, #tpu.memory_space<any>> -> memref<1x128xf32, #tpu.memory_space<any>>
      %c14_i32_169 = arith.constant 14 : i32
      %c0_i32_170 = arith.constant 0 : i32
      %189 = tpu.memref_slice %arg5[%c0_i32_165, %c14_i32_169, %c0_i32_170] : memref<2x16x128xf32, #tpu.memory_space<vmem>> -> memref<1x1x128xf32, #tpu.memory_space<vmem>>
      %190 = tpu.memref_squeeze %189 : memref<1x1x128xf32, #tpu.memory_space<vmem>> -> memref<1x128xf32, #tpu.memory_space<vmem>>
      %191 = tpu.memref_slice %arg6[%c0_i32_166, %c14_i32_167] : memref<2x16x!tpu.dma_semaphore, #tpu.memory_space<semaphore_mem>> -> memref<1x1x!tpu.dma_semaphore, #tpu.memory_space<semaphore_mem>>
      %192 = tpu.memref_squeeze %191 : memref<1x1x!tpu.dma_semaphore, #tpu.memory_space<semaphore_mem>> -> memref<!tpu.dma_semaphore, #tpu.memory_space<semaphore_mem>>
      tpu.enqueue_dma source(%188 : memref<1x128xf32, #tpu.memory_space<any>>) target(%190 : memref<1x128xf32, #tpu.memory_space<vmem>>) target_semaphore(%192 : memref<!tpu.dma_semaphore, #tpu.memory_space<semaphore_mem>>)
      %c15 = arith.constant 15 : index
      %193 = memref.load %arg1[%c15] : memref<32xi32, #tpu.memory_space<smem>>
      %c0_i32_171 = arith.constant 0 : i32
      %c0_i32_172 = arith.constant 0 : i32
      %c15_i32_173 = arith.constant 15 : i32
      %c0_i32_174 = arith.constant 0 : i32
      %194 = tpu.memref_slice %arg2[%193, %c0_i32_174] : memref<256x128xf32, #tpu.memory_space<any>> -> memref<1x128xf32, #tpu.memory_space<any>>
      %c15_i32_175 = arith.constant 15 : i32
      %c0_i32_176 = arith.constant 0 : i32
      %195 = tpu.memref_slice %arg5[%c0_i32_171, %c15_i32_175, %c0_i32_176] : memref<2x16x128xf32, #tpu.memory_space<vmem>> -> memref<1x1x128xf32, #tpu.memory_space<vmem>>
      %196 = tpu.memref_squeeze %195 : memref<1x1x128xf32, #tpu.memory_space<vmem>> -> memref<1x128xf32, #tpu.memory_space<vmem>>
      %197 = tpu.memref_slice %arg6[%c0_i32_172, %c15_i32_173] : memref<2x16x!tpu.dma_semaphore, #tpu.memory_space<semaphore_mem>> -> memref<1x1x!tpu.dma_semaphore, #tpu.memory_space<semaphore_mem>>
      %198 = tpu.memref_squeeze %197 : memref<1x1x!tpu.dma_semaphore, #tpu.memory_space<semaphore_mem>> -> memref<!tpu.dma_semaphore, #tpu.memory_space<semaphore_mem>>
      tpu.enqueue_dma source(%194 : memref<1x128xf32, #tpu.memory_space<any>>) target(%196 : memref<1x128xf32, #tpu.memory_space<vmem>>) target_semaphore(%198 : memref<!tpu.dma_semaphore, #tpu.memory_space<semaphore_mem>>)
    } else {
    }
    %c1_i32 = arith.constant 1 : i32
    %3 = arith.addi %arg0, %c1_i32 : i32
    %c2_i32 = arith.constant 2 : i32
    %4 = arith.cmpi slt, %3, %c2_i32 : i32
    %5 = arith.extui %4 : i1 to i32
    %c0_i32_1 = arith.constant 0 : i32
    %6 = arith.cmpi ne, %5, %c0_i32_1 : i32
    scf.if %6 {
      %c1_i32_80 = arith.constant 1 : i32
      %103 = arith.addi %arg0, %c1_i32_80 : i32
      %c1_i32_81 = arith.constant 1 : i32
      %104 = arith.addi %arg0, %c1_i32_81 : i32
      %c2_i32_82 = arith.constant 2 : i32
      %c0_i32_83 = arith.constant 0 : i32
      %105 = arith.cmpi eq, %c2_i32_82, %c0_i32_83 : i32
      %c1_i32_84 = arith.constant 1 : i32
      %106 = arith.select %105, %c1_i32_84, %c2_i32_82 : i32
      %107 = arith.remsi %104, %106 : i32
      %c0_i32_85 = arith.constant 0 : i32
      %108 = arith.cmpi ne, %107, %c0_i32_85 : i32
      %c0_i32_86 = arith.constant 0 : i32
      %109 = arith.cmpi slt, %107, %c0_i32_86 : i32
      %c0_i32_87 = arith.constant 0 : i32
      %110 = arith.cmpi slt, %106, %c0_i32_87 : i32
      %111 = arith.xori %109, %110 : i1
      %112 = arith.andi %111, %108 : i1
      %113 = arith.addi %107, %106 : i32
      %114 = arith.select %112, %113, %107 : i32
      %c16_i32 = arith.constant 16 : i32
      %115 = arith.muli %103, %c16_i32 : i32
      %c0_i32_88 = arith.constant 0 : i32
      %116 = arith.addi %115, %c0_i32_88 : i32
      %117 = arith.index_cast %116 : i32 to index
      %118 = memref.load %arg1[%117] : memref<32xi32, #tpu.memory_space<smem>>
      %c0_i32_89 = arith.constant 0 : i32
      %c0_i32_90 = arith.constant 0 : i32
      %119 = tpu.memref_slice %arg2[%118, %c0_i32_90] : memref<256x128xf32, #tpu.memory_space<any>> -> memref<1x128xf32, #tpu.memory_space<any>>
      %c0_i32_91 = arith.constant 0 : i32
      %c0_i32_92 = arith.constant 0 : i32
      %120 = tpu.memref_slice %arg5[%114, %c0_i32_91, %c0_i32_92] : memref<2x16x128xf32, #tpu.memory_space<vmem>> -> memref<1x1x128xf32, #tpu.memory_space<vmem>>
      %121 = tpu.memref_squeeze %120 : memref<1x1x128xf32, #tpu.memory_space<vmem>> -> memref<1x128xf32, #tpu.memory_space<vmem>>
      %122 = tpu.memref_slice %arg6[%114, %c0_i32_89] : memref<2x16x!tpu.dma_semaphore, #tpu.memory_space<semaphore_mem>> -> memref<1x1x!tpu.dma_semaphore, #tpu.memory_space<semaphore_mem>>
      %123 = tpu.memref_squeeze %122 : memref<1x1x!tpu.dma_semaphore, #tpu.memory_space<semaphore_mem>> -> memref<!tpu.dma_semaphore, #tpu.memory_space<semaphore_mem>>
      tpu.enqueue_dma source(%119 : memref<1x128xf32, #tpu.memory_space<any>>) target(%121 : memref<1x128xf32, #tpu.memory_space<vmem>>) target_semaphore(%123 : memref<!tpu.dma_semaphore, #tpu.memory_space<semaphore_mem>>)
      %c1_i32_93 = arith.constant 1 : i32
      %124 = arith.addi %115, %c1_i32_93 : i32
      %125 = arith.index_cast %124 : i32 to index
      %126 = memref.load %arg1[%125] : memref<32xi32, #tpu.memory_space<smem>>
      %c1_i32_94 = arith.constant 1 : i32
      %c0_i32_95 = arith.constant 0 : i32
      %127 = tpu.memref_slice %arg2[%126, %c0_i32_95] : memref<256x128xf32, #tpu.memory_space<any>> -> memref<1x128xf32, #tpu.memory_space<any>>
      %c1_i32_96 = arith.constant 1 : i32
      %c0_i32_97 = arith.constant 0 : i32
      %128 = tpu.memref_slice %arg5[%114, %c1_i32_96, %c0_i32_97] : memref<2x16x128xf32, #tpu.memory_space<vmem>> -> memref<1x1x128xf32, #tpu.memory_space<vmem>>
      %129 = tpu.memref_squeeze %128 : memref<1x1x128xf32, #tpu.memory_space<vmem>> -> memref<1x128xf32, #tpu.memory_space<vmem>>
      %130 = tpu.memref_slice %arg6[%114, %c1_i32_94] : memref<2x16x!tpu.dma_semaphore, #tpu.memory_space<semaphore_mem>> -> memref<1x1x!tpu.dma_semaphore, #tpu.memory_space<semaphore_mem>>
      %131 = tpu.memref_squeeze %130 : memref<1x1x!tpu.dma_semaphore, #tpu.memory_space<semaphore_mem>> -> memref<!tpu.dma_semaphore, #tpu.memory_space<semaphore_mem>>
      tpu.enqueue_dma source(%127 : memref<1x128xf32, #tpu.memory_space<any>>) target(%129 : memref<1x128xf32, #tpu.memory_space<vmem>>) target_semaphore(%131 : memref<!tpu.dma_semaphore, #tpu.memory_space<semaphore_mem>>)
      %c2_i32_98 = arith.constant 2 : i32
      %132 = arith.addi %115, %c2_i32_98 : i32
      %133 = arith.index_cast %132 : i32 to index
      %134 = memref.load %arg1[%133] : memref<32xi32, #tpu.memory_space<smem>>
      %c2_i32_99 = arith.constant 2 : i32
      %c0_i32_100 = arith.constant 0 : i32
      %135 = tpu.memref_slice %arg2[%134, %c0_i32_100] : memref<256x128xf32, #tpu.memory_space<any>> -> memref<1x128xf32, #tpu.memory_space<any>>
      %c2_i32_101 = arith.constant 2 : i32
      %c0_i32_102 = arith.constant 0 : i32
      %136 = tpu.memref_slice %arg5[%114, %c2_i32_101, %c0_i32_102] : memref<2x16x128xf32, #tpu.memory_space<vmem>> -> memref<1x1x128xf32, #tpu.memory_space<vmem>>
      %137 = tpu.memref_squeeze %136 : memref<1x1x128xf32, #tpu.memory_space<vmem>> -> memref<1x128xf32, #tpu.memory_space<vmem>>
      %138 = tpu.memref_slice %arg6[%114, %c2_i32_99] : memref<2x16x!tpu.dma_semaphore, #tpu.memory_space<semaphore_mem>> -> memref<1x1x!tpu.dma_semaphore, #tpu.memory_space<semaphore_mem>>
      %139 = tpu.memref_squeeze %138 : memref<1x1x!tpu.dma_semaphore, #tpu.memory_space<semaphore_mem>> -> memref<!tpu.dma_semaphore, #tpu.memory_space<semaphore_mem>>
      tpu.enqueue_dma source(%135 : memref<1x128xf32, #tpu.memory_space<any>>) target(%137 : memref<1x128xf32, #tpu.memory_space<vmem>>) target_semaphore(%139 : memref<!tpu.dma_semaphore, #tpu.memory_space<semaphore_mem>>)
      %c3_i32_103 = arith.constant 3 : i32
      %140 = arith.addi %115, %c3_i32_103 : i32
      %141 = arith.index_cast %140 : i32 to index
      %142 = memref.load %arg1[%141] : memref<32xi32, #tpu.memory_space<smem>>
      %c3_i32_104 = arith.constant 3 : i32
      %c0_i32_105 = arith.constant 0 : i32
      %143 = tpu.memref_slice %arg2[%142, %c0_i32_105] : memref<256x128xf32, #tpu.memory_space<any>> -> memref<1x128xf32, #tpu.memory_space<any>>
      %c3_i32_106 = arith.constant 3 : i32
      %c0_i32_107 = arith.constant 0 : i32
      %144 = tpu.memref_slice %arg5[%114, %c3_i32_106, %c0_i32_107] : memref<2x16x128xf32, #tpu.memory_space<vmem>> -> memref<1x1x128xf32, #tpu.memory_space<vmem>>
      %145 = tpu.memref_squeeze %144 : memref<1x1x128xf32, #tpu.memory_space<vmem>> -> memref<1x128xf32, #tpu.memory_space<vmem>>
      %146 = tpu.memref_slice %arg6[%114, %c3_i32_104] : memref<2x16x!tpu.dma_semaphore, #tpu.memory_space<semaphore_mem>> -> memref<1x1x!tpu.dma_semaphore, #tpu.memory_space<semaphore_mem>>
      %147 = tpu.memref_squeeze %146 : memref<1x1x!tpu.dma_semaphore, #tpu.memory_space<semaphore_mem>> -> memref<!tpu.dma_semaphore, #tpu.memory_space<semaphore_mem>>
      tpu.enqueue_dma source(%143 : memref<1x128xf32, #tpu.memory_space<any>>) target(%145 : memref<1x128xf32, #tpu.memory_space<vmem>>) target_semaphore(%147 : memref<!tpu.dma_semaphore, #tpu.memory_space<semaphore_mem>>)
      %c4_i32_108 = arith.constant 4 : i32
      %148 = arith.addi %115, %c4_i32_108 : i32
      %149 = arith.index_cast %148 : i32 to index
      %150 = memref.load %arg1[%149] : memref<32xi32, #tpu.memory_space<smem>>
      %c4_i32_109 = arith.constant 4 : i32
      %c0_i32_110 = arith.constant 0 : i32
      %151 = tpu.memref_slice %arg2[%150, %c0_i32_110] : memref<256x128xf32, #tpu.memory_space<any>> -> memref<1x128xf32, #tpu.memory_space<any>>
      %c4_i32_111 = arith.constant 4 : i32
      %c0_i32_112 = arith.constant 0 : i32
      %152 = tpu.memref_slice %arg5[%114, %c4_i32_111, %c0_i32_112] : memref<2x16x128xf32, #tpu.memory_space<vmem>> -> memref<1x1x128xf32, #tpu.memory_space<vmem>>
      %153 = tpu.memref_squeeze %152 : memref<1x1x128xf32, #tpu.memory_space<vmem>> -> memref<1x128xf32, #tpu.memory_space<vmem>>
      %154 = tpu.memref_slice %arg6[%114, %c4_i32_109] : memref<2x16x!tpu.dma_semaphore, #tpu.memory_space<semaphore_mem>> -> memref<1x1x!tpu.dma_semaphore, #tpu.memory_space<semaphore_mem>>
      %155 = tpu.memref_squeeze %154 : memref<1x1x!tpu.dma_semaphore, #tpu.memory_space<semaphore_mem>> -> memref<!tpu.dma_semaphore, #tpu.memory_space<semaphore_mem>>
      tpu.enqueue_dma source(%151 : memref<1x128xf32, #tpu.memory_space<any>>) target(%153 : memref<1x128xf32, #tpu.memory_space<vmem>>) target_semaphore(%155 : memref<!tpu.dma_semaphore, #tpu.memory_space<semaphore_mem>>)
      %c5_i32_113 = arith.constant 5 : i32
      %156 = arith.addi %115, %c5_i32_113 : i32
      %157 = arith.index_cast %156 : i32 to index
      %158 = memref.load %arg1[%157] : memref<32xi32, #tpu.memory_space<smem>>
      %c5_i32_114 = arith.constant 5 : i32
      %c0_i32_115 = arith.constant 0 : i32
      %159 = tpu.memref_slice %arg2[%158, %c0_i32_115] : memref<256x128xf32, #tpu.memory_space<any>> -> memref<1x128xf32, #tpu.memory_space<any>>
      %c5_i32_116 = arith.constant 5 : i32
      %c0_i32_117 = arith.constant 0 : i32
      %160 = tpu.memref_slice %arg5[%114, %c5_i32_116, %c0_i32_117] : memref<2x16x128xf32, #tpu.memory_space<vmem>> -> memref<1x1x128xf32, #tpu.memory_space<vmem>>
      %161 = tpu.memref_squeeze %160 : memref<1x1x128xf32, #tpu.memory_space<vmem>> -> memref<1x128xf32, #tpu.memory_space<vmem>>
      %162 = tpu.memref_slice %arg6[%114, %c5_i32_114] : memref<2x16x!tpu.dma_semaphore, #tpu.memory_space<semaphore_mem>> -> memref<1x1x!tpu.dma_semaphore, #tpu.memory_space<semaphore_mem>>
      %163 = tpu.memref_squeeze %162 : memref<1x1x!tpu.dma_semaphore, #tpu.memory_space<semaphore_mem>> -> memref<!tpu.dma_semaphore, #tpu.memory_space<semaphore_mem>>
      tpu.enqueue_dma source(%159 : memref<1x128xf32, #tpu.memory_space<any>>) target(%161 : memref<1x128xf32, #tpu.memory_space<vmem>>) target_semaphore(%163 : memref<!tpu.dma_semaphore, #tpu.memory_space<semaphore_mem>>)
      %c6_i32_118 = arith.constant 6 : i32
      %164 = arith.addi %115, %c6_i32_118 : i32
      %165 = arith.index_cast %164 : i32 to index
      %166 = memref.load %arg1[%165] : memref<32xi32, #tpu.memory_space<smem>>
      %c6_i32_119 = arith.constant 6 : i32
      %c0_i32_120 = arith.constant 0 : i32
      %167 = tpu.memref_slice %arg2[%166, %c0_i32_120] : memref<256x128xf32, #tpu.memory_space<any>> -> memref<1x128xf32, #tpu.memory_space<any>>
      %c6_i32_121 = arith.constant 6 : i32
      %c0_i32_122 = arith.constant 0 : i32
      %168 = tpu.memref_slice %arg5[%114, %c6_i32_121, %c0_i32_122] : memref<2x16x128xf32, #tpu.memory_space<vmem>> -> memref<1x1x128xf32, #tpu.memory_space<vmem>>
      %169 = tpu.memref_squeeze %168 : memref<1x1x128xf32, #tpu.memory_space<vmem>> -> memref<1x128xf32, #tpu.memory_space<vmem>>
      %170 = tpu.memref_slice %arg6[%114, %c6_i32_119] : memref<2x16x!tpu.dma_semaphore, #tpu.memory_space<semaphore_mem>> -> memref<1x1x!tpu.dma_semaphore, #tpu.memory_space<semaphore_mem>>
      %171 = tpu.memref_squeeze %170 : memref<1x1x!tpu.dma_semaphore, #tpu.memory_space<semaphore_mem>> -> memref<!tpu.dma_semaphore, #tpu.memory_space<semaphore_mem>>
      tpu.enqueue_dma source(%167 : memref<1x128xf32, #tpu.memory_space<any>>) target(%169 : memref<1x128xf32, #tpu.memory_space<vmem>>) target_semaphore(%171 : memref<!tpu.dma_semaphore, #tpu.memory_space<semaphore_mem>>)
      %c7_i32_123 = arith.constant 7 : i32
      %172 = arith.addi %115, %c7_i32_123 : i32
      %173 = arith.index_cast %172 : i32 to index
      %174 = memref.load %arg1[%173] : memref<32xi32, #tpu.memory_space<smem>>
      %c7_i32_124 = arith.constant 7 : i32
      %c0_i32_125 = arith.constant 0 : i32
      %175 = tpu.memref_slice %arg2[%174, %c0_i32_125] : memref<256x128xf32, #tpu.memory_space<any>> -> memref<1x128xf32, #tpu.memory_space<any>>
      %c7_i32_126 = arith.constant 7 : i32
      %c0_i32_127 = arith.constant 0 : i32
      %176 = tpu.memref_slice %arg5[%114, %c7_i32_126, %c0_i32_127] : memref<2x16x128xf32, #tpu.memory_space<vmem>> -> memref<1x1x128xf32, #tpu.memory_space<vmem>>
      %177 = tpu.memref_squeeze %176 : memref<1x1x128xf32, #tpu.memory_space<vmem>> -> memref<1x128xf32, #tpu.memory_space<vmem>>
      %178 = tpu.memref_slice %arg6[%114, %c7_i32_124] : memref<2x16x!tpu.dma_semaphore, #tpu.memory_space<semaphore_mem>> -> memref<1x1x!tpu.dma_semaphore, #tpu.memory_space<semaphore_mem>>
      %179 = tpu.memref_squeeze %178 : memref<1x1x!tpu.dma_semaphore, #tpu.memory_space<semaphore_mem>> -> memref<!tpu.dma_semaphore, #tpu.memory_space<semaphore_mem>>
      tpu.enqueue_dma source(%175 : memref<1x128xf32, #tpu.memory_space<any>>) target(%177 : memref<1x128xf32, #tpu.memory_space<vmem>>) target_semaphore(%179 : memref<!tpu.dma_semaphore, #tpu.memory_space<semaphore_mem>>)
      %c8_i32_128 = arith.constant 8 : i32
      %180 = arith.addi %115, %c8_i32_128 : i32
      %181 = arith.index_cast %180 : i32 to index
      %182 = memref.load %arg1[%181] : memref<32xi32, #tpu.memory_space<smem>>
      %c8_i32_129 = arith.constant 8 : i32
      %c0_i32_130 = arith.constant 0 : i32
      %183 = tpu.memref_slice %arg2[%182, %c0_i32_130] : memref<256x128xf32, #tpu.memory_space<any>> -> memref<1x128xf32, #tpu.memory_space<any>>
      %c8_i32_131 = arith.constant 8 : i32
      %c0_i32_132 = arith.constant 0 : i32
      %184 = tpu.memref_slice %arg5[%114, %c8_i32_131, %c0_i32_132] : memref<2x16x128xf32, #tpu.memory_space<vmem>> -> memref<1x1x128xf32, #tpu.memory_space<vmem>>
      %185 = tpu.memref_squeeze %184 : memref<1x1x128xf32, #tpu.memory_space<vmem>> -> memref<1x128xf32, #tpu.memory_space<vmem>>
      %186 = tpu.memref_slice %arg6[%114, %c8_i32_129] : memref<2x16x!tpu.dma_semaphore, #tpu.memory_space<semaphore_mem>> -> memref<1x1x!tpu.dma_semaphore, #tpu.memory_space<semaphore_mem>>
      %187 = tpu.memref_squeeze %186 : memref<1x1x!tpu.dma_semaphore, #tpu.memory_space<semaphore_mem>> -> memref<!tpu.dma_semaphore, #tpu.memory_space<semaphore_mem>>
      tpu.enqueue_dma source(%183 : memref<1x128xf32, #tpu.memory_space<any>>) target(%185 : memref<1x128xf32, #tpu.memory_space<vmem>>) target_semaphore(%187 : memref<!tpu.dma_semaphore, #tpu.memory_space<semaphore_mem>>)
      %c9_i32_133 = arith.constant 9 : i32
      %188 = arith.addi %115, %c9_i32_133 : i32
      %189 = arith.index_cast %188 : i32 to index
      %190 = memref.load %arg1[%189] : memref<32xi32, #tpu.memory_space<smem>>
      %c9_i32_134 = arith.constant 9 : i32
      %c0_i32_135 = arith.constant 0 : i32
      %191 = tpu.memref_slice %arg2[%190, %c0_i32_135] : memref<256x128xf32, #tpu.memory_space<any>> -> memref<1x128xf32, #tpu.memory_space<any>>
      %c9_i32_136 = arith.constant 9 : i32
      %c0_i32_137 = arith.constant 0 : i32
      %192 = tpu.memref_slice %arg5[%114, %c9_i32_136, %c0_i32_137] : memref<2x16x128xf32, #tpu.memory_space<vmem>> -> memref<1x1x128xf32, #tpu.memory_space<vmem>>
      %193 = tpu.memref_squeeze %192 : memref<1x1x128xf32, #tpu.memory_space<vmem>> -> memref<1x128xf32, #tpu.memory_space<vmem>>
      %194 = tpu.memref_slice %arg6[%114, %c9_i32_134] : memref<2x16x!tpu.dma_semaphore, #tpu.memory_space<semaphore_mem>> -> memref<1x1x!tpu.dma_semaphore, #tpu.memory_space<semaphore_mem>>
      %195 = tpu.memref_squeeze %194 : memref<1x1x!tpu.dma_semaphore, #tpu.memory_space<semaphore_mem>> -> memref<!tpu.dma_semaphore, #tpu.memory_space<semaphore_mem>>
      tpu.enqueue_dma source(%191 : memref<1x128xf32, #tpu.memory_space<any>>) target(%193 : memref<1x128xf32, #tpu.memory_space<vmem>>) target_semaphore(%195 : memref<!tpu.dma_semaphore, #tpu.memory_space<semaphore_mem>>)
      %c10_i32_138 = arith.constant 10 : i32
      %196 = arith.addi %115, %c10_i32_138 : i32
      %197 = arith.index_cast %196 : i32 to index
      %198 = memref.load %arg1[%197] : memref<32xi32, #tpu.memory_space<smem>>
      %c10_i32_139 = arith.constant 10 : i32
      %c0_i32_140 = arith.constant 0 : i32
      %199 = tpu.memref_slice %arg2[%198, %c0_i32_140] : memref<256x128xf32, #tpu.memory_space<any>> -> memref<1x128xf32, #tpu.memory_space<any>>
      %c10_i32_141 = arith.constant 10 : i32
      %c0_i32_142 = arith.constant 0 : i32
      %200 = tpu.memref_slice %arg5[%114, %c10_i32_141, %c0_i32_142] : memref<2x16x128xf32, #tpu.memory_space<vmem>> -> memref<1x1x128xf32, #tpu.memory_space<vmem>>
      %201 = tpu.memref_squeeze %200 : memref<1x1x128xf32, #tpu.memory_space<vmem>> -> memref<1x128xf32, #tpu.memory_space<vmem>>
      %202 = tpu.memref_slice %arg6[%114, %c10_i32_139] : memref<2x16x!tpu.dma_semaphore, #tpu.memory_space<semaphore_mem>> -> memref<1x1x!tpu.dma_semaphore, #tpu.memory_space<semaphore_mem>>
      %203 = tpu.memref_squeeze %202 : memref<1x1x!tpu.dma_semaphore, #tpu.memory_space<semaphore_mem>> -> memref<!tpu.dma_semaphore, #tpu.memory_space<semaphore_mem>>
      tpu.enqueue_dma source(%199 : memref<1x128xf32, #tpu.memory_space<any>>) target(%201 : memref<1x128xf32, #tpu.memory_space<vmem>>) target_semaphore(%203 : memref<!tpu.dma_semaphore, #tpu.memory_space<semaphore_mem>>)
      %c11_i32_143 = arith.constant 11 : i32
      %204 = arith.addi %115, %c11_i32_143 : i32
      %205 = arith.index_cast %204 : i32 to index
      %206 = memref.load %arg1[%205] : memref<32xi32, #tpu.memory_space<smem>>
      %c11_i32_144 = arith.constant 11 : i32
      %c0_i32_145 = arith.constant 0 : i32
      %207 = tpu.memref_slice %arg2[%206, %c0_i32_145] : memref<256x128xf32, #tpu.memory_space<any>> -> memref<1x128xf32, #tpu.memory_space<any>>
      %c11_i32_146 = arith.constant 11 : i32
      %c0_i32_147 = arith.constant 0 : i32
      %208 = tpu.memref_slice %arg5[%114, %c11_i32_146, %c0_i32_147] : memref<2x16x128xf32, #tpu.memory_space<vmem>> -> memref<1x1x128xf32, #tpu.memory_space<vmem>>
      %209 = tpu.memref_squeeze %208 : memref<1x1x128xf32, #tpu.memory_space<vmem>> -> memref<1x128xf32, #tpu.memory_space<vmem>>
      %210 = tpu.memref_slice %arg6[%114, %c11_i32_144] : memref<2x16x!tpu.dma_semaphore, #tpu.memory_space<semaphore_mem>> -> memref<1x1x!tpu.dma_semaphore, #tpu.memory_space<semaphore_mem>>
      %211 = tpu.memref_squeeze %210 : memref<1x1x!tpu.dma_semaphore, #tpu.memory_space<semaphore_mem>> -> memref<!tpu.dma_semaphore, #tpu.memory_space<semaphore_mem>>
      tpu.enqueue_dma source(%207 : memref<1x128xf32, #tpu.memory_space<any>>) target(%209 : memref<1x128xf32, #tpu.memory_space<vmem>>) target_semaphore(%211 : memref<!tpu.dma_semaphore, #tpu.memory_space<semaphore_mem>>)
      %c12_i32_148 = arith.constant 12 : i32
      %212 = arith.addi %115, %c12_i32_148 : i32
      %213 = arith.index_cast %212 : i32 to index
      %214 = memref.load %arg1[%213] : memref<32xi32, #tpu.memory_space<smem>>
      %c12_i32_149 = arith.constant 12 : i32
      %c0_i32_150 = arith.constant 0 : i32
      %215 = tpu.memref_slice %arg2[%214, %c0_i32_150] : memref<256x128xf32, #tpu.memory_space<any>> -> memref<1x128xf32, #tpu.memory_space<any>>
      %c12_i32_151 = arith.constant 12 : i32
      %c0_i32_152 = arith.constant 0 : i32
      %216 = tpu.memref_slice %arg5[%114, %c12_i32_151, %c0_i32_152] : memref<2x16x128xf32, #tpu.memory_space<vmem>> -> memref<1x1x128xf32, #tpu.memory_space<vmem>>
      %217 = tpu.memref_squeeze %216 : memref<1x1x128xf32, #tpu.memory_space<vmem>> -> memref<1x128xf32, #tpu.memory_space<vmem>>
      %218 = tpu.memref_slice %arg6[%114, %c12_i32_149] : memref<2x16x!tpu.dma_semaphore, #tpu.memory_space<semaphore_mem>> -> memref<1x1x!tpu.dma_semaphore, #tpu.memory_space<semaphore_mem>>
      %219 = tpu.memref_squeeze %218 : memref<1x1x!tpu.dma_semaphore, #tpu.memory_space<semaphore_mem>> -> memref<!tpu.dma_semaphore, #tpu.memory_space<semaphore_mem>>
      tpu.enqueue_dma source(%215 : memref<1x128xf32, #tpu.memory_space<any>>) target(%217 : memref<1x128xf32, #tpu.memory_space<vmem>>) target_semaphore(%219 : memref<!tpu.dma_semaphore, #tpu.memory_space<semaphore_mem>>)
      %c13_i32_153 = arith.constant 13 : i32
      %220 = arith.addi %115, %c13_i32_153 : i32
      %221 = arith.index_cast %220 : i32 to index
      %222 = memref.load %arg1[%221] : memref<32xi32, #tpu.memory_space<smem>>
      %c13_i32_154 = arith.constant 13 : i32
      %c0_i32_155 = arith.constant 0 : i32
      %223 = tpu.memref_slice %arg2[%222, %c0_i32_155] : memref<256x128xf32, #tpu.memory_space<any>> -> memref<1x128xf32, #tpu.memory_space<any>>
      %c13_i32_156 = arith.constant 13 : i32
      %c0_i32_157 = arith.constant 0 : i32
      %224 = tpu.memref_slice %arg5[%114, %c13_i32_156, %c0_i32_157] : memref<2x16x128xf32, #tpu.memory_space<vmem>> -> memref<1x1x128xf32, #tpu.memory_space<vmem>>
      %225 = tpu.memref_squeeze %224 : memref<1x1x128xf32, #tpu.memory_space<vmem>> -> memref<1x128xf32, #tpu.memory_space<vmem>>
      %226 = tpu.memref_slice %arg6[%114, %c13_i32_154] : memref<2x16x!tpu.dma_semaphore, #tpu.memory_space<semaphore_mem>> -> memref<1x1x!tpu.dma_semaphore, #tpu.memory_space<semaphore_mem>>
      %227 = tpu.memref_squeeze %226 : memref<1x1x!tpu.dma_semaphore, #tpu.memory_space<semaphore_mem>> -> memref<!tpu.dma_semaphore, #tpu.memory_space<semaphore_mem>>
      tpu.enqueue_dma source(%223 : memref<1x128xf32, #tpu.memory_space<any>>) target(%225 : memref<1x128xf32, #tpu.memory_space<vmem>>) target_semaphore(%227 : memref<!tpu.dma_semaphore, #tpu.memory_space<semaphore_mem>>)
      %c14_i32_158 = arith.constant 14 : i32
      %228 = arith.addi %115, %c14_i32_158 : i32
      %229 = arith.index_cast %228 : i32 to index
      %230 = memref.load %arg1[%229] : memref<32xi32, #tpu.memory_space<smem>>
      %c14_i32_159 = arith.constant 14 : i32
      %c0_i32_160 = arith.constant 0 : i32
      %231 = tpu.memref_slice %arg2[%230, %c0_i32_160] : memref<256x128xf32, #tpu.memory_space<any>> -> memref<1x128xf32, #tpu.memory_space<any>>
      %c14_i32_161 = arith.constant 14 : i32
      %c0_i32_162 = arith.constant 0 : i32
      %232 = tpu.memref_slice %arg5[%114, %c14_i32_161, %c0_i32_162] : memref<2x16x128xf32, #tpu.memory_space<vmem>> -> memref<1x1x128xf32, #tpu.memory_space<vmem>>
      %233 = tpu.memref_squeeze %232 : memref<1x1x128xf32, #tpu.memory_space<vmem>> -> memref<1x128xf32, #tpu.memory_space<vmem>>
      %234 = tpu.memref_slice %arg6[%114, %c14_i32_159] : memref<2x16x!tpu.dma_semaphore, #tpu.memory_space<semaphore_mem>> -> memref<1x1x!tpu.dma_semaphore, #tpu.memory_space<semaphore_mem>>
      %235 = tpu.memref_squeeze %234 : memref<1x1x!tpu.dma_semaphore, #tpu.memory_space<semaphore_mem>> -> memref<!tpu.dma_semaphore, #tpu.memory_space<semaphore_mem>>
      tpu.enqueue_dma source(%231 : memref<1x128xf32, #tpu.memory_space<any>>) target(%233 : memref<1x128xf32, #tpu.memory_space<vmem>>) target_semaphore(%235 : memref<!tpu.dma_semaphore, #tpu.memory_space<semaphore_mem>>)
      %c15_i32_163 = arith.constant 15 : i32
      %236 = arith.addi %115, %c15_i32_163 : i32
      %237 = arith.index_cast %236 : i32 to index
      %238 = memref.load %arg1[%237] : memref<32xi32, #tpu.memory_space<smem>>
      %c15_i32_164 = arith.constant 15 : i32
      %c0_i32_165 = arith.constant 0 : i32
      %239 = tpu.memref_slice %arg2[%238, %c0_i32_165] : memref<256x128xf32, #tpu.memory_space<any>> -> memref<1x128xf32, #tpu.memory_space<any>>
      %c15_i32_166 = arith.constant 15 : i32
      %c0_i32_167 = arith.constant 0 : i32
      %240 = tpu.memref_slice %arg5[%114, %c15_i32_166, %c0_i32_167] : memref<2x16x128xf32, #tpu.memory_space<vmem>> -> memref<1x1x128xf32, #tpu.memory_space<vmem>>
      %241 = tpu.memref_squeeze %240 : memref<1x1x128xf32, #tpu.memory_space<vmem>> -> memref<1x128xf32, #tpu.memory_space<vmem>>
      %242 = tpu.memref_slice %arg6[%114, %c15_i32_164] : memref<2x16x!tpu.dma_semaphore, #tpu.memory_space<semaphore_mem>> -> memref<1x1x!tpu.dma_semaphore, #tpu.memory_space<semaphore_mem>>
      %243 = tpu.memref_squeeze %242 : memref<1x1x!tpu.dma_semaphore, #tpu.memory_space<semaphore_mem>> -> memref<!tpu.dma_semaphore, #tpu.memory_space<semaphore_mem>>
      tpu.enqueue_dma source(%239 : memref<1x128xf32, #tpu.memory_space<any>>) target(%241 : memref<1x128xf32, #tpu.memory_space<vmem>>) target_semaphore(%243 : memref<!tpu.dma_semaphore, #tpu.memory_space<semaphore_mem>>)
    } else {
    }
    %c2_i32_2 = arith.constant 2 : i32
    %c0_i32_3 = arith.constant 0 : i32
    %7 = arith.cmpi eq, %c2_i32_2, %c0_i32_3 : i32
    %c1_i32_4 = arith.constant 1 : i32
    %8 = arith.select %7, %c1_i32_4, %c2_i32_2 : i32
    %9 = arith.remsi %arg0, %8 : i32
    %c0_i32_5 = arith.constant 0 : i32
    %10 = arith.cmpi ne, %9, %c0_i32_5 : i32
    %c0_i32_6 = arith.constant 0 : i32
    %11 = arith.cmpi slt, %9, %c0_i32_6 : i32
    %c0_i32_7 = arith.constant 0 : i32
    %12 = arith.cmpi slt, %8, %c0_i32_7 : i32
    %13 = arith.xori %11, %12 : i1
    %14 = arith.andi %13, %10 : i1
    %15 = arith.addi %9, %8 : i32
    %16 = arith.select %14, %15, %9 : i32
    %c0_i32_8 = arith.constant 0 : i32
    %c0_i32_9 = arith.constant 0 : i32
    %c0_i32_10 = arith.constant 0 : i32
    %17 = tpu.memref_slice %arg2[%c0_i32_9, %c0_i32_10] : memref<256x128xf32, #tpu.memory_space<any>> -> memref<1x128xf32, #tpu.memory_space<any>>
    %c0_i32_11 = arith.constant 0 : i32
    %c0_i32_12 = arith.constant 0 : i32
    %18 = tpu.memref_slice %arg5[%16, %c0_i32_11, %c0_i32_12] : memref<2x16x128xf32, #tpu.memory_space<vmem>> -> memref<1x1x128xf32, #tpu.memory_space<vmem>>
    %19 = tpu.memref_squeeze %18 : memref<1x1x128xf32, #tpu.memory_space<vmem>> -> memref<1x128xf32, #tpu.memory_space<vmem>>
    %20 = tpu.memref_slice %arg6[%16, %c0_i32_8] : memref<2x16x!tpu.dma_semaphore, #tpu.memory_space<semaphore_mem>> -> memref<1x1x!tpu.dma_semaphore, #tpu.memory_space<semaphore_mem>>
    %21 = tpu.memref_squeeze %20 : memref<1x1x!tpu.dma_semaphore, #tpu.memory_space<semaphore_mem>> -> memref<!tpu.dma_semaphore, #tpu.memory_space<semaphore_mem>>
    tpu.wait_dma2 semaphore(%21 : memref<!tpu.dma_semaphore, #tpu.memory_space<semaphore_mem>>) src(%17 : memref<1x128xf32, #tpu.memory_space<any>>) dst(%19 : memref<1x128xf32, #tpu.memory_space<vmem>>)
    %c1_i32_13 = arith.constant 1 : i32
    %c0_i32_14 = arith.constant 0 : i32
    %c0_i32_15 = arith.constant 0 : i32
    %22 = tpu.memref_slice %arg2[%c0_i32_14, %c0_i32_15] : memref<256x128xf32, #tpu.memory_space<any>> -> memref<1x128xf32, #tpu.memory_space<any>>
    %c1_i32_16 = arith.constant 1 : i32
    %c0_i32_17 = arith.constant 0 : i32
    %23 = tpu.memref_slice %arg5[%16, %c1_i32_16, %c0_i32_17] : memref<2x16x128xf32, #tpu.memory_space<vmem>> -> memref<1x1x128xf32, #tpu.memory_space<vmem>>
    %24 = tpu.memref_squeeze %23 : memref<1x1x128xf32, #tpu.memory_space<vmem>> -> memref<1x128xf32, #tpu.memory_space<vmem>>
    %25 = tpu.memref_slice %arg6[%16, %c1_i32_13] : memref<2x16x!tpu.dma_semaphore, #tpu.memory_space<semaphore_mem>> -> memref<1x1x!tpu.dma_semaphore, #tpu.memory_space<semaphore_mem>>
    %26 = tpu.memref_squeeze %25 : memref<1x1x!tpu.dma_semaphore, #tpu.memory_space<semaphore_mem>> -> memref<!tpu.dma_semaphore, #tpu.memory_space<semaphore_mem>>
    tpu.wait_dma2 semaphore(%26 : memref<!tpu.dma_semaphore, #tpu.memory_space<semaphore_mem>>) src(%22 : memref<1x128xf32, #tpu.memory_space<any>>) dst(%24 : memref<1x128xf32, #tpu.memory_space<vmem>>)
    %c2_i32_18 = arith.constant 2 : i32
    %c0_i32_19 = arith.constant 0 : i32
    %c0_i32_20 = arith.constant 0 : i32
    %27 = tpu.memref_slice %arg2[%c0_i32_19, %c0_i32_20] : memref<256x128xf32, #tpu.memory_space<any>> -> memref<1x128xf32, #tpu.memory_space<any>>
    %c2_i32_21 = arith.constant 2 : i32
    %c0_i32_22 = arith.constant 0 : i32
    %28 = tpu.memref_slice %arg5[%16, %c2_i32_21, %c0_i32_22] : memref<2x16x128xf32, #tpu.memory_space<vmem>> -> memref<1x1x128xf32, #tpu.memory_space<vmem>>
    %29 = tpu.memref_squeeze %28 : memref<1x1x128xf32, #tpu.memory_space<vmem>> -> memref<1x128xf32, #tpu.memory_space<vmem>>
    %30 = tpu.memref_slice %arg6[%16, %c2_i32_18] : memref<2x16x!tpu.dma_semaphore, #tpu.memory_space<semaphore_mem>> -> memref<1x1x!tpu.dma_semaphore, #tpu.memory_space<semaphore_mem>>
    %31 = tpu.memref_squeeze %30 : memref<1x1x!tpu.dma_semaphore, #tpu.memory_space<semaphore_mem>> -> memref<!tpu.dma_semaphore, #tpu.memory_space<semaphore_mem>>
    tpu.wait_dma2 semaphore(%31 : memref<!tpu.dma_semaphore, #tpu.memory_space<semaphore_mem>>) src(%27 : memref<1x128xf32, #tpu.memory_space<any>>) dst(%29 : memref<1x128xf32, #tpu.memory_space<vmem>>)
    %c3_i32 = arith.constant 3 : i32
    %c0_i32_23 = arith.constant 0 : i32
    %c0_i32_24 = arith.constant 0 : i32
    %32 = tpu.memref_slice %arg2[%c0_i32_23, %c0_i32_24] : memref<256x128xf32, #tpu.memory_space<any>> -> memref<1x128xf32, #tpu.memory_space<any>>
    %c3_i32_25 = arith.constant 3 : i32
    %c0_i32_26 = arith.constant 0 : i32
    %33 = tpu.memref_slice %arg5[%16, %c3_i32_25, %c0_i32_26] : memref<2x16x128xf32, #tpu.memory_space<vmem>> -> memref<1x1x128xf32, #tpu.memory_space<vmem>>
    %34 = tpu.memref_squeeze %33 : memref<1x1x128xf32, #tpu.memory_space<vmem>> -> memref<1x128xf32, #tpu.memory_space<vmem>>
    %35 = tpu.memref_slice %arg6[%16, %c3_i32] : memref<2x16x!tpu.dma_semaphore, #tpu.memory_space<semaphore_mem>> -> memref<1x1x!tpu.dma_semaphore, #tpu.memory_space<semaphore_mem>>
    %36 = tpu.memref_squeeze %35 : memref<1x1x!tpu.dma_semaphore, #tpu.memory_space<semaphore_mem>> -> memref<!tpu.dma_semaphore, #tpu.memory_space<semaphore_mem>>
    tpu.wait_dma2 semaphore(%36 : memref<!tpu.dma_semaphore, #tpu.memory_space<semaphore_mem>>) src(%32 : memref<1x128xf32, #tpu.memory_space<any>>) dst(%34 : memref<1x128xf32, #tpu.memory_space<vmem>>)
    %c4_i32 = arith.constant 4 : i32
    %c0_i32_27 = arith.constant 0 : i32
    %c0_i32_28 = arith.constant 0 : i32
    %37 = tpu.memref_slice %arg2[%c0_i32_27, %c0_i32_28] : memref<256x128xf32, #tpu.memory_space<any>> -> memref<1x128xf32, #tpu.memory_space<any>>
    %c4_i32_29 = arith.constant 4 : i32
    %c0_i32_30 = arith.constant 0 : i32
    %38 = tpu.memref_slice %arg5[%16, %c4_i32_29, %c0_i32_30] : memref<2x16x128xf32, #tpu.memory_space<vmem>> -> memref<1x1x128xf32, #tpu.memory_space<vmem>>
    %39 = tpu.memref_squeeze %38 : memref<1x1x128xf32, #tpu.memory_space<vmem>> -> memref<1x128xf32, #tpu.memory_space<vmem>>
    %40 = tpu.memref_slice %arg6[%16, %c4_i32] : memref<2x16x!tpu.dma_semaphore, #tpu.memory_space<semaphore_mem>> -> memref<1x1x!tpu.dma_semaphore, #tpu.memory_space<semaphore_mem>>
    %41 = tpu.memref_squeeze %40 : memref<1x1x!tpu.dma_semaphore, #tpu.memory_space<semaphore_mem>> -> memref<!tpu.dma_semaphore, #tpu.memory_space<semaphore_mem>>
    tpu.wait_dma2 semaphore(%41 : memref<!tpu.dma_semaphore, #tpu.memory_space<semaphore_mem>>) src(%37 : memref<1x128xf32, #tpu.memory_space<any>>) dst(%39 : memref<1x128xf32, #tpu.memory_space<vmem>>)
    %c5_i32 = arith.constant 5 : i32
    %c0_i32_31 = arith.constant 0 : i32
    %c0_i32_32 = arith.constant 0 : i32
    %42 = tpu.memref_slice %arg2[%c0_i32_31, %c0_i32_32] : memref<256x128xf32, #tpu.memory_space<any>> -> memref<1x128xf32, #tpu.memory_space<any>>
    %c5_i32_33 = arith.constant 5 : i32
    %c0_i32_34 = arith.constant 0 : i32
    %43 = tpu.memref_slice %arg5[%16, %c5_i32_33, %c0_i32_34] : memref<2x16x128xf32, #tpu.memory_space<vmem>> -> memref<1x1x128xf32, #tpu.memory_space<vmem>>
    %44 = tpu.memref_squeeze %43 : memref<1x1x128xf32, #tpu.memory_space<vmem>> -> memref<1x128xf32, #tpu.memory_space<vmem>>
    %45 = tpu.memref_slice %arg6[%16, %c5_i32] : memref<2x16x!tpu.dma_semaphore, #tpu.memory_space<semaphore_mem>> -> memref<1x1x!tpu.dma_semaphore, #tpu.memory_space<semaphore_mem>>
    %46 = tpu.memref_squeeze %45 : memref<1x1x!tpu.dma_semaphore, #tpu.memory_space<semaphore_mem>> -> memref<!tpu.dma_semaphore, #tpu.memory_space<semaphore_mem>>
    tpu.wait_dma2 semaphore(%46 : memref<!tpu.dma_semaphore, #tpu.memory_space<semaphore_mem>>) src(%42 : memref<1x128xf32, #tpu.memory_space<any>>) dst(%44 : memref<1x128xf32, #tpu.memory_space<vmem>>)
    %c6_i32 = arith.constant 6 : i32
    %c0_i32_35 = arith.constant 0 : i32
    %c0_i32_36 = arith.constant 0 : i32
    %47 = tpu.memref_slice %arg2[%c0_i32_35, %c0_i32_36] : memref<256x128xf32, #tpu.memory_space<any>> -> memref<1x128xf32, #tpu.memory_space<any>>
    %c6_i32_37 = arith.constant 6 : i32
    %c0_i32_38 = arith.constant 0 : i32
    %48 = tpu.memref_slice %arg5[%16, %c6_i32_37, %c0_i32_38] : memref<2x16x128xf32, #tpu.memory_space<vmem>> -> memref<1x1x128xf32, #tpu.memory_space<vmem>>
    %49 = tpu.memref_squeeze %48 : memref<1x1x128xf32, #tpu.memory_space<vmem>> -> memref<1x128xf32, #tpu.memory_space<vmem>>
    %50 = tpu.memref_slice %arg6[%16, %c6_i32] : memref<2x16x!tpu.dma_semaphore, #tpu.memory_space<semaphore_mem>> -> memref<1x1x!tpu.dma_semaphore, #tpu.memory_space<semaphore_mem>>
    %51 = tpu.memref_squeeze %50 : memref<1x1x!tpu.dma_semaphore, #tpu.memory_space<semaphore_mem>> -> memref<!tpu.dma_semaphore, #tpu.memory_space<semaphore_mem>>
    tpu.wait_dma2 semaphore(%51 : memref<!tpu.dma_semaphore, #tpu.memory_space<semaphore_mem>>) src(%47 : memref<1x128xf32, #tpu.memory_space<any>>) dst(%49 : memref<1x128xf32, #tpu.memory_space<vmem>>)
    %c7_i32 = arith.constant 7 : i32
    %c0_i32_39 = arith.constant 0 : i32
    %c0_i32_40 = arith.constant 0 : i32
    %52 = tpu.memref_slice %arg2[%c0_i32_39, %c0_i32_40] : memref<256x128xf32, #tpu.memory_space<any>> -> memref<1x128xf32, #tpu.memory_space<any>>
    %c7_i32_41 = arith.constant 7 : i32
    %c0_i32_42 = arith.constant 0 : i32
    %53 = tpu.memref_slice %arg5[%16, %c7_i32_41, %c0_i32_42] : memref<2x16x128xf32, #tpu.memory_space<vmem>> -> memref<1x1x128xf32, #tpu.memory_space<vmem>>
    %54 = tpu.memref_squeeze %53 : memref<1x1x128xf32, #tpu.memory_space<vmem>> -> memref<1x128xf32, #tpu.memory_space<vmem>>
    %55 = tpu.memref_slice %arg6[%16, %c7_i32] : memref<2x16x!tpu.dma_semaphore, #tpu.memory_space<semaphore_mem>> -> memref<1x1x!tpu.dma_semaphore, #tpu.memory_space<semaphore_mem>>
    %56 = tpu.memref_squeeze %55 : memref<1x1x!tpu.dma_semaphore, #tpu.memory_space<semaphore_mem>> -> memref<!tpu.dma_semaphore, #tpu.memory_space<semaphore_mem>>
    tpu.wait_dma2 semaphore(%56 : memref<!tpu.dma_semaphore, #tpu.memory_space<semaphore_mem>>) src(%52 : memref<1x128xf32, #tpu.memory_space<any>>) dst(%54 : memref<1x128xf32, #tpu.memory_space<vmem>>)
    %c8_i32 = arith.constant 8 : i32
    %c0_i32_43 = arith.constant 0 : i32
    %c0_i32_44 = arith.constant 0 : i32
    %57 = tpu.memref_slice %arg2[%c0_i32_43, %c0_i32_44] : memref<256x128xf32, #tpu.memory_space<any>> -> memref<1x128xf32, #tpu.memory_space<any>>
    %c8_i32_45 = arith.constant 8 : i32
    %c0_i32_46 = arith.constant 0 : i32
    %58 = tpu.memref_slice %arg5[%16, %c8_i32_45, %c0_i32_46] : memref<2x16x128xf32, #tpu.memory_space<vmem>> -> memref<1x1x128xf32, #tpu.memory_space<vmem>>
    %59 = tpu.memref_squeeze %58 : memref<1x1x128xf32, #tpu.memory_space<vmem>> -> memref<1x128xf32, #tpu.memory_space<vmem>>
    %60 = tpu.memref_slice %arg6[%16, %c8_i32] : memref<2x16x!tpu.dma_semaphore, #tpu.memory_space<semaphore_mem>> -> memref<1x1x!tpu.dma_semaphore, #tpu.memory_space<semaphore_mem>>
    %61 = tpu.memref_squeeze %60 : memref<1x1x!tpu.dma_semaphore, #tpu.memory_space<semaphore_mem>> -> memref<!tpu.dma_semaphore, #tpu.memory_space<semaphore_mem>>
    tpu.wait_dma2 semaphore(%61 : memref<!tpu.dma_semaphore, #tpu.memory_space<semaphore_mem>>) src(%57 : memref<1x128xf32, #tpu.memory_space<any>>) dst(%59 : memref<1x128xf32, #tpu.memory_space<vmem>>)
    %c9_i32 = arith.constant 9 : i32
    %c0_i32_47 = arith.constant 0 : i32
    %c0_i32_48 = arith.constant 0 : i32
    %62 = tpu.memref_slice %arg2[%c0_i32_47, %c0_i32_48] : memref<256x128xf32, #tpu.memory_space<any>> -> memref<1x128xf32, #tpu.memory_space<any>>
    %c9_i32_49 = arith.constant 9 : i32
    %c0_i32_50 = arith.constant 0 : i32
    %63 = tpu.memref_slice %arg5[%16, %c9_i32_49, %c0_i32_50] : memref<2x16x128xf32, #tpu.memory_space<vmem>> -> memref<1x1x128xf32, #tpu.memory_space<vmem>>
    %64 = tpu.memref_squeeze %63 : memref<1x1x128xf32, #tpu.memory_space<vmem>> -> memref<1x128xf32, #tpu.memory_space<vmem>>
    %65 = tpu.memref_slice %arg6[%16, %c9_i32] : memref<2x16x!tpu.dma_semaphore, #tpu.memory_space<semaphore_mem>> -> memref<1x1x!tpu.dma_semaphore, #tpu.memory_space<semaphore_mem>>
    %66 = tpu.memref_squeeze %65 : memref<1x1x!tpu.dma_semaphore, #tpu.memory_space<semaphore_mem>> -> memref<!tpu.dma_semaphore, #tpu.memory_space<semaphore_mem>>
    tpu.wait_dma2 semaphore(%66 : memref<!tpu.dma_semaphore, #tpu.memory_space<semaphore_mem>>) src(%62 : memref<1x128xf32, #tpu.memory_space<any>>) dst(%64 : memref<1x128xf32, #tpu.memory_space<vmem>>)
    %c10_i32 = arith.constant 10 : i32
    %c0_i32_51 = arith.constant 0 : i32
    %c0_i32_52 = arith.constant 0 : i32
    %67 = tpu.memref_slice %arg2[%c0_i32_51, %c0_i32_52] : memref<256x128xf32, #tpu.memory_space<any>> -> memref<1x128xf32, #tpu.memory_space<any>>
    %c10_i32_53 = arith.constant 10 : i32
    %c0_i32_54 = arith.constant 0 : i32
    %68 = tpu.memref_slice %arg5[%16, %c10_i32_53, %c0_i32_54] : memref<2x16x128xf32, #tpu.memory_space<vmem>> -> memref<1x1x128xf32, #tpu.memory_space<vmem>>
    %69 = tpu.memref_squeeze %68 : memref<1x1x128xf32, #tpu.memory_space<vmem>> -> memref<1x128xf32, #tpu.memory_space<vmem>>
    %70 = tpu.memref_slice %arg6[%16, %c10_i32] : memref<2x16x!tpu.dma_semaphore, #tpu.memory_space<semaphore_mem>> -> memref<1x1x!tpu.dma_semaphore, #tpu.memory_space<semaphore_mem>>
    %71 = tpu.memref_squeeze %70 : memref<1x1x!tpu.dma_semaphore, #tpu.memory_space<semaphore_mem>> -> memref<!tpu.dma_semaphore, #tpu.memory_space<semaphore_mem>>
    tpu.wait_dma2 semaphore(%71 : memref<!tpu.dma_semaphore, #tpu.memory_space<semaphore_mem>>) src(%67 : memref<1x128xf32, #tpu.memory_space<any>>) dst(%69 : memref<1x128xf32, #tpu.memory_space<vmem>>)
    %c11_i32 = arith.constant 11 : i32
    %c0_i32_55 = arith.constant 0 : i32
    %c0_i32_56 = arith.constant 0 : i32
    %72 = tpu.memref_slice %arg2[%c0_i32_55, %c0_i32_56] : memref<256x128xf32, #tpu.memory_space<any>> -> memref<1x128xf32, #tpu.memory_space<any>>
    %c11_i32_57 = arith.constant 11 : i32
    %c0_i32_58 = arith.constant 0 : i32
    %73 = tpu.memref_slice %arg5[%16, %c11_i32_57, %c0_i32_58] : memref<2x16x128xf32, #tpu.memory_space<vmem>> -> memref<1x1x128xf32, #tpu.memory_space<vmem>>
    %74 = tpu.memref_squeeze %73 : memref<1x1x128xf32, #tpu.memory_space<vmem>> -> memref<1x128xf32, #tpu.memory_space<vmem>>
    %75 = tpu.memref_slice %arg6[%16, %c11_i32] : memref<2x16x!tpu.dma_semaphore, #tpu.memory_space<semaphore_mem>> -> memref<1x1x!tpu.dma_semaphore, #tpu.memory_space<semaphore_mem>>
    %76 = tpu.memref_squeeze %75 : memref<1x1x!tpu.dma_semaphore, #tpu.memory_space<semaphore_mem>> -> memref<!tpu.dma_semaphore, #tpu.memory_space<semaphore_mem>>
    tpu.wait_dma2 semaphore(%76 : memref<!tpu.dma_semaphore, #tpu.memory_space<semaphore_mem>>) src(%72 : memref<1x128xf32, #tpu.memory_space<any>>) dst(%74 : memref<1x128xf32, #tpu.memory_space<vmem>>)
    %c12_i32 = arith.constant 12 : i32
    %c0_i32_59 = arith.constant 0 : i32
    %c0_i32_60 = arith.constant 0 : i32
    %77 = tpu.memref_slice %arg2[%c0_i32_59, %c0_i32_60] : memref<256x128xf32, #tpu.memory_space<any>> -> memref<1x128xf32, #tpu.memory_space<any>>
    %c12_i32_61 = arith.constant 12 : i32
    %c0_i32_62 = arith.constant 0 : i32
    %78 = tpu.memref_slice %arg5[%16, %c12_i32_61, %c0_i32_62] : memref<2x16x128xf32, #tpu.memory_space<vmem>> -> memref<1x1x128xf32, #tpu.memory_space<vmem>>
    %79 = tpu.memref_squeeze %78 : memref<1x1x128xf32, #tpu.memory_space<vmem>> -> memref<1x128xf32, #tpu.memory_space<vmem>>
    %80 = tpu.memref_slice %arg6[%16, %c12_i32] : memref<2x16x!tpu.dma_semaphore, #tpu.memory_space<semaphore_mem>> -> memref<1x1x!tpu.dma_semaphore, #tpu.memory_space<semaphore_mem>>
    %81 = tpu.memref_squeeze %80 : memref<1x1x!tpu.dma_semaphore, #tpu.memory_space<semaphore_mem>> -> memref<!tpu.dma_semaphore, #tpu.memory_space<semaphore_mem>>
    tpu.wait_dma2 semaphore(%81 : memref<!tpu.dma_semaphore, #tpu.memory_space<semaphore_mem>>) src(%77 : memref<1x128xf32, #tpu.memory_space<any>>) dst(%79 : memref<1x128xf32, #tpu.memory_space<vmem>>)
    %c13_i32 = arith.constant 13 : i32
    %c0_i32_63 = arith.constant 0 : i32
    %c0_i32_64 = arith.constant 0 : i32
    %82 = tpu.memref_slice %arg2[%c0_i32_63, %c0_i32_64] : memref<256x128xf32, #tpu.memory_space<any>> -> memref<1x128xf32, #tpu.memory_space<any>>
    %c13_i32_65 = arith.constant 13 : i32
    %c0_i32_66 = arith.constant 0 : i32
    %83 = tpu.memref_slice %arg5[%16, %c13_i32_65, %c0_i32_66] : memref<2x16x128xf32, #tpu.memory_space<vmem>> -> memref<1x1x128xf32, #tpu.memory_space<vmem>>
    %84 = tpu.memref_squeeze %83 : memref<1x1x128xf32, #tpu.memory_space<vmem>> -> memref<1x128xf32, #tpu.memory_space<vmem>>
    %85 = tpu.memref_slice %arg6[%16, %c13_i32] : memref<2x16x!tpu.dma_semaphore, #tpu.memory_space<semaphore_mem>> -> memref<1x1x!tpu.dma_semaphore, #tpu.memory_space<semaphore_mem>>
    %86 = tpu.memref_squeeze %85 : memref<1x1x!tpu.dma_semaphore, #tpu.memory_space<semaphore_mem>> -> memref<!tpu.dma_semaphore, #tpu.memory_space<semaphore_mem>>
    tpu.wait_dma2 semaphore(%86 : memref<!tpu.dma_semaphore, #tpu.memory_space<semaphore_mem>>) src(%82 : memref<1x128xf32, #tpu.memory_space<any>>) dst(%84 : memref<1x128xf32, #tpu.memory_space<vmem>>)
    %c14_i32 = arith.constant 14 : i32
    %c0_i32_67 = arith.constant 0 : i32
    %c0_i32_68 = arith.constant 0 : i32
    %87 = tpu.memref_slice %arg2[%c0_i32_67, %c0_i32_68] : memref<256x128xf32, #tpu.memory_space<any>> -> memref<1x128xf32, #tpu.memory_space<any>>
    %c14_i32_69 = arith.constant 14 : i32
    %c0_i32_70 = arith.constant 0 : i32
    %88 = tpu.memref_slice %arg5[%16, %c14_i32_69, %c0_i32_70] : memref<2x16x128xf32, #tpu.memory_space<vmem>> -> memref<1x1x128xf32, #tpu.memory_space<vmem>>
    %89 = tpu.memref_squeeze %88 : memref<1x1x128xf32, #tpu.memory_space<vmem>> -> memref<1x128xf32, #tpu.memory_space<vmem>>
    %90 = tpu.memref_slice %arg6[%16, %c14_i32] : memref<2x16x!tpu.dma_semaphore, #tpu.memory_space<semaphore_mem>> -> memref<1x1x!tpu.dma_semaphore, #tpu.memory_space<semaphore_mem>>
    %91 = tpu.memref_squeeze %90 : memref<1x1x!tpu.dma_semaphore, #tpu.memory_space<semaphore_mem>> -> memref<!tpu.dma_semaphore, #tpu.memory_space<semaphore_mem>>
    tpu.wait_dma2 semaphore(%91 : memref<!tpu.dma_semaphore, #tpu.memory_space<semaphore_mem>>) src(%87 : memref<1x128xf32, #tpu.memory_space<any>>) dst(%89 : memref<1x128xf32, #tpu.memory_space<vmem>>)
    %c15_i32 = arith.constant 15 : i32
    %c0_i32_71 = arith.constant 0 : i32
    %c0_i32_72 = arith.constant 0 : i32
    %92 = tpu.memref_slice %arg2[%c0_i32_71, %c0_i32_72] : memref<256x128xf32, #tpu.memory_space<any>> -> memref<1x128xf32, #tpu.memory_space<any>>
    %c15_i32_73 = arith.constant 15 : i32
    %c0_i32_74 = arith.constant 0 : i32
    %93 = tpu.memref_slice %arg5[%16, %c15_i32_73, %c0_i32_74] : memref<2x16x128xf32, #tpu.memory_space<vmem>> -> memref<1x1x128xf32, #tpu.memory_space<vmem>>
    %94 = tpu.memref_squeeze %93 : memref<1x1x128xf32, #tpu.memory_space<vmem>> -> memref<1x128xf32, #tpu.memory_space<vmem>>
    %95 = tpu.memref_slice %arg6[%16, %c15_i32] : memref<2x16x!tpu.dma_semaphore, #tpu.memory_space<semaphore_mem>> -> memref<1x1x!tpu.dma_semaphore, #tpu.memory_space<semaphore_mem>>
    %96 = tpu.memref_squeeze %95 : memref<1x1x!tpu.dma_semaphore, #tpu.memory_space<semaphore_mem>> -> memref<!tpu.dma_semaphore, #tpu.memory_space<semaphore_mem>>
    tpu.wait_dma2 semaphore(%96 : memref<!tpu.dma_semaphore, #tpu.memory_space<semaphore_mem>>) src(%92 : memref<1x128xf32, #tpu.memory_space<any>>) dst(%94 : memref<1x128xf32, #tpu.memory_space<vmem>>)
    %97 = arith.index_cast %16 : i32 to index
    %c0 = arith.constant 0 : index
    %c0_75 = arith.constant 0 : index
    %98 = vector.load %arg5[%97, %c0, %c0_75] : memref<2x16x128xf32, #tpu.memory_space<vmem>>, vector<1x16x128xf32>
    %99 = vector.shape_cast %98 : vector<1x16x128xf32> to vector<16x128xf32>
    %c0_76 = arith.constant 0 : index
    %c0_77 = arith.constant 0 : index
    %100 = vector.load %arg3[%c0_76, %c0_77] : memref<16x128xf32, #tpu.memory_space<vmem>>, vector<16x128xf32>
    %101 = arith.addf %99, %100 : vector<16x128xf32>
    %c0_78 = arith.constant 0 : index
    %c0_79 = arith.constant 0 : index
    %102 = vector.load %arg4[%c0_78, %c0_79] : memref<16x128xf32, #tpu.memory_space<vmem>>, vector<16x128xf32>
    tpu.vector_store %arg4[%c0_78, %c0_79], %101 {strides = array<i32>} : memref<16x128xf32, #tpu.memory_space<vmem>>, vector<16x128xf32>,
    return
  }
  func.func @transform_1(%arg0: i32, %arg1: memref<32xi32, #tpu.memory_space<smem>>) -> (i32, i32) {
    %c0_i32 = arith.constant 0 : i32
    %c0_i32_0 = arith.constant 0 : i32
    %c0_i32_1 = arith.constant 0 : i32
    return %c0_i32, %c0_i32_0 : i32, i32
  }
  func.func @transform_2(%arg0: i32, %arg1: memref<32xi32, #tpu.memory_space<smem>>) -> (i32, i32) {
    %c0_i32 = arith.constant 0 : i32
    %c0_i32_0 = arith.constant 0 : i32
    return %arg0, %c0_i32 : i32, i32
  }
}

</mosaic_0001>

<bundles_post_ra>
// kernel: tpu_custom_call.1
= control target key start
LH: loop header
LB: loop body
LE: loop exit
PB: predicated region body
PF: predicated region fallthrough
CT: control target
= control target key end

     0   :  { %s2412_s12 = smov [#allocation5]   ;;  %s3203_s0 = inlined_call_operand.hbm [shape: s32[32], index: 0, kind: input, shape index: {}]   ;;  %s3204_s1 = inlined_call_operand.hbm [shape: f32[256,128], index: 1, kind: input, shape index: {}]   ;;  %s3205_s2 = inlined_call_operand.hbm [shape: f32[16,128], index: 2, kind: input, shape index: {}]   ;;  %s3206_s3 = inlined_call_operand.hbm [shape: f32[32,128], index: 3, kind: output, shape index: {}]  }
   0x1   :  { %3214 = sst [smem:[#allocation101_spill]] %s3205_s2 }
   0x2   :  { %9 = dma.hbm_to_smem %s3203_s0, 16, %s2412_s12, [#allocation4] }
   0x3   :  { %2354 = dma.done.wait [#allocation4], 16 }
   0x4   :  { %2355 = vsyncadd [#allocation4], 4294967280 }
   0x5   :  { %11 = sfence }
   0x6   :  { %12 = vsyncpa [#allocation7], 0 }
   0x7   :  { %13 = vsyncpa [#allocation8], 0 }
   0x8   :  { %15 = vsyncpa [#allocation8 + $0x1], 0  ;;  %s2458_s15 = smov 0   ;;  %s2460_s16 = smov 0  }
   0x9   :  { %s2462_s17 = smov 0   ;;  %s2464_s18 = smov 0  }
   0xa LB: > { %3215 = sst [smem:[#allocation95_spill]] %s2398_s15  ;;  %s2479_s0 = sadd.s32 4294967295, %s2410_s18   ;;  %s2410_s18 = sphi %s2464_s18, %s3231_s18   ;;  %s2406_s17 = sphi %s2462_s17, %s3233_s17   ;;  %s2402_s16 = sphi %s2460_s16, %s3235_s16   ;;  %s2398_s15 = sphi %s2458_s15, %s3234_s15  }
   0xb   : > { %3216 = sst [smem:[#allocation96_spill]] %s2406_s17  ;;  %s1272_s19 = sadd.s32 4294967294, %s2410_s18  }
   0xc   : > { %3217 = sst [smem:[#allocation97_spill]] %s2410_s18  ;;  %s2483_s20 = sadd.s32 1, %s2410_s18  }
   0xd   : > { %3218 = sst [smem:[#allocation98_spill]] %s2483_s20  ;;  %s49_s21 = sadd.s32 1, %s2406_s17 }
   0xe   : > { %s46_s22 = ssub.s32 %s2410_s18, %s2483_s20  ;;  %p59_p0 = scmp.ne.s32.totalorder %s2406_s17, %s2402_s16 }
   0xf   : > { %p47_p1 = scmp.eq.s32.totalorder %s46_s22, 0  ;;  %p60_p2 = scmp.eq.s32.totalorder %s2479_s0, 1 }
  0x10   : > { %p65_p3 = scmp.ne.s32.totalorder %s2402_s16, %s2398_s15  ;;  %p66_p4 = scmp.eq.s32.totalorder %s1272_s19, 1 }
  0x11   : > { %s2494_s23 = scalar_select %p47_p1, %s2406_s17, %s49_s21  }
  0x12   : > { %p2496_p5 = por %p60_p2, %p59_p0  ;;  %p2500_p6 = por %p66_p4, %p65_p3 }
  0x13   : > { %3219 = sst [smem:[#allocation99_spill]] %s2494_s23  ;;  %p1273_p7 = scmp.ge.s32.totalorder %s2410_s18, 1 }
  0x14   : > { %s3221_s25 = scalar_select %p2500_p6, 1, 0 }
  0x15   : > { %p73_p8 = scmp.lt.s32.totalorder %s2410_s18, 3  ;;  %p1452_p9 = scmp.eq.s32.totalorder %s2479_s0, 0 }
  0x16   : > { %3222 = sst [smem:[#allocation100_spill]] %s3221_s25  ;;  %s2413_s27 = smov [#allocation6]  }
  0x17   : > { %p2507_p10 = pnand %p1273_p7, %p73_p8  ;;  %s85_s28 = sshll.u32 %s2413_s27, 4  ;;  %s86_s28 = int_to_ptr.vmem [resolvable:$true] %s85_s28 }
  0x18   : > { %s1529_s29 = scalar_lea.vmem %s86_s28, 256  ;;  %p1537_p3 = scmp.lt.s32.totalorder %s86_s28, %s86_s28 }
  0x19   : > { %p1444_p11 = pneg %p2507_p10  ;;  %p1530_p0 = scmp.ne.s32.totalorder %s86_s28, %s1529_s29 }
  0x1a   : > { %p1538_p4 = scmp.lt.s32.totalorder %s1529_s29, %s1529_s29 }
  0x1b   : > { %p1445_p12 = pnand %p1452_p9, %p1444_p11 }
  0x1c   : > { %p1539_p6 = por %p1538_p4, %p1537_p3 }
  0x1d   : > { %p1520_p13 = pneg %p1445_p12 }
  0x1f   : > { %p1532_p1 = pnand %p1530_p0, %p1520_p13 }
  0x21   : > { %p1533_p2 = pneg %p1532_p1 }
  0x23   : > { %p1540_p7 = pnand %p1539_p6, %p1533_p2 }
  0x25   : > { %1543 = shalt.err (!%p1540_p7)
}
  0x26   : > { %s2414_s30 = smov 128   ;;  %s2415_s4 = smov 8  }
  0x27   : > { %s3224_s2 = sld [smem:[#allocation101_spill]] }
  0x29   : > { %101 = sbr.rel (%p2507_p10) target bundleno = 836 (0x344), region = 24 }
  0x2d   : > { %1447 = dma.hbm_to_vmem [thread:$0]  (!%p1445_p12), %s3224_s2, 256, %s86_s28, [#allocation7], %s2414_s30, %s2414_s30, %s2415_s4  }
  0x2e   : > { %2357 = dma.done.wait (%p1452_p9), [#allocation7], 256  }
  0x2f   : > { %2359 = vsyncadd (%p1452_p9), [#allocation7], 4294967040  ;;  %s3207_s7 = sand.u32 1, %s2402_s16   ;;  %s121_s9 = sld [smem:[#allocation5]] }
  0x30   : > { %s2527_s8 = sshll.u32 %s3207_s7, 4  ;;  %s2416_s10 = smov [#allocation2]  }
  0x31   : > { %s131_s11 = sshll.u32 %s2416_s10, 4  ;;  %s2531_s12 = sld [smem:[#allocation5 + $0x1]]  ;;  %s2529_s11 = int_to_ptr.vmem [resolvable:$true] %s131_s11 }
  0x32   : > { %s2533_s13 = sld [smem:[#allocation5 + $0x2]]  ;;  %s2417_s14 = smov [#allocation2 + $0x1]  }
  0x33   : > { %s147_s19 = sshll.u32 %s2417_s14, 4  ;;  %s2418_s21 = smov [#allocation2 + $0x2]   ;;  %s2535_s19 = int_to_ptr.vmem [resolvable:$true] %s147_s19 }
  0x34   : > { %s163_s22 = sshll.u32 %s2418_s21, 4  ;;  %s2542_s30 = sld [smem:[#allocation5 + $0x3]]  ;;  %s2537_s22 = int_to_ptr.vmem [resolvable:$true] %s163_s22 }
  0x35   : > { %s1279_s26 = sshll.u32 %s121_s9, 4  ;;  %s2549_s10 = scalar_lea.hbm %s3204_s1, 4096 }
  0x36   : > { %s123_s29 = scalar_lea.hbm %s3204_s1, %s1279_s26 }
  0x37   : > { %s1544_s4 = scalar_lea.hbm %s123_s29, 16  ;;  %p1549_p11 = scmp.lt.s32.totalorder %s123_s29, %s3204_s1 }
  0x38   : > { %p1545_p6 = scmp.ne.s32.totalorder %s123_s29, %s1544_s4  ;;  %p1550_p12 = scmp.lt.s32.totalorder %s2549_s10, %s1544_s4 }
  0x3a   : > { %p1546_p8 = pnand %p1545_p6, %p1452_p9  ;;  %p1551_p13 = por %p1550_p12, %p1549_p11 }
  0x3c   : > { %p1547_p10 = pneg %p1546_p8 }
  0x3e   : > { %p1552_p0 = pnand %p1551_p13, %p1547_p10 }
  0x40   : > { %1555 = shalt.err (!%p1552_p0)  }
  0x41   : > { %s1556_s21 = scalar_lea.vmem %s2529_s11, 16  ;;  %s2560_s26 = scalar_lea.vmem %s2529_s11, 512 }
  0x42   : > { %p1557_p1 = scmp.ne.s32.totalorder %s2529_s11, %s1556_s21  ;;  %p1563_p4 = scmp.lt.s32.totalorder %s2529_s11, %s2529_s11 }
  0x43   : > { %p1564_p7 = scmp.lt.s32.totalorder %s2560_s26, %s1556_s21 }
  0x44   : > { %p1558_p2 = pnand %p1557_p1, %p1452_p9 }
  0x45   : > { %p1565_p6 = por %p1564_p7, %p1563_p4 }
  0x46   : > { %p1559_p3 = pneg %p1558_p2 }
  0x48   : > { %p1566_p8 = pnand %p1565_p6, %p1559_p3 }
  0x4a   : > { %1569 = shalt.err (!%p1566_p8)  }
  0x4b   : > { %1426 = dma.hbm_to_vmem [thread:$0]  (%p1452_p9), %s123_s29, 16, %s2529_s11, [#allocation3] }
  0x4c   : > { %s1281_s27 = sshll.u32 %s2531_s12, 4  ;;  %s1283_s28 = sshll.u32 %s2533_s13, 4 }
  0x4d   : > { %s137_s6 = scalar_lea.hbm %s3204_s1, %s1281_s27  ;;  %s2576_s21 = scalar_lea.hbm %s3204_s1, %s1283_s28 }
  0x4e   : > { %s1570_s7 = scalar_lea.hbm %s137_s6, 16  ;;  %p1575_p13 = scmp.lt.s32.totalorder %s137_s6, %s3204_s1 }
  0x4f   : > { %p1571_p10 = scmp.ne.s32.totalorder %s137_s6, %s1570_s7  ;;  %p1576_p0 = scmp.lt.s32.totalorder %s2549_s10, %s1570_s7 }
  0x51   : > { %p1572_p11 = pnand %p1571_p10, %p1452_p9  ;;  %p1577_p1 = por %p1576_p0, %p1575_p13 }
  0x53   : > { %p1573_p12 = pneg %p1572_p11 }
  0x55   : > { %p1578_p2 = pnand %p1577_p1, %p1573_p12 }
  0x57   : > { %1581 = shalt.err (!%p1578_p2)  }
  0x58   : > { %s1582_s12 = scalar_lea.vmem %s2535_s19, 16  ;;  %p1589_p6 = scmp.lt.s32.totalorder %s2535_s19, %s2529_s11 }
  0x59   : > { %p1583_p3 = scmp.ne.s32.totalorder %s2535_s19, %s1582_s12  ;;  %p1590_p8 = scmp.lt.s32.totalorder %s2560_s26, %s1582_s12 }
  0x5b   : > { %p1584_p4 = pnand %p1583_p3, %p1452_p9  ;;  %p1591_p10 = por %p1590_p8, %p1589_p6 }
  0x5d   : > { %p1585_p7 = pneg %p1584_p4 }
  0x5f   : > { %p1592_p11 = pnand %p1591_p10, %p1585_p7 }
  0x61   : > { %1595 = shalt.err (!%p1592_p11)  }
  0x62   : > { %1427 = dma.hbm_to_vmem [thread:$0]  (%p1452_p9), %s137_s6, 16, %s2535_s19, [#allocation3 + $0x1] }
  0x63   : > { %s1596_s2 = scalar_lea.hbm %s2576_s21, 16  ;;  %p1601_p1 = scmp.lt.s32.totalorder %s2576_s21, %s3204_s1 }
  0x64   : > { %p1597_p12 = scmp.ne.s32.totalorder %s2576_s21, %s1596_s2  ;;  %p1602_p2 = scmp.lt.s32.totalorder %s2549_s10, %s1596_s2 }
  0x66   : > { %p1598_p13 = pnand %p1597_p12, %p1452_p9  ;;  %p1603_p3 = por %p1602_p2, %p1601_p1 }
  0x68   : > { %p1599_p0 = pneg %p1598_p13 }
  0x6a   : > { %p1604_p4 = pnand %p1603_p3, %p1599_p0 }
  0x6c   : > { %1607 = shalt.err (!%p1604_p4)  }
  0x6d   : > { %s1608_s13 = scalar_lea.vmem %s2537_s22, 16  ;;  %p1615_p10 = scmp.lt.s32.totalorder %s2537_s22, %s2529_s11 }
  0x6e   : > { %p1609_p7 = scmp.ne.s32.totalorder %s2537_s22, %s1608_s13  ;;  %p1616_p11 = scmp.lt.s32.totalorder %s2560_s26, %s1608_s13 }
  0x70   : > { %p1610_p6 = pnand %p1609_p7, %p1452_p9  ;;  %p1617_p12 = por %p1616_p11, %p1615_p10 }
  0x72   : > { %p1611_p8 = pneg %p1610_p6 }
  0x74   : > { %p1618_p13 = pnand %p1617_p12, %p1611_p8 }
  0x76   : > { %1621 = shalt.err (!%p1618_p13)  }
  0x77   : > { %1428 = dma.hbm_to_vmem [thread:$0]  (%p1452_p9), %s2576_s21, 16, %s2537_s22, [#allocation3 + $0x2] }
  0x78   : > { %s1285_s19 = sshll.u32 %s2542_s30, 4  ;;  %s2419_s4 = smov [#allocation2 + $0x3]  }
  0x79   : > { %s169_s28 = scalar_lea.hbm %s3204_s1, %s1285_s19  ;;  %s179_s5 = sshll.u32 %s2419_s4, 4  ;;  %s180_s5 = int_to_ptr.vmem [resolvable:$true] %s179_s5 }
  0x7a   : > { %s2618_s6 = sld [smem:[#allocation5 + $0x4]]  ;;  %s1622_s14 = scalar_lea.hbm %s169_s28, 16 }
  0x7b   : > { %p1623_p0 = scmp.ne.s32.totalorder %s169_s28, %s1622_s14  ;;  %p1627_p3 = scmp.lt.s32.totalorder %s169_s28, %s3204_s1 }
  0x7c   : > { %p1628_p4 = scmp.lt.s32.totalorder %s2549_s10, %s1622_s14 }
  0x7d   : > { %p1624_p1 = pnand %p1623_p0, %p1452_p9 }
  0x7e   : > { %p1629_p7 = por %p1628_p4, %p1627_p3 }
  0x7f   : > { %p1625_p2 = pneg %p1624_p1 }
  0x81   : > { %p1630_p6 = pnand %p1629_p7, %p1625_p2 }
  0x83   : > { %1633 = shalt.err (!%p1630_p6)  }
  0x84   : > { %s1634_s22 = scalar_lea.vmem %s180_s5, 16  ;;  %p1641_p12 = scmp.lt.s32.totalorder %s180_s5, %s2529_s11 }
  0x85   : > { %p1635_p8 = scmp.ne.s32.totalorder %s180_s5, %s1634_s22  ;;  %p1642_p13 = scmp.lt.s32.totalorder %s2560_s26, %s1634_s22 }
  0x87   : > { %p1636_p10 = pnand %p1635_p8, %p1452_p9  ;;  %p1643_p0 = por %p1642_p13, %p1641_p12 }
  0x89   : > { %p1637_p11 = pneg %p1636_p10 }
  0x8b   : > { %p1644_p1 = pnand %p1643_p0, %p1637_p11 }
  0x8d   : > { %1647 = shalt.err (!%p1644_p1)  }
  0x8e   : > { %1429 = dma.hbm_to_vmem [thread:$0]  (%p1452_p9), %s169_s28, 16, %s180_s5, [#allocation3 + $0x3] }
  0x8f   : > { %s2632_s30 = sld [smem:[#allocation5 + $0x5]]  ;;  %s2420_s21 = smov [#allocation2 + $0x4]  }
  0x90   : > { %s195_s2 = sshll.u32 %s2420_s21, 4  ;;  %s2421_s23 = smov [#allocation2 + $0x5]   ;;  %s196_s2 = int_to_ptr.vmem [resolvable:$true] %s195_s2 }
  0x91   : > { %s211_s7 = sshll.u32 %s2421_s23, 4  ;;  %s2636_s13 = sld [smem:[#allocation5 + $0x6]]  ;;  %s2634_s7 = int_to_ptr.vmem [resolvable:$true] %s211_s7 }
  0x92   : > { %s1287_s19 = sshll.u32 %s2618_s6, 4  ;;  %s2422_s14 = smov [#allocation2 + $0x6]  }
  0x93   : > { %s185_s4 = scalar_lea.hbm %s3204_s1, %s1287_s19  ;;  %s227_s9 = sshll.u32 %s2422_s14, 4  ;;  %s2655_s9 = int_to_ptr.vmem [resolvable:$true] %s227_s9 }
  0x94   : > { %s1648_s28 = scalar_lea.hbm %s185_s4, 16  ;;  %p1653_p7 = scmp.lt.s32.totalorder %s185_s4, %s3204_s1 }
  0x95   : > { %p1649_p2 = scmp.ne.s32.totalorder %s185_s4, %s1648_s28  ;;  %p1654_p6 = scmp.lt.s32.totalorder %s2549_s10, %s1648_s28 }
  0x97   : > { %p1650_p3 = pnand %p1649_p2, %p1452_p9  ;;  %p1655_p8 = por %p1654_p6, %p1653_p7 }
  0x99   : > { %p1651_p4 = pneg %p1650_p3 }
  0x9b   : > { %p1656_p10 = pnand %p1655_p8, %p1651_p4 }
  0x9d   : > { %1659 = shalt.err (!%p1656_p10)  }
  0x9e   : > { %s1660_s6 = scalar_lea.vmem %s196_s2, 16  ;;  %p1667_p0 = scmp.lt.s32.totalorder %s196_s2, %s2529_s11 }
  0x9f   : > { %p1661_p11 = scmp.ne.s32.totalorder %s196_s2, %s1660_s6  ;;  %p1668_p1 = scmp.lt.s32.totalorder %s2560_s26, %s1660_s6 }
  0xa1   : > { %p1662_p12 = pnand %p1661_p11, %p1452_p9  ;;  %p1669_p2 = por %p1668_p1, %p1667_p0 }
  0xa3   : > { %p1663_p13 = pneg %p1662_p12 }
  0xa5   : > { %p1670_p3 = pnand %p1669_p2, %p1663_p13 }
  0xa7   : > { %1673 = shalt.err (!%p1670_p3)  }
  0xa8   : > { %1430 = dma.hbm_to_vmem [thread:$0]  (%p1452_p9), %s185_s4, 16, %s196_s2, [#allocation3 + $0x4] }
  0xa9   : > { %s1289_s22 = sshll.u32 %s2632_s30, 4  ;;  %s2660_s29 = sld [smem:[#allocation5 + $0x7]] }
  0xaa   : > { %s201_s19 = scalar_lea.hbm %s3204_s1, %s1289_s22 }
  0xab   : > { %s1674_s27 = scalar_lea.hbm %s201_s19, 16  ;;  %p1679_p8 = scmp.lt.s32.totalorder %s201_s19, %s3204_s1 }
  0xac   : > { %p1675_p4 = scmp.ne.s32.totalorder %s201_s19, %s1674_s27  ;;  %p1680_p10 = scmp.lt.s32.totalorder %s2549_s10, %s1674_s27 }
  0xae   : > { %p1676_p7 = pnand %p1675_p4, %p1452_p9  ;;  %p1681_p11 = por %p1680_p10, %p1679_p8 }
  0xb0   : > { %p1677_p6 = pneg %p1676_p7 }
  0xb2   : > { %p1682_p12 = pnand %p1681_p11, %p1677_p6 }
  0xb4   : > { %1685 = shalt.err (!%p1682_p12)  }
  0xb5   : > { %s1686_s30 = scalar_lea.vmem %s2634_s7, 16  ;;  %p1693_p2 = scmp.lt.s32.totalorder %s2634_s7, %s2529_s11 }
  0xb6   : > { %p1687_p13 = scmp.ne.s32.totalorder %s2634_s7, %s1686_s30  ;;  %p1694_p3 = scmp.lt.s32.totalorder %s2560_s26, %s1686_s30 }
  0xb8   : > { %p1688_p0 = pnand %p1687_p13, %p1452_p9  ;;  %p1695_p4 = por %p1694_p3, %p1693_p2 }
  0xba   : > { %p1689_p1 = pneg %p1688_p0 }
  0xbc   : > { %p1696_p7 = pnand %p1695_p4, %p1689_p1 }
  0xbe   : > { %1699 = shalt.err (!%p1696_p7)  }
  0xbf   : > { %1431 = dma.hbm_to_vmem [thread:$0]  (%p1452_p9), %s201_s19, 16, %s2634_s7, [#allocation3 + $0x5] }
  0xc0   : > { %s1291_s2 = sshll.u32 %s2636_s13, 4  ;;  %s2423_s6 = smov [#allocation2 + $0x7]  }
  0xc1   : > { %s217_s12 = scalar_lea.hbm %s3204_s1, %s1291_s2  ;;  %s243_s22 = sshll.u32 %s2423_s6, 4  ;;  %s244_s22 = int_to_ptr.vmem [resolvable:$true] %s243_s22 }
  0xc2   : > { %s1700_s21 = scalar_lea.hbm %s217_s12, 16  ;;  %p1705_p11 = scmp.lt.s32.totalorder %s217_s12, %s3204_s1 }
  0xc3   : > { %p1701_p6 = scmp.ne.s32.totalorder %s217_s12, %s1700_s21  ;;  %p1706_p12 = scmp.lt.s32.totalorder %s2549_s10, %s1700_s21 }
  0xc5   : > { %p1702_p8 = pnand %p1701_p6, %p1452_p9  ;;  %p1707_p13 = por %p1706_p12, %p1705_p11 }
  0xc7   : > { %p1703_p10 = pneg %p1702_p8 }
  0xc9   : > { %p1708_p0 = pnand %p1707_p13, %p1703_p10 }
  0xcb   : > { %1711 = shalt.err (!%p1708_p0)  }
  0xcc   : > { %s1712_s7 = scalar_lea.vmem %s2655_s9, 16  ;;  %p1719_p4 = scmp.lt.s32.totalorder %s2655_s9, %s2529_s11 }
  0xcd   : > { %p1713_p1 = scmp.ne.s32.totalorder %s2655_s9, %s1712_s7  ;;  %p1720_p7 = scmp.lt.s32.totalorder %s2560_s26, %s1712_s7 }
  0xcf   : > { %p1714_p2 = pnand %p1713_p1, %p1452_p9  ;;  %p1721_p6 = por %p1720_p7, %p1719_p4 }
  0xd1   : > { %p1715_p3 = pneg %p1714_p2 }
  0xd3   : > { %p1722_p8 = pnand %p1721_p6, %p1715_p3 }
  0xd5   : > { %1725 = shalt.err (!%p1722_p8)  }
  0xd6   : > { %1432 = dma.hbm_to_vmem [thread:$0]  (%p1452_p9), %s217_s12, 16, %s2655_s9, [#allocation3 + $0x6] }
  0xd7   : > { %s2698_s13 = sld [smem:[#allocation5 + $0x8]]  ;;  %s1293_s19 = sshll.u32 %s2660_s29, 4 }
  0xd8   : > { %s233_s30 = scalar_lea.hbm %s3204_s1, %s1293_s19  ;;  %s2424_s2 = smov [#allocation2 + $0x8]  }
  0xd9   : > { %s259_s4 = sshll.u32 %s2424_s2, 4  ;;  %s1726_s5 = scalar_lea.hbm %s233_s30, 16  ;;  %s260_s4 = int_to_ptr.vmem [resolvable:$true] %s259_s4 }
  0xda   : > { %p1727_p10 = scmp.ne.s32.totalorder %s233_s30, %s1726_s5  ;;  %p1731_p13 = scmp.lt.s32.totalorder %s233_s30, %s3204_s1 }
  0xdb   : > { %p1732_p0 = scmp.lt.s32.totalorder %s2549_s10, %s1726_s5 }
  0xdc   : > { %p1728_p11 = pnand %p1727_p10, %p1452_p9 }
  0xdd   : > { %p1733_p1 = por %p1732_p0, %p1731_p13 }
  0xde   : > { %p1729_p12 = pneg %p1728_p11 }
  0xe0   : > { %p1734_p2 = pnand %p1733_p1, %p1729_p12 }
  0xe2   : > { %1737 = shalt.err (!%p1734_p2)  }
  0xe3   : > { %s1738_s9 = scalar_lea.vmem %s244_s22, 16  ;;  %p1745_p6 = scmp.lt.s32.totalorder %s244_s22, %s2529_s11 }
  0xe4   : > { %p1739_p3 = scmp.ne.s32.totalorder %s244_s22, %s1738_s9  ;;  %p1746_p8 = scmp.lt.s32.totalorder %s2560_s26, %s1738_s9 }
  0xe6   : > { %p1740_p4 = pnand %p1739_p3, %p1452_p9  ;;  %p1747_p10 = por %p1746_p8, %p1745_p6 }
  0xe8   : > { %p1741_p7 = pneg %p1740_p4 }
  0xea   : > { %p1748_p11 = pnand %p1747_p10, %p1741_p7 }
  0xec   : > { %1751 = shalt.err (!%p1748_p11)  }
  0xed   : > { %1433 = dma.hbm_to_vmem [thread:$0]  (%p1452_p9), %s233_s30, 16, %s244_s22, [#allocation3 + $0x7] }
  0xee   : > { %s2716_s29 = sld [smem:[#allocation5 + $0x9]]  ;;  %s1295_s23 = sshll.u32 %s2698_s13, 4 }
  0xef   : > { %s2718_s12 = sld [smem:[#allocation5 + $0xa]]  ;;  %s2425_s27 = smov [#allocation2 + $0x9]  }
  0xf0   : > { %s275_s7 = sshll.u32 %s2425_s27, 4  ;;  %s249_s28 = scalar_lea.hbm %s3204_s1, %s1295_s23  ;;  %s2724_s7 = int_to_ptr.vmem [resolvable:$true] %s275_s7 }
  0xf1   : > { %s1752_s2 = scalar_lea.hbm %s249_s28, 16  ;;  %p1757_p1 = scmp.lt.s32.totalorder %s249_s28, %s3204_s1 }
  0xf2   : > { %p1753_p12 = scmp.ne.s32.totalorder %s249_s28, %s1752_s2  ;;  %p1758_p2 = scmp.lt.s32.totalorder %s2549_s10, %s1752_s2 }
  0xf4   : > { %p1754_p13 = pnand %p1753_p12, %p1452_p9  ;;  %p1759_p3 = por %p1758_p2, %p1757_p1 }
  0xf6   : > { %p1755_p0 = pneg %p1754_p13 }
  0xf8   : > { %p1760_p4 = pnand %p1759_p3, %p1755_p0 }
  0xfa   : > { %1763 = shalt.err (!%p1760_p4)  }
  0xfb   : > { %s1764_s13 = scalar_lea.vmem %s260_s4, 16  ;;  %p1771_p10 = scmp.lt.s32.totalorder %s260_s4, %s2529_s11 }
  0xfc   : > { %p1765_p7 = scmp.ne.s32.totalorder %s260_s4, %s1764_s13  ;;  %p1772_p11 = scmp.lt.s32.totalorder %s2560_s26, %s1764_s13 }
  0xfe   : > { %p1766_p6 = pnand %p1765_p7, %p1452_p9  ;;  %p1773_p12 = por %p1772_p11, %p1771_p10 }
 0x100   : > { %p1767_p8 = pneg %p1766_p6 }
 0x102   : > { %p1774_p13 = pnand %p1773_p12, %p1767_p8 }
 0x104   : > { %1777 = shalt.err (!%p1774_p13)  }
 0x105   : > { %1434 = dma.hbm_to_vmem [thread:$0]  (%p1452_p9), %s249_s28, 16, %s260_s4, [#allocation3 + $0x8] }
 0x106   : > { %s2738_s5 = sld [smem:[#allocation5 + $0xb]]  ;;  %s1297_s6 = sshll.u32 %s2716_s29, 4 }
 0x107   : > { %s2426_s21 = smov [#allocation2 + $0xa]   ;;  %s265_s19 = scalar_lea.hbm %s3204_s1, %s1297_s6 }
 0x108   : > { %s291_s9 = sshll.u32 %s2426_s21, 4  ;;  %s1299_s14 = sshll.u32 %s2718_s12, 4  ;;  %s292_s9 = int_to_ptr.vmem [resolvable:$true] %s291_s9 }
 0x109   : > { %s1778_s2 = scalar_lea.hbm %s265_s19, 16  ;;  %p1783_p3 = scmp.lt.s32.totalorder %s265_s19, %s3204_s1 }
 0x10a   : > { %p1779_p0 = scmp.ne.s32.totalorder %s265_s19, %s1778_s2  ;;  %p1784_p4 = scmp.lt.s32.totalorder %s2549_s10, %s1778_s2 }
 0x10c   : > { %p1780_p1 = pnand %p1779_p0, %p1452_p9  ;;  %p1785_p7 = por %p1784_p4, %p1783_p3 }
 0x10e   : > { %p1781_p2 = pneg %p1780_p1 }
 0x110   : > { %p1786_p6 = pnand %p1785_p7, %p1781_p2 }
 0x112   : > { %1789 = shalt.err (!%p1786_p6)  }
 0x113   : > { %s1790_s4 = scalar_lea.vmem %s2724_s7, 16  ;;  %p1797_p12 = scmp.lt.s32.totalorder %s2724_s7, %s2529_s11 }
 0x114   : > { %p1791_p8 = scmp.ne.s32.totalorder %s2724_s7, %s1790_s4  ;;  %p1798_p13 = scmp.lt.s32.totalorder %s2560_s26, %s1790_s4 }
 0x116   : > { %p1792_p10 = pnand %p1791_p8, %p1452_p9  ;;  %p1799_p0 = por %p1798_p13, %p1797_p12 }
 0x118   : > { %p1793_p11 = pneg %p1792_p10 }
 0x11a   : > { %p1800_p1 = pnand %p1799_p0, %p1793_p11 }
 0x11c   : > { %1803 = shalt.err (!%p1800_p1)  }
 0x11d   : > { %1435 = dma.hbm_to_vmem [thread:$0]  (%p1452_p9), %s265_s19, 16, %s2724_s7, [#allocation3 + $0x9] }
 0x11e   : > { %s281_s28 = scalar_lea.hbm %s3204_s1, %s1299_s14 }
 0x11f   : > { %s1804_s13 = scalar_lea.hbm %s281_s28, 16  ;;  %p1809_p7 = scmp.lt.s32.totalorder %s281_s28, %s3204_s1 }
 0x120   : > { %p1805_p2 = scmp.ne.s32.totalorder %s281_s28, %s1804_s13  ;;  %p1810_p6 = scmp.lt.s32.totalorder %s2549_s10, %s1804_s13 }
 0x122   : > { %p1806_p3 = pnand %p1805_p2, %p1452_p9  ;;  %p1811_p8 = por %p1810_p6, %p1809_p7 }
 0x124   : > { %p1807_p4 = pneg %p1806_p3 }
 0x126   : > { %p1812_p10 = pnand %p1811_p8, %p1807_p4 }
 0x128   : > { %1815 = shalt.err (!%p1812_p10)  }
 0x129   : > { %s1816_s23 = scalar_lea.vmem %s292_s9, 16  ;;  %p1823_p0 = scmp.lt.s32.totalorder %s292_s9, %s2529_s11 }
 0x12a   : > { %p1817_p11 = scmp.ne.s32.totalorder %s292_s9, %s1816_s23  ;;  %p1824_p1 = scmp.lt.s32.totalorder %s2560_s26, %s1816_s23 }
 0x12c   : > { %p1818_p12 = pnand %p1817_p11, %p1452_p9  ;;  %p1825_p2 = por %p1824_p1, %p1823_p0 }
 0x12e   : > { %p1819_p13 = pneg %p1818_p12 }
 0x130   : > { %p1826_p3 = pnand %p1825_p2, %p1819_p13 }
 0x132   : > { %1829 = shalt.err (!%p1826_p3)  }
 0x133   : > { %1436 = dma.hbm_to_vmem [thread:$0]  (%p1452_p9), %s281_s28, 16, %s292_s9, [#allocation3 + $0xa] }
 0x134   : > { %s1301_s7 = sshll.u32 %s2738_s5, 4  ;;  %s2427_s2 = smov [#allocation2 + $0xb]  }
 0x135   : > { %s297_s14 = scalar_lea.hbm %s3204_s1, %s1301_s7  ;;  %s307_s22 = sshll.u32 %s2427_s2, 4  ;;  %s308_s22 = int_to_ptr.vmem [resolvable:$true] %s307_s22 }
 0x136   : > { %s2780_s30 = sld [smem:[#allocation5 + $0xc]]  ;;  %s1830_s4 = scalar_lea.hbm %s297_s14, 16 }
 0x137   : > { %p1831_p4 = scmp.ne.s32.totalorder %s297_s14, %s1830_s4  ;;  %p1835_p8 = scmp.lt.s32.totalorder %s297_s14, %s3204_s1 }
 0x138   : > { %p1836_p10 = scmp.lt.s32.totalorder %s2549_s10, %s1830_s4 }
 0x139   : > { %p1832_p7 = pnand %p1831_p4, %p1452_p9 }
 0x13a   : > { %p1837_p11 = por %p1836_p10, %p1835_p8 }
 0x13b   : > { %p1833_p6 = pneg %p1832_p7 }
 0x13d   : > { %p1838_p12 = pnand %p1837_p11, %p1833_p6 }
 0x13f   : > { %1841 = shalt.err (!%p1838_p12)  }
 0x140   : > { %s1842_s5 = scalar_lea.vmem %s308_s22, 16  ;;  %p1849_p2 = scmp.lt.s32.totalorder %s308_s22, %s2529_s11 }
 0x141   : > { %p1843_p13 = scmp.ne.s32.totalorder %s308_s22, %s1842_s5  ;;  %p1850_p3 = scmp.lt.s32.totalorder %s2560_s26, %s1842_s5 }
 0x143   : > { %p1844_p0 = pnand %p1843_p13, %p1452_p9  ;;  %p1851_p4 = por %p1850_p3, %p1849_p2 }
 0x145   : > { %p1845_p1 = pneg %p1844_p0 }
 0x147   : > { %p1852_p7 = pnand %p1851_p4, %p1845_p1 }
 0x149   : > { %1855 = shalt.err (!%p1852_p7)  }
 0x14a   : > { %1437 = dma.hbm_to_vmem [thread:$0]  (%p1452_p9), %s297_s14, 16, %s308_s22, [#allocation3 + $0xb] }
 0x14b   : > { %s2794_s9 = sld [smem:[#allocation5 + $0xd]]  ;;  %s2428_s28 = smov [#allocation2 + $0xc]  }
 0x14c   : > { %s323_s13 = sshll.u32 %s2428_s28, 4  ;;  %s2429_s6 = smov [#allocation2 + $0xd]   ;;  %s324_s13 = int_to_ptr.vmem [resolvable:$true] %s323_s13 }
 0x14d   : > { %s339_s21 = sshll.u32 %s2429_s6, 4  ;;  %s2798_s23 = sld [smem:[#allocation5 + $0xe]]  ;;  %s2796_s21 = int_to_ptr.vmem [resolvable:$true] %s339_s21 }
 0x14e   : > { %s1303_s7 = sshll.u32 %s2780_s30, 4  ;;  %s2430_s4 = smov [#allocation2 + $0xe]  }
 0x14f   : > { %s313_s2 = scalar_lea.hbm %s3204_s1, %s1303_s7  ;;  %s355_s29 = sshll.u32 %s2430_s4, 4  ;;  %s2817_s29 = int_to_ptr.vmem [resolvable:$true] %s355_s29 }
 0x150   : > { %s1856_s14 = scalar_lea.hbm %s313_s2, 16  ;;  %p1861_p11 = scmp.lt.s32.totalorder %s313_s2, %s3204_s1 }
 0x151   : > { %p1857_p6 = scmp.ne.s32.totalorder %s313_s2, %s1856_s14  ;;  %p1862_p12 = scmp.lt.s32.totalorder %s2549_s10, %s1856_s14 }
 0x153   : > { %p1858_p8 = pnand %p1857_p6, %p1452_p9  ;;  %p1863_p13 = por %p1862_p12, %p1861_p11 }
 0x155   : > { %p1859_p10 = pneg %p1858_p8 }
 0x157   : > { %p1864_p0 = pnand %p1863_p13, %p1859_p10 }
 0x159   : > { %1867 = shalt.err (!%p1864_p0)  }
 0x15a   : > { %s1868_s30 = scalar_lea.vmem %s324_s13, 16  ;;  %p1875_p4 = scmp.lt.s32.totalorder %s324_s13, %s2529_s11 }
 0x15b   : > { %p1869_p1 = scmp.ne.s32.totalorder %s324_s13, %s1868_s30  ;;  %p1876_p7 = scmp.lt.s32.totalorder %s2560_s26, %s1868_s30 }
 0x15d   : > { %p1870_p2 = pnand %p1869_p1, %p1452_p9  ;;  %p1877_p6 = por %p1876_p7, %p1875_p4 }
 0x15f   : > { %p1871_p3 = pneg %p1870_p2 }
 0x161   : > { %p1878_p8 = pnand %p1877_p6, %p1871_p3 }
 0x163   : > { %1881 = shalt.err (!%p1878_p8)  }
 0x164   : > { %1438 = dma.hbm_to_vmem [thread:$0]  (%p1452_p9), %s313_s2, 16, %s324_s13, [#allocation3 + $0xc] }
 0x165   : > { %s1305_s5 = sshll.u32 %s2794_s9, 4  ;;  %s2822_s27 = sld [smem:[#allocation5 + $0xf]] }
 0x166   : > { %s329_s7 = scalar_lea.hbm %s3204_s1, %s1305_s5 }
 0x167   : > { %s1882_s19 = scalar_lea.hbm %s329_s7, 16  ;;  %p1887_p13 = scmp.lt.s32.totalorder %s329_s7, %s3204_s1 }
 0x168   : > { %p1883_p10 = scmp.ne.s32.totalorder %s329_s7, %s1882_s19  ;;  %p1888_p0 = scmp.lt.s32.totalorder %s2549_s10, %s1882_s19 }
 0x16a   : > { %p1884_p11 = pnand %p1883_p10, %p1452_p9  ;;  %p1889_p1 = por %p1888_p0, %p1887_p13 }
 0x16c   : > { %p1885_p12 = pneg %p1884_p11 }
 0x16e   : > { %p1890_p2 = pnand %p1889_p1, %p1885_p12 }
 0x170   : > { %1893 = shalt.err (!%p1890_p2)  }
 0x171   : > { %s1894_s9 = scalar_lea.vmem %s2796_s21, 16  ;;  %p1901_p6 = scmp.lt.s32.totalorder %s2796_s21, %s2529_s11 }
 0x172   : > { %p1895_p3 = scmp.ne.s32.totalorder %s2796_s21, %s1894_s9  ;;  %p1902_p8 = scmp.lt.s32.totalorder %s2560_s26, %s1894_s9 }
 0x174   : > { %p1896_p4 = pnand %p1895_p3, %p1452_p9  ;;  %p1903_p10 = por %p1902_p8, %p1901_p6 }
 0x176   : > { %p1897_p7 = pneg %p1896_p4 }
 0x178   : > { %p1904_p11 = pnand %p1903_p10, %p1897_p7 }
 0x17a   : > { %1907 = shalt.err (!%p1904_p11)  }
 0x17b   : > { %1439 = dma.hbm_to_vmem [thread:$0]  (%p1452_p9), %s329_s7, 16, %s2796_s21, [#allocation3 + $0xd] }
 0x17c   : > { %s1307_s13 = sshll.u32 %s2798_s23, 4  ;;  %s2431_s30 = smov [#allocation2 + $0xf]  }
 0x17d   : > { %s345_s12 = scalar_lea.hbm %s3204_s1, %s1307_s13  ;;  %s371_s5 = sshll.u32 %s2431_s30, 4  ;;  %s372_s5 = int_to_ptr.vmem [resolvable:$true] %s371_s5 }
 0x17e   : > { %s1908_s28 = scalar_lea.hbm %s345_s12, 16  ;;  %p1913_p1 = scmp.lt.s32.totalorder %s345_s12, %s3204_s1 }
 0x17f   : > { %p1909_p12 = scmp.ne.s32.totalorder %s345_s12, %s1908_s28  ;;  %p1914_p2 = scmp.lt.s32.totalorder %s2549_s10, %s1908_s28 }
 0x181   : > { %p1910_p13 = pnand %p1909_p12, %p1452_p9  ;;  %p1915_p3 = por %p1914_p2, %p1913_p1 }
 0x183   : > { %p1911_p0 = pneg %p1910_p13 }
 0x185   : > { %p1916_p4 = pnand %p1915_p3, %p1911_p0 }
 0x187   : > { %1919 = shalt.err (!%p1916_p4)  }
 0x188   : > { %s1920_s21 = scalar_lea.vmem %s2817_s29, 16  ;;  %p1927_p10 = scmp.lt.s32.totalorder %s2817_s29, %s2529_s11 }
 0x189   : > { %p1921_p7 = scmp.ne.s32.totalorder %s2817_s29, %s1920_s21  ;;  %p1928_p11 = scmp.lt.s32.totalorder %s2560_s26, %s1920_s21 }
 0x18b   : > { %p1922_p6 = pnand %p1921_p7, %p1452_p9  ;;  %p1929_p12 = por %p1928_p11, %p1927_p10 }
 0x18d   : > { %p1923_p8 = pneg %p1922_p6 }
 0x18f   : > { %p1930_p13 = pnand %p1929_p12, %p1923_p8 }
 0x191   : > { %1933 = shalt.err (!%p1930_p13)  }
 0x192   : > { %1440 = dma.hbm_to_vmem [thread:$0]  (%p1452_p9), %s345_s12, 16, %s2817_s29, [#allocation3 + $0xe] }
 0x193   : > { %s2861_s23 = sadd.s32 1, %s2479_s0  ;;  %s1309_s7 = sshll.u32 %s2822_s27, 4 }
 0x194   : > { %s361_s9 = scalar_lea.hbm %s3204_s1, %s1309_s7 }
 0x195   : > { %s1934_s13 = scalar_lea.hbm %s361_s9, 16  ;;  %p1939_p3 = scmp.lt.s32.totalorder %s361_s9, %s3204_s1 }
 0x196   : > { %p1935_p0 = scmp.ne.s32.totalorder %s361_s9, %s1934_s13  ;;  %p1940_p4 = scmp.lt.s32.totalorder %s2549_s10, %s1934_s13 }
 0x198   : > { %p1936_p1 = pnand %p1935_p0, %p1452_p9  ;;  %p1941_p7 = por %p1940_p4, %p1939_p3 }
 0x19a   : > { %p1937_p2 = pneg %p1936_p1 }
 0x19c   : > { %p1942_p6 = pnand %p1941_p7, %p1937_p2 }
 0x19e   : > { %1945 = shalt.err (!%p1942_p6)  }
 0x19f   : > { %s1946_s29 = scalar_lea.vmem %s372_s5, 16  ;;  %p1953_p12 = scmp.lt.s32.totalorder %s372_s5, %s2529_s11 }
 0x1a0   : > { %p1947_p8 = scmp.ne.s32.totalorder %s372_s5, %s1946_s29  ;;  %p1954_p13 = scmp.lt.s32.totalorder %s2560_s26, %s1946_s29 }
 0x1a2   : > { %p1948_p10 = pnand %p1947_p8, %p1452_p9  ;;  %p1955_p0 = por %p1954_p13, %p1953_p12 }
 0x1a4   : > { %p1949_p11 = pneg %p1948_p10 }
 0x1a6   : > { %p1956_p1 = pnand %p1955_p0, %p1949_p11 }
 0x1a8   : > { %1959 = shalt.err (!%p1956_p1)  }
 0x1a9   : > { %1441 = dma.hbm_to_vmem [thread:$0]  (%p1452_p9), %s361_s9, 16, %s372_s5, [#allocation3 + $0xf] }
 0x1aa   : > { %s2880_s27 = scalar_lea.vmem [#allocation9], %s2527_s8  ;;  %p1310_p2 = scmp.ge.s32.totalorder %s2861_s23, 2 }
 0x1ab   : > { %p380_p3 = scmp.lt.s32.totalorder (!%p1310_p2), %s2861_s23, 0  ;;  %s381_s12 = ssub.s32 (!%p1310_p2), 0, %s2861_s23 }
 0x1ac   : > { %379 = sbr.rel (%p1310_p2) target bundleno = 769 (0x301), region = 100  ;;  %s1311_s30 = smin.u32 (!%p1310_p2), %s381_s12, %s2861_s23 }
 0x1ad   : > { %s1418_s28 = sshll.u32 (!%p1310_p2), %s2479_s0, 4  ;;  %s383_s6 = sand.u32 (!%p1310_p2), 1, %s1311_s30  }
 0x1ae   : > { %s2887_s19 = sadd.s32 (!%p1310_p2), 16, %s1418_s28  ;;  %s384_s8 = ssub.s32 (!%p1310_p2), 0, %s383_s6 }
 0x1af   : > { %s393_s5 = sld [smem:[#allocation5 + %s2887_s19]] (!%p1310_p2)  ;;  %s410_s21 = sadd.s32 (!%p1310_p2), 1, %s2887_s19 }
 0x1b0   : > { %s428_s7 = sadd.s32 (!%p1310_p2), 2, %s2887_s19  ;;  %s2892_s14 = sld [smem:[#allocation5 + %s410_s21]] (!%p1310_p2) }
 0x1b1   : > { %s3237_s8 = smov (!%p380_p3, %s384_s8), %s383_s6  ;;  %s2895_s13 = sld [smem:[#allocation5 + %s428_s7]] }
 0x1b2   : > { %p1313_p9 = scmp.lt.s32.totalorder %s3237_s8, 0  ;;  %s390_s4 = sadd.s32 2, %s3237_s8 }
 0x1b4   : > { %s3239_s4 = smov (!%p1313_p9, %s390_s4), %s3237_s8 }
 0x1b5   : > { %s1315_s9 = sshll.u32 %s393_s5, 4  ;;  %s1316_s12 = sshll.u32 %s3239_s4, 4 }
 0x1b6   : > { %s395_s29 = scalar_lea.hbm %s3204_s1, %s1315_s9  ;;  %s2900_s30 = scalar_lea.vmem [#allocation2], %s1316_s12 }
 0x1b7   : > { %s406_s28 = sshll.u32 %s2900_s30, 4  ;;  %s1075_s6 = scalar_lea.vmem %s2900_s30, 1 [#allocation2]  ;;  %s407_s28 = int_to_ptr.vmem [resolvable:$true] %s406_s28 }
 0x1b8   : > { %s1317_s21 = sshll.u32 %s2892_s14, 4  ;;  %s2905_s17 = scalar_lea.sflag [#allocation3], %s1316_s12 }
 0x1b9   : > { %s1960_s23 = scalar_lea.hbm %s395_s29, 16  ;;  %p1963_p7 = scmp.lt.s32.totalorder %s395_s29, %s3204_s1 }
 0x1ba   : > { %p1961_p4 = scmp.ne.s32.totalorder %s395_s29, %s1960_s23  ;;  %p1964_p6 = scmp.lt.s32.totalorder %s2549_s10, %s1960_s23 }
 0x1bc   : > { %p1965_p8 = por %p1964_p6, %p1963_p7 }
 0x1be   : > { %p1966_p10 = pnand %p1965_p8, %p1961_p4 }
 0x1c0   : > { %1969 = shalt.err (!%p1966_p10)  }
 0x1c1   : > { %s1970_s7 = scalar_lea.vmem %s407_s28, 16  ;;  %p1975_p12 = scmp.lt.s32.totalorder %s407_s28, %s2529_s11 }
 0x1c2   : > { %p1971_p11 = scmp.ne.s32.totalorder %s407_s28, %s1970_s7  ;;  %p1976_p13 = scmp.lt.s32.totalorder %s2560_s26, %s1970_s7 }
 0x1c4   : > { %p1977_p0 = por %p1976_p13, %p1975_p12 }
 0x1c6   : > { %p1978_p1 = pnand %p1977_p0, %p1971_p11 }
 0x1c8   : > { %1981 = shalt.err (!%p1978_p1)  }
 0x1c9   : > { %409 = dma.hbm_to_vmem [thread:$0]  %s395_s29, 16, %s407_s28, %s2905_s17 }
 0x1ca   : > { %s413_s23 = scalar_lea.hbm %s3204_s1, %s1317_s21  ;;  %s1078_s9 = scalar_lea.sflag %s2905_s17, 1 [#allocation3] }
 0x1cb   : > { %s424_s2 = sshll.u32 %s1075_s6, 4  ;;  %s1320_s22 = sshll.u32 %s2895_s13, 4  ;;  %s425_s2 = int_to_ptr.vmem [resolvable:$true] %s424_s2 }
 0x1cc   : > { %s2922_s5 = scalar_lea.hbm %s3204_s1, %s1320_s22  ;;  %s1982_s7 = scalar_lea.hbm %s413_s23, 16 }
 0x1cd   : > { %p1983_p2 = scmp.ne.s32.totalorder %s413_s23, %s1982_s7  ;;  %p1985_p3 = scmp.lt.s32.totalorder %s413_s23, %s3204_s1 }
 0x1ce   : > { %p1986_p9 = scmp.lt.s32.totalorder %s2549_s10, %s1982_s7 }
 0x1d0   : > { %p1987_p4 = por %p1986_p9, %p1985_p3 }
 0x1d2   : > { %p1988_p7 = pnand %p1987_p4, %p1983_p2 }
 0x1d4   : > { %1991 = shalt.err (!%p1988_p7)  }
 0x1d5   : > { %s1992_s29 = scalar_lea.vmem %s425_s2, 16  ;;  %p1997_p8 = scmp.lt.s32.totalorder %s425_s2, %s2529_s11 }
 0x1d6   : > { %p1993_p6 = scmp.ne.s32.totalorder %s425_s2, %s1992_s29  ;;  %p1998_p10 = scmp.lt.s32.totalorder %s2560_s26, %s1992_s29 }
 0x1d8   : > { %p1999_p11 = por %p1998_p10, %p1997_p8 }
 0x1da   : > { %p2000_p12 = pnand %p1999_p11, %p1993_p6 }
 0x1dc   : > { %2003 = shalt.err (!%p2000_p12)  }
 0x1dd   : > { %427 = dma.hbm_to_vmem [thread:$0]  %s413_s23, 16, %s425_s2, %s1078_s9 }
 0x1de   : > { %s1083_s20 = scalar_lea.vmem %s2900_s30, 2 [#allocation2]  ;;  %s1086_s25 = scalar_lea.sflag %s2905_s17, 2 [#allocation3] }
 0x1df   : > { %s442_s13 = sshll.u32 %s1083_s20, 4  ;;  %s3225_s28 = sadd.s32 3, %s2887_s19  ;;  %s443_s13 = int_to_ptr.vmem [resolvable:$true] %s442_s13 }
 0x1e0   : > { %s447_s6 = sld [smem:[#allocation5 + %s3225_s28]]  ;;  %s1091_s21 = scalar_lea.vmem %s2900_s30, 3 [#allocation2] }
 0x1e1   : > { %s2004_s4 = scalar_lea.hbm %s2922_s5, 16  ;;  %p2007_p0 = scmp.lt.s32.totalorder %s2922_s5, %s3204_s1 }
 0x1e2   : > { %p2005_p13 = scmp.ne.s32.totalorder %s2922_s5, %s2004_s4  ;;  %p2008_p1 = scmp.lt.s32.totalorder %s2549_s10, %s2004_s4 }
 0x1e4   : > { %p2009_p2 = por %p2008_p1, %p2007_p0 }
 0x1e6   : > { %p2010_p3 = pnand %p2009_p2, %p2005_p13 }
 0x1e8   : > { %2013 = shalt.err (!%p2010_p3)  }
 0x1e9   : > { %s2014_s23 = scalar_lea.vmem %s443_s13, 16  ;;  %p2019_p4 = scmp.lt.s32.totalorder %s443_s13, %s2529_s11 }
 0x1ea   : > { %p2015_p9 = scmp.ne.s32.totalorder %s443_s13, %s2014_s23  ;;  %p2020_p7 = scmp.lt.s32.totalorder %s2560_s26, %s2014_s23 }
 0x1ec   : > { %p2021_p6 = por %p2020_p7, %p2019_p4 }
 0x1ee   : > { %p2022_p8 = pnand %p2021_p6, %p2015_p9 }
 0x1f0   : > { %2025 = shalt.err (!%p2022_p8)  }
 0x1f1   : > { %445 = dma.hbm_to_vmem [thread:$0]  %s2922_s5, 16, %s443_s13, %s1086_s25 }
 0x1f2   : > { %s1094_s9 = scalar_lea.sflag %s2905_s17, 3 [#allocation3]  ;;  %s460_s2 = sshll.u32 %s1091_s21, 4  ;;  %s461_s2 = int_to_ptr.vmem [resolvable:$true] %s460_s2 }
 0x1f3   : > { %s464_s12 = sadd.s32 4, %s2887_s19  ;;  %s1099_s7 = scalar_lea.vmem %s2900_s30, 4 [#allocation2] }
 0x1f4   : > { %s465_s8 = sld [smem:[#allocation5 + %s464_s12]]  ;;  %s1323_s29 = sshll.u32 %s447_s6, 4 }
 0x1f5   : > { %s1102_s20 = scalar_lea.sflag %s2905_s17, 4 [#allocation3]  ;;  %s449_s14 = scalar_lea.hbm %s3204_s1, %s1323_s29 }
 0x1f6   : > { %s478_s22 = sshll.u32 %s1099_s7, 4  ;;  %s2026_s23 = scalar_lea.hbm %s449_s14, 16  ;;  %s479_s22 = int_to_ptr.vmem [resolvable:$true] %s478_s22 }
 0x1f7   : > { %p2027_p10 = scmp.ne.s32.totalorder %s449_s14, %s2026_s23  ;;  %p2029_p11 = scmp.lt.s32.totalorder %s449_s14, %s3204_s1 }
 0x1f8   : > { %p2030_p12 = scmp.lt.s32.totalorder %s2549_s10, %s2026_s23 }
 0x1fa   : > { %p2031_p13 = por %p2030_p12, %p2029_p11 }
 0x1fc   : > { %p2032_p0 = pnand %p2031_p13, %p2027_p10 }
 0x1fe   : > { %2035 = shalt.err (!%p2032_p0)  }
 0x1ff   : > { %s2036_s5 = scalar_lea.vmem %s461_s2, 16  ;;  %p2041_p2 = scmp.lt.s32.totalorder %s461_s2, %s2529_s11 }
 0x200   : > { %p2037_p1 = scmp.ne.s32.totalorder %s461_s2, %s2036_s5  ;;  %p2042_p3 = scmp.lt.s32.totalorder %s2560_s26, %s2036_s5 }
 0x202   : > { %p2043_p9 = por %p2042_p3, %p2041_p2 }
 0x204   : > { %p2044_p4 = pnand %p2043_p9, %p2037_p1 }
 0x206   : > { %2047 = shalt.err (!%p2044_p4)  }
 0x207   : > { %463 = dma.hbm_to_vmem [thread:$0]  %s449_s14, 16, %s461_s2, %s1094_s9 }
 0x208   : > { %s482_s15 = sadd.s32 5, %s2887_s19  ;;  %s1107_s25 = scalar_lea.vmem %s2900_s30, 5 [#allocation2] }
 0x209   : > { %s483_s18 = sld [smem:[#allocation5 + %s482_s15]]  ;;  %s1326_s13 = sshll.u32 %s465_s8, 4 }
 0x20a   : > { %s1110_s6 = scalar_lea.sflag %s2905_s17, 5 [#allocation3]  ;;  %s467_s7 = scalar_lea.hbm %s3204_s1, %s1326_s13 }
 0x20b   : > { %s496_s29 = sshll.u32 %s1107_s25, 4  ;;  %s2048_s28 = scalar_lea.hbm %s467_s7, 16  ;;  %s497_s29 = int_to_ptr.vmem [resolvable:$true] %s496_s29 }
 0x20c   : > { %p2049_p7 = scmp.ne.s32.totalorder %s467_s7, %s2048_s28  ;;  %p2051_p6 = scmp.lt.s32.totalorder %s467_s7, %s3204_s1 }
 0x20d   : > { %p2052_p8 = scmp.lt.s32.totalorder %s2549_s10, %s2048_s28 }
 0x20f   : > { %p2053_p10 = por %p2052_p8, %p2051_p6 }
 0x211   : > { %p2054_p11 = pnand %p2053_p10, %p2049_p7 }
 0x213   : > { %2057 = shalt.err (!%p2054_p11)  }
 0x214   : > { %s2058_s9 = scalar_lea.vmem %s479_s22, 16  ;;  %p2063_p13 = scmp.lt.s32.totalorder %s479_s22, %s2529_s11 }
 0x215   : > { %p2059_p12 = scmp.ne.s32.totalorder %s479_s22, %s2058_s9  ;;  %p2064_p0 = scmp.lt.s32.totalorder %s2560_s26, %s2058_s9 }
 0x217   : > { %p2065_p1 = por %p2064_p0, %p2063_p13 }
 0x219   : > { %p2066_p2 = pnand %p2065_p1, %p2059_p12 }
 0x21b   : > { %2069 = shalt.err (!%p2066_p2)  }
 0x21c   : > { %481 = dma.hbm_to_vmem [thread:$0]  %s467_s7, 16, %s479_s22, %s1102_s20 }
 0x21d   : > { %s500_s2 = sadd.s32 6, %s2887_s19  ;;  %s1115_s14 = scalar_lea.vmem %s2900_s30, 6 [#allocation2] }
 0x21e   : > { %s501_s8 = sld [smem:[#allocation5 + %s500_s2]]  ;;  %s1329_s5 = sshll.u32 %s483_s18, 4 }
 0x21f   : > { %s1118_s15 = scalar_lea.sflag %s2905_s17, 6 [#allocation3]  ;;  %s485_s21 = scalar_lea.hbm %s3204_s1, %s1329_s5 }
 0x220   : > { %s514_s12 = sshll.u32 %s1115_s14, 4  ;;  %s2070_s28 = scalar_lea.hbm %s485_s21, 16  ;;  %s515_s12 = int_to_ptr.vmem [resolvable:$true] %s514_s12 }
 0x221   : > { %p2071_p3 = scmp.ne.s32.totalorder %s485_s21, %s2070_s28  ;;  %p2073_p9 = scmp.lt.s32.totalorder %s485_s21, %s3204_s1 }
 0x222   : > { %p2074_p4 = scmp.lt.s32.totalorder %s2549_s10, %s2070_s28 }
 0x224   : > { %p2075_p7 = por %p2074_p4, %p2073_p9 }
 0x226   : > { %p2076_p6 = pnand %p2075_p7, %p2071_p3 }
 0x228   : > { %2079 = shalt.err (!%p2076_p6)  }
 0x229   : > { %s2080_s20 = scalar_lea.vmem %s497_s29, 16  ;;  %p2085_p10 = scmp.lt.s32.totalorder %s497_s29, %s2529_s11 }
 0x22a   : > { %p2081_p8 = scmp.ne.s32.totalorder %s497_s29, %s2080_s20  ;;  %p2086_p11 = scmp.lt.s32.totalorder %s2560_s26, %s2080_s20 }
 0x22c   : > { %p2087_p12 = por %p2086_p11, %p2085_p10 }
 0x22e   : > { %p2088_p13 = pnand %p2087_p12, %p2081_p8 }
 0x230   : > { %2091 = shalt.err (!%p2088_p13)  }
 0x231   : > { %499 = dma.hbm_to_vmem [thread:$0]  %s485_s21, 16, %s497_s29, %s1110_s6 }
 0x232   : > { %s518_s22 = sadd.s32 7, %s2887_s19  ;;  %s1123_s7 = scalar_lea.vmem %s2900_s30, 7 [#allocation2] }
 0x233   : > { %s519_s18 = sld [smem:[#allocation5 + %s518_s22]]  ;;  %s1332_s9 = sshll.u32 %s501_s8, 4 }
 0x234   : > { %s1126_s2 = scalar_lea.sflag %s2905_s17, 7 [#allocation3]  ;;  %s503_s25 = scalar_lea.hbm %s3204_s1, %s1332_s9 }
 0x235   : > { %s532_s13 = sshll.u32 %s1123_s7, 4  ;;  %s2092_s28 = scalar_lea.hbm %s503_s25, 16  ;;  %s533_s13 = int_to_ptr.vmem [resolvable:$true] %s532_s13 }
 0x236   : > { %p2093_p0 = scmp.ne.s32.totalorder %s503_s25, %s2092_s28  ;;  %p2095_p1 = scmp.lt.s32.totalorder %s503_s25, %s3204_s1 }
 0x237   : > { %p2096_p2 = scmp.lt.s32.totalorder %s2549_s10, %s2092_s28 }
 0x239   : > { %p2097_p3 = por %p2096_p2, %p2095_p1 }
 0x23b   : > { %p2098_p9 = pnand %p2097_p3, %p2093_p0 }
 0x23d   : > { %2101 = shalt.err (!%p2098_p9)  }
 0x23e   : > { %s2102_s6 = scalar_lea.vmem %s515_s12, 16  ;;  %p2107_p7 = scmp.lt.s32.totalorder %s515_s12, %s2529_s11 }
 0x23f   : > { %p2103_p4 = scmp.ne.s32.totalorder %s515_s12, %s2102_s6  ;;  %p2108_p6 = scmp.lt.s32.totalorder %s2560_s26, %s2102_s6 }
 0x241   : > { %p2109_p8 = por %p2108_p6, %p2107_p7 }
 0x243   : > { %p2110_p10 = pnand %p2109_p8, %p2103_p4 }
 0x245   : > { %2113 = shalt.err (!%p2110_p10)  }
 0x246   : > { %517 = dma.hbm_to_vmem [thread:$0]  %s503_s25, 16, %s515_s12, %s1118_s15 }
 0x247   : > { %s536_s29 = sadd.s32 8, %s2887_s19  ;;  %s1131_s21 = scalar_lea.vmem %s2900_s30, 8 [#allocation2] }
 0x248   : > { %s537_s8 = sld [smem:[#allocation5 + %s536_s29]]  ;;  %s1335_s20 = sshll.u32 %s519_s18, 4 }
 0x249   : > { %s1134_s22 = scalar_lea.sflag %s2905_s17, 8 [#allocation3]  ;;  %s521_s14 = scalar_lea.hbm %s3204_s1, %s1335_s20 }
 0x24a   : > { %s550_s5 = sshll.u32 %s1131_s21, 4  ;;  %s2114_s28 = scalar_lea.hbm %s521_s14, 16  ;;  %s551_s5 = int_to_ptr.vmem [resolvable:$true] %s550_s5 }
 0x24b   : > { %p2115_p11 = scmp.ne.s32.totalorder %s521_s14, %s2114_s28  ;;  %p2117_p12 = scmp.lt.s32.totalorder %s521_s14, %s3204_s1 }
 0x24c   : > { %p2118_p13 = scmp.lt.s32.totalorder %s2549_s10, %s2114_s28 }
 0x24e   : > { %p2119_p0 = por %p2118_p13, %p2117_p12 }
 0x250   : > { %p2120_p1 = pnand %p2119_p0, %p2115_p11 }
 0x252   : > { %2123 = shalt.err (!%p2120_p1)  }
 0x253   : > { %s2124_s15 = scalar_lea.vmem %s533_s13, 16  ;;  %p2129_p3 = scmp.lt.s32.totalorder %s533_s13, %s2529_s11 }
 0x254   : > { %p2125_p2 = scmp.ne.s32.totalorder %s533_s13, %s2124_s15  ;;  %p2130_p9 = scmp.lt.s32.totalorder %s2560_s26, %s2124_s15 }
 0x256   : > { %p2131_p4 = por %p2130_p9, %p2129_p3 }
 0x258   : > { %p2132_p7 = pnand %p2131_p4, %p2125_p2 }
 0x25a   : > { %2135 = shalt.err (!%p2132_p7)  }
 0x25b   : > { %535 = dma.hbm_to_vmem [thread:$0]  %s521_s14, 16, %s533_s13, %s1126_s2 }
 0x25c   : > { %s554_s12 = sadd.s32 9, %s2887_s19  ;;  %s1139_s25 = scalar_lea.vmem %s2900_s30, 9 [#allocation2] }
 0x25d   : > { %s555_s18 = sld [smem:[#allocation5 + %s554_s12]]  ;;  %s1338_s6 = sshll.u32 %s537_s8, 4 }
 0x25e   : > { %s1142_s29 = scalar_lea.sflag %s2905_s17, 9 [#allocation3]  ;;  %s539_s7 = scalar_lea.hbm %s3204_s1, %s1338_s6 }
 0x25f   : > { %s568_s9 = sshll.u32 %s1139_s25, 4  ;;  %s2136_s28 = scalar_lea.hbm %s539_s7, 16  ;;  %s569_s9 = int_to_ptr.vmem [resolvable:$true] %s568_s9 }
 0x260   : > { %p2137_p6 = scmp.ne.s32.totalorder %s539_s7, %s2136_s28  ;;  %p2139_p8 = scmp.lt.s32.totalorder %s539_s7, %s3204_s1 }
 0x261   : > { %p2140_p10 = scmp.lt.s32.totalorder %s2549_s10, %s2136_s28 }
 0x263   : > { %p2141_p11 = por %p2140_p10, %p2139_p8 }
 0x265   : > { %p2142_p12 = pnand %p2141_p11, %p2137_p6 }
 0x267   : > { %2145 = shalt.err (!%p2142_p12)  }
 0x268   : > { %s2146_s2 = scalar_lea.vmem %s551_s5, 16  ;;  %p2151_p0 = scmp.lt.s32.totalorder %s551_s5, %s2529_s11 }
 0x269   : > { %p2147_p13 = scmp.ne.s32.totalorder %s551_s5, %s2146_s2  ;;  %p2152_p1 = scmp.lt.s32.totalorder %s2560_s26, %s2146_s2 }
 0x26b   : > { %p2153_p2 = por %p2152_p1, %p2151_p0 }
 0x26d   : > { %p2154_p3 = pnand %p2153_p2, %p2147_p13 }
 0x26f   : > { %2157 = shalt.err (!%p2154_p3)  }
 0x270   : > { %553 = dma.hbm_to_vmem [thread:$0]  %s539_s7, 16, %s551_s5, %s1134_s22 }
 0x271   : > { %s572_s13 = sadd.s32 10, %s2887_s19  ;;  %s1147_s14 = scalar_lea.vmem %s2900_s30, 10 [#allocation2] }
 0x272   : > { %s573_s8 = sld [smem:[#allocation5 + %s572_s13]]  ;;  %s1341_s15 = sshll.u32 %s555_s18, 4 }
 0x273   : > { %s1150_s12 = scalar_lea.sflag %s2905_s17, 10 [#allocation3]  ;;  %s557_s21 = scalar_lea.hbm %s3204_s1, %s1341_s15 }
 0x274   : > { %s586_s20 = sshll.u32 %s1147_s14, 4  ;;  %s2158_s28 = scalar_lea.hbm %s557_s21, 16  ;;  %s587_s20 = int_to_ptr.vmem [resolvable:$true] %s586_s20 }
 0x275   : > { %p2159_p9 = scmp.ne.s32.totalorder %s557_s21, %s2158_s28  ;;  %p2161_p4 = scmp.lt.s32.totalorder %s557_s21, %s3204_s1 }
 0x276   : > { %p2162_p7 = scmp.lt.s32.totalorder %s2549_s10, %s2158_s28 }
 0x278   : > { %p2163_p6 = por %p2162_p7, %p2161_p4 }
 0x27a   : > { %p2164_p8 = pnand %p2163_p6, %p2159_p9 }
 0x27c   : > { %2167 = shalt.err (!%p2164_p8)  }
 0x27d   : > { %s2168_s22 = scalar_lea.vmem %s569_s9, 16  ;;  %p2173_p11 = scmp.lt.s32.totalorder %s569_s9, %s2529_s11 }
 0x27e   : > { %p2169_p10 = scmp.ne.s32.totalorder %s569_s9, %s2168_s22  ;;  %p2174_p12 = scmp.lt.s32.totalorder %s2560_s26, %s2168_s22 }
 0x280   : > { %p2175_p13 = por %p2174_p12, %p2173_p11 }
 0x282   : > { %p2176_p0 = pnand %p2175_p13, %p2169_p10 }
 0x284   : > { %2179 = shalt.err (!%p2176_p0)  }
 0x285   : > { %571 = dma.hbm_to_vmem [thread:$0]  %s557_s21, 16, %s569_s9, %s1142_s29 }
 0x286   : > { %s590_s5 = sadd.s32 11, %s2887_s19  ;;  %s1155_s7 = scalar_lea.vmem %s2900_s30, 11 [#allocation2] }
 0x287   : > { %s591_s18 = sld [smem:[#allocation5 + %s590_s5]]  ;;  %s1344_s2 = sshll.u32 %s573_s8, 4 }
 0x288   : > { %s1158_s13 = scalar_lea.sflag %s2905_s17, 11 [#allocation3]  ;;  %s575_s25 = scalar_lea.hbm %s3204_s1, %s1344_s2 }
 0x289   : > { %s604_s6 = sshll.u32 %s1155_s7, 4  ;;  %s2180_s28 = scalar_lea.hbm %s575_s25, 16  ;;  %s605_s6 = int_to_ptr.vmem [resolvable:$true] %s604_s6 }
 0x28a   : > { %p2181_p1 = scmp.ne.s32.totalorder %s575_s25, %s2180_s28  ;;  %p2183_p2 = scmp.lt.s32.totalorder %s575_s25, %s3204_s1 }
 0x28b   : > { %p2184_p3 = scmp.lt.s32.totalorder %s2549_s10, %s2180_s28 }
 0x28d   : > { %p2185_p9 = por %p2184_p3, %p2183_p2 }
 0x28f   : > { %p2186_p4 = pnand %p2185_p9, %p2181_p1 }
 0x291   : > { %2189 = shalt.err (!%p2186_p4)  }
 0x292   : > { %s2190_s29 = scalar_lea.vmem %s587_s20, 16  ;;  %p2195_p6 = scmp.lt.s32.totalorder %s587_s20, %s2529_s11 }
 0x293   : > { %p2191_p7 = scmp.ne.s32.totalorder %s587_s20, %s2190_s29  ;;  %p2196_p8 = scmp.lt.s32.totalorder %s2560_s26, %s2190_s29 }
 0x295   : > { %p2197_p10 = por %p2196_p8, %p2195_p6 }
 0x297   : > { %p2198_p11 = pnand %p2197_p10, %p2191_p7 }
 0x299   : > { %2201 = shalt.err (!%p2198_p11)  }
 0x29a   : > { %589 = dma.hbm_to_vmem [thread:$0]  %s575_s25, 16, %s587_s20, %s1150_s12 }
 0x29b   : > { %s608_s9 = sadd.s32 12, %s2887_s19  ;;  %s1163_s21 = scalar_lea.vmem %s2900_s30, 12 [#allocation2] }
 0x29c   : > { %s609_s8 = sld [smem:[#allocation5 + %s608_s9]]  ;;  %s1347_s22 = sshll.u32 %s591_s18, 4 }
 0x29d   : > { %s1166_s5 = scalar_lea.sflag %s2905_s17, 12 [#allocation3]  ;;  %s593_s14 = scalar_lea.hbm %s3204_s1, %s1347_s22 }
 0x29e   : > { %s622_s15 = sshll.u32 %s1163_s21, 4  ;;  %s2202_s28 = scalar_lea.hbm %s593_s14, 16  ;;  %s623_s15 = int_to_ptr.vmem [resolvable:$true] %s622_s15 }
 0x29f   : > { %p2203_p12 = scmp.ne.s32.totalorder %s593_s14, %s2202_s28  ;;  %p2205_p13 = scmp.lt.s32.totalorder %s593_s14, %s3204_s1 }
 0x2a0   : > { %p2206_p0 = scmp.lt.s32.totalorder %s2549_s10, %s2202_s28 }
 0x2a2   : > { %p2207_p1 = por %p2206_p0, %p2205_p13 }
 0x2a4   : > { %p2208_p2 = pnand %p2207_p1, %p2203_p12 }
 0x2a6   : > { %2211 = shalt.err (!%p2208_p2)  }
 0x2a7   : > { %s2212_s12 = scalar_lea.vmem %s605_s6, 16  ;;  %p2217_p9 = scmp.lt.s32.totalorder %s605_s6, %s2529_s11 }
 0x2a8   : > { %p2213_p3 = scmp.ne.s32.totalorder %s605_s6, %s2212_s12  ;;  %p2218_p4 = scmp.lt.s32.totalorder %s2560_s26, %s2212_s12 }
 0x2aa   : > { %p2219_p7 = por %p2218_p4, %p2217_p9 }
 0x2ac   : > { %p2220_p6 = pnand %p2219_p7, %p2213_p3 }
 0x2ae   : > { %2223 = shalt.err (!%p2220_p6)  }
 0x2af   : > { %607 = dma.hbm_to_vmem [thread:$0]  %s593_s14, 16, %s605_s6, %s1158_s13 }
 0x2b0   : > { %s626_s20 = sadd.s32 13, %s2887_s19  ;;  %s1171_s25 = scalar_lea.vmem %s2900_s30, 13 [#allocation2] }
 0x2b1   : > { %s627_s18 = sld [smem:[#allocation5 + %s626_s20]]  ;;  %s1350_s29 = sshll.u32 %s609_s8, 4 }
 0x2b2   : > { %s1174_s9 = scalar_lea.sflag %s2905_s17, 13 [#allocation3]  ;;  %s611_s7 = scalar_lea.hbm %s3204_s1, %s1350_s29 }
 0x2b3   : > { %s640_s2 = sshll.u32 %s1171_s25, 4  ;;  %s2224_s28 = scalar_lea.hbm %s611_s7, 16  ;;  %s641_s2 = int_to_ptr.vmem [resolvable:$true] %s640_s2 }
 0x2b4   : > { %p2225_p8 = scmp.ne.s32.totalorder %s611_s7, %s2224_s28  ;;  %p2227_p10 = scmp.lt.s32.totalorder %s611_s7, %s3204_s1 }
 0x2b5   : > { %p2228_p11 = scmp.lt.s32.totalorder %s2549_s10, %s2224_s28 }
 0x2b7   : > { %p2229_p12 = por %p2228_p11, %p2227_p10 }
 0x2b9   : > { %p2230_p13 = pnand %p2229_p12, %p2225_p8 }
 0x2bb   : > { %2233 = shalt.err (!%p2230_p13)  }
 0x2bc   : > { %s2234_s13 = scalar_lea.vmem %s623_s15, 16  ;;  %p2239_p1 = scmp.lt.s32.totalorder %s623_s15, %s2529_s11 }
 0x2bd   : > { %p2235_p0 = scmp.ne.s32.totalorder %s623_s15, %s2234_s13  ;;  %p2240_p2 = scmp.lt.s32.totalorder %s2560_s26, %s2234_s13 }
 0x2bf   : > { %p2241_p3 = por %p2240_p2, %p2239_p1 }
 0x2c1   : > { %p2242_p9 = pnand %p2241_p3, %p2235_p0 }
 0x2c3   : > { %2245 = shalt.err (!%p2242_p9)  }
 0x2c4   : > { %625 = dma.hbm_to_vmem [thread:$0]  %s611_s7, 16, %s623_s15, %s1166_s5 }
 0x2c5   : > { %s644_s6 = sadd.s32 14, %s2887_s19  ;;  %s1179_s14 = scalar_lea.vmem %s2900_s30, 14 [#allocation2] }
 0x2c6   : > { %s645_s8 = sld [smem:[#allocation5 + %s644_s6]]  ;;  %s1353_s12 = sshll.u32 %s627_s18, 4 }
 0x2c7   : > { %s1182_s20 = scalar_lea.sflag %s2905_s17, 14 [#allocation3]  ;;  %s629_s21 = scalar_lea.hbm %s3204_s1, %s1353_s12 }
 0x2c8   : > { %s658_s22 = sshll.u32 %s1179_s14, 4  ;;  %s2246_s28 = scalar_lea.hbm %s629_s21, 16  ;;  %s659_s22 = int_to_ptr.vmem [resolvable:$true] %s658_s22 }
 0x2c9   : > { %p2247_p4 = scmp.ne.s32.totalorder %s629_s21, %s2246_s28  ;;  %p2249_p7 = scmp.lt.s32.totalorder %s629_s21, %s3204_s1 }
 0x2ca   : > { %p2250_p6 = scmp.lt.s32.totalorder %s2549_s10, %s2246_s28 }
 0x2cc   : > { %p2251_p8 = por %p2250_p6, %p2249_p7 }
 0x2ce   : > { %p2252_p10 = pnand %p2251_p8, %p2247_p4 }
 0x2d0   : > { %2255 = shalt.err (!%p2252_p10)  }
 0x2d1   : > { %s2256_s5 = scalar_lea.vmem %s641_s2, 16  ;;  %p2261_p12 = scmp.lt.s32.totalorder %s641_s2, %s2529_s11 }
 0x2d2   : > { %p2257_p11 = scmp.ne.s32.totalorder %s641_s2, %s2256_s5  ;;  %p2262_p13 = scmp.lt.s32.totalorder %s2560_s26, %s2256_s5 }
 0x2d4   : > { %p2263_p0 = por %p2262_p13, %p2261_p12 }
 0x2d6   : > { %p2264_p1 = pnand %p2263_p0, %p2257_p11 }
 0x2d8   : > { %2267 = shalt.err (!%p2264_p1)  }
 0x2d9   : > { %643 = dma.hbm_to_vmem [thread:$0]  %s629_s21, 16, %s641_s2, %s1174_s9 }
 0x2da   : > { %s662_s15 = sadd.s32 15, %s2887_s19  ;;  %s1187_s7 = scalar_lea.vmem %s2900_s30, 15 [#allocation2] }
 0x2db   : > { %s663_s18 = sld [smem:[#allocation5 + %s662_s15]]  ;;  %s1356_s13 = sshll.u32 %s645_s8, 4 }
 0x2dc   : > { %s647_s12 = scalar_lea.hbm %s3204_s1, %s1356_s13  ;;  %s676_s25 = sshll.u32 %s1187_s7, 4  ;;  %s677_s25 = int_to_ptr.vmem [resolvable:$true] %s676_s25 }
 0x2dd   : > { %s2268_s29 = scalar_lea.hbm %s647_s12, 16  ;;  %p2271_p3 = scmp.lt.s32.totalorder %s647_s12, %s3204_s1 }
 0x2de   : > { %p2269_p2 = scmp.ne.s32.totalorder %s647_s12, %s2268_s29  ;;  %p2272_p9 = scmp.lt.s32.totalorder %s2549_s10, %s2268_s29 }
 0x2e0   : > { %p2273_p4 = por %p2272_p9, %p2271_p3 }
 0x2e2   : > { %p2274_p7 = pnand %p2273_p4, %p2269_p2 }
 0x2e4   : > { %2277 = shalt.err (!%p2274_p7)  }
 0x2e5   : > { %s2278_s9 = scalar_lea.vmem %s659_s22, 16  ;;  %p2283_p8 = scmp.lt.s32.totalorder %s659_s22, %s2529_s11 }
 0x2e6   : > { %p2279_p6 = scmp.ne.s32.totalorder %s659_s22, %s2278_s9  ;;  %p2284_p10 = scmp.lt.s32.totalorder %s2560_s26, %s2278_s9 }
 0x2e8   : > { %p2285_p11 = por %p2284_p10, %p2283_p8 }
 0x2ea   : > { %p2286_p12 = pnand %p2285_p11, %p2279_p6 }
 0x2ec   : > { %2289 = shalt.err (!%p2286_p12)  }
 0x2ed   : > { %661 = dma.hbm_to_vmem [thread:$0]  %s647_s12, 16, %s659_s22, %s1182_s20 }
 0x2ee   : > { %s1190_s19 = scalar_lea.sflag %s2905_s17, 15 [#allocation3]  ;;  %s1359_s30 = sshll.u32 %s663_s18, 4 }
 0x2ef   : > { %s665_s21 = scalar_lea.hbm %s3204_s1, %s1359_s30 }
 0x2f0   : > { %s2290_s23 = scalar_lea.hbm %s665_s21, 16  ;;  %p2293_p0 = scmp.lt.s32.totalorder %s665_s21, %s3204_s1 }
 0x2f1   : > { %p2291_p13 = scmp.ne.s32.totalorder %s665_s21, %s2290_s23  ;;  %p2294_p1 = scmp.lt.s32.totalorder %s2549_s10, %s2290_s23 }
 0x2f3   : > { %p2295_p2 = por %p2294_p1, %p2293_p0 }
 0x2f5   : > { %p2296_p3 = pnand %p2295_p2, %p2291_p13 }
 0x2f7   : > { %2299 = shalt.err (!%p2296_p3)  }
 0x2f8   : > { %s2300_s7 = scalar_lea.vmem %s677_s25, 16  ;;  %p2305_p4 = scmp.lt.s32.totalorder %s677_s25, %s2529_s11 }
 0x2f9   : > { %p2301_p9 = scmp.ne.s32.totalorder %s677_s25, %s2300_s7  ;;  %p2306_p7 = scmp.lt.s32.totalorder %s2560_s26, %s2300_s7 }
 0x2fb   : > { %p2307_p6 = por %p2306_p7, %p2305_p4 }
 0x2fd   : > { %p2308_p8 = pnand %p2307_p6, %p2301_p9 }
 0x2ff   : > { %2311 = shalt.err (!%p2308_p8)  }
 0x300   : > { %679 = dma.hbm_to_vmem [thread:$0]  %s665_s21, 16, %s677_s25, %s1190_s19 }
 0x301 PF: > { %p680_p10 = scmp.lt.s32.totalorder %s2479_s0, 0  ;;  %s681_s17 = ssub.s32 0, %s2479_s0 }
 0x302   : > { %s1362_s10 = smin.u32 %s2479_s0, %s681_s17 }
 0x303   : > { %s683_s20 = sand.u32 1, %s1362_s10  }
 0x304   : > { %s684_s22 = ssub.s32 0, %s683_s20 }
 0x305   : > { %s3241_s22 = smov (!%p680_p10, %s684_s22), %s683_s20 }
 0x306   : > { %p1364_p11 = scmp.lt.s32.totalorder %s3241_s22, 0  ;;  %s690_s18 = sadd.s32 2, %s3241_s22 }
 0x308   : > { %s3243_s18 = smov (!%p1364_p11, %s690_s18), %s3241_s22 }
 0x309   : > { %s1365_s11 = sshll.u32 %s3243_s18, 4 }
 0x30a   : > { %s3129_s26 = scalar_lea.sflag [#allocation3], %s1365_s11 }
 0x30b   : > { %2360 = dma.done.wait %s3129_s26, 16 }
 0x30c   : > { %2361 = vsyncadd %s3129_s26, 4294967280  ;;  %s1195_s13 = scalar_lea.sflag %s3129_s26, 1 [#allocation3] }
 0x30d   : > { %2362 = dma.done.wait %s1195_s13, 16 }
 0x30e   : > { %2363 = vsyncadd %s1195_s13, 4294967280  ;;  %s1198_s6 = scalar_lea.sflag %s3129_s26, 2 [#allocation3] }
 0x30f   : > { %2364 = dma.done.wait %s1198_s6, 16 }
 0x310   : > { %2365 = vsyncadd %s1198_s6, 4294967280  ;;  %s1201_s14 = scalar_lea.sflag %s3129_s26, 3 [#allocation3] }
 0x311   : > { %2366 = dma.done.wait %s1201_s14, 16 }
 0x312   : > { %2367 = vsyncadd %s1201_s14, 4294967280  ;;  %s1204_s12 = scalar_lea.sflag %s3129_s26, 4 [#allocation3] }
 0x313   : > { %2368 = dma.done.wait %s1204_s12, 16 }
 0x314   : > { %2369 = vsyncadd %s1204_s12, 4294967280  ;;  %s1207_s25 = scalar_lea.sflag %s3129_s26, 5 [#allocation3] }
 0x315   : > { %2370 = dma.done.wait %s1207_s25, 16 }
 0x316   : > { %2371 = vsyncadd %s1207_s25, 4294967280  ;;  %s1210_s29 = scalar_lea.sflag %s3129_s26, 6 [#allocation3] }
 0x317   : > { %2372 = dma.done.wait %s1210_s29, 16 }
 0x318   : > { %2373 = vsyncadd %s1210_s29, 4294967280  ;;  %s1213_s28 = scalar_lea.sflag %s3129_s26, 7 [#allocation3] }
 0x319   : > { %2374 = dma.done.wait %s1213_s28, 16 }
 0x31a   : > { %2375 = vsyncadd %s1213_s28, 4294967280  ;;  %s1216_s4 = scalar_lea.sflag %s3129_s26, 8 [#allocation3] }
 0x31b   : > { %2376 = dma.done.wait %s1216_s4, 16 }
 0x31c   : > { %2377 = vsyncadd %s1216_s4, 4294967280  ;;  %s1219_s9 = scalar_lea.sflag %s3129_s26, 9 [#allocation3] }
 0x31d   : > { %2378 = dma.done.wait %s1219_s9, 16 }
 0x31e   : > { %2379 = vsyncadd %s1219_s9, 4294967280  ;;  %s1222_s19 = scalar_lea.sflag %s3129_s26, 10 [#allocation3] }
 0x31f   : > { %2380 = dma.done.wait %s1222_s19, 16 }
 0x320   : > { %2381 = vsyncadd %s1222_s19, 4294967280  ;;  %s1225_s30 = scalar_lea.sflag %s3129_s26, 11 [#allocation3] }
 0x321   : > { %2382 = dma.done.wait %s1225_s30, 16 }
 0x322   : > { %2383 = vsyncadd %s1225_s30, 4294967280  ;;  %s1228_s2 = scalar_lea.sflag %s3129_s26, 12 [#allocation3] }
 0x323   : > { %2384 = dma.done.wait %s1228_s2, 16 }
 0x324   : > { %2385 = vsyncadd %s1228_s2, 4294967280  ;;  %s1231_s8 = scalar_lea.sflag %s3129_s26, 13 [#allocation3] }
 0x325   : > { %2386 = dma.done.wait %s1231_s8, 16 }
 0x326   : > { %2387 = vsyncadd %s1231_s8, 4294967280  ;;  %s1234_s21 = scalar_lea.sflag %s3129_s26, 14 [#allocation3] }
 0x327   : > { %2388 = dma.done.wait %s1234_s21, 16 }
 0x328   : > { %2389 = vsyncadd %s1234_s21, 4294967280  ;;  %s1237_s23 = scalar_lea.sflag %s3129_s26, 15 [#allocation3] }
 0x329   : > { %2390 = dma.done.wait %s1237_s23, 16 }
 0x32a   : > { %2391 = vsyncadd %s1237_s23, 4294967280  ;;  %s1420_s5 = sshll.u32 %s2479_s0, 8  ;;  %s780_s15 = sshll.u32 %s2880_s27, 4  ;;  %v760_v1 = vld [vmem:[#allocation6] sm:$0xff]  ;;  %v761_v4 = vld [vmem:[#allocation6 + $0x8] sm:$0xff]  ;;  %s3157_s15 = int_to_ptr.vmem [resolvable:$true] %s780_s15 }
 0x32b   : > { %s757_s7 = scalar_lea.vmem [#allocation2], %s1365_s11  ;;  %s3155_s20 = scalar_lea.hbm %s3206_s3, %s1420_s5 }
 0x32c   : > { %v758_v0 = vld [vmem:[%s757_s7] sm:$0xff]  ;;  %v759_v2 = vld [vmem:[%s757_s7 + $0x8] sm:$0xff]  ;;  %s3226_s0 = sand.u32 1, %s2402_s16   ;;  %s2312_s18 = scalar_lea.vmem %s3157_s15, 256 }
 0x32d   : > { %v762_v3 = vadd.f32 %v760_v1, %v758_v0  ;;  %v763_v5 = vadd.f32 %v761_v4, %v759_v2  ;;  %s3163_s22 = scalar_lea.sflag [#allocation8], %s3226_s0  ;;  %p2313_p12 = scmp.ne.s32.totalorder %s3157_s15, %s2312_s18 }
 0x32e   : > { %s2432_s11 = smov [#allocation9]  }
 0x32f   : > { %764 = vst [vmem:[%s2880_s27] sm:$0xff] %v762_v3  ;;  %765 = vst [vmem:[%s2880_s27 + $0x8] sm:$0xff] %v763_v5  ;;  %p2314_p13 = pnand %p2313_p12, %p2496_p5  ;;  %s2316_s26 = sshll.u32 %s2432_s11, 4  ;;  %s2317_s26 = int_to_ptr.vmem [resolvable:$false] %s2316_s26 }
 0x330   : > { %s2318_s13 = scalar_lea.vmem %s2317_s26, 512  ;;  %p2319_p1 = scmp.lt.s32.totalorder %s3157_s15, %s2317_s26 }
 0x331   : > { %p2315_p0 = pneg %p2314_p13  ;;  %p2320_p2 = scmp.lt.s32.totalorder %s2318_s13, %s2312_s18 }
 0x333   : > { %p2321_p3 = por %p2320_p2, %p2319_p1 }
 0x335   : > { %p2322_p9 = pnand %p2321_p3, %p2315_p0 }
 0x337   : > { %2325 = shalt.err (!%p2322_p9)
}
 0x338   : > { %s2326_s27 = scalar_lea.hbm %s3155_s20, 256  ;;  %s2330_s12 = scalar_lea.hbm %s3206_s3, 512 }
 0x339   : > { %p2327_p4 = scmp.ne.s32.totalorder %s3155_s20, %s2326_s27  ;;  %p2331_p8 = scmp.lt.s32.totalorder %s3155_s20, %s3206_s3 }
 0x33a   : > { %p2332_p10 = scmp.lt.s32.totalorder %s2330_s12, %s2326_s27 }
 0x33b   : > { %p2328_p7 = pnand %p2327_p4, %p2496_p5 }
 0x33c   : > { %p2333_p11 = por %p2332_p10, %p2331_p8 }
 0x33d   : > { %p2329_p6 = pneg %p2328_p7 }
 0x33f   : > { %p2334_p12 = pnand %p2333_p11, %p2329_p6 }
 0x341   : > { %2337 = shalt.err (!%p2334_p12)
}
 0x342   : > { %s2433_s28 = smov 128   ;;  %s2434_s4 = smov 8  }
 0x343   : > { %1442 = dma.vmem_to_hbm [thread:$0]  (%p2496_p5), %s3157_s15, 256, %s3155_s20, %s3163_s22, %s2433_s28, %s2433_s28, %s2434_s4  }
 0x344 PF: > { %s3227_s9 = sld [smem:[#allocation97_spill]] }
 0x345   : > { %s3228_s19 = sld [smem:[#allocation95_spill]] }
 0x346   : > { %s3229_s30 = sld [smem:[#allocation100_spill]] }
 0x34a   : > { %p1455_p13 = scmp.ge.s32.totalorder %s3227_s9, 2 }
 0x34b   : > { %s795_s2 = sand.u32 1, %s3228_s19  }
 0x34c   : > { %p3230_p0 = scmp.ne.s32.totalorder %s3229_s30, 0  ;;  %s796_s8 = scalar_lea.sflag [#allocation8], %s795_s2 }
 0x34e   : > { %p1449_p1 = pnand %p1455_p13, %p3230_p0 }
 0x350   : > { %p1450_p2 = pneg %p1449_p1 }
 0x352   : > { %2393 = dma.done.wait (%p1450_p2), %s796_s8, 256  }
 0x353   : > { %2395 = vsyncadd (%p1450_p2), %s796_s8, 4294967040  ;;  %s3231_s18 = sld [smem:[#allocation98_spill]]  ;;  %s3234_s15 = smov %s2402_s16 }
 0x354   : > { %s3232_s21 = sld [smem:[#allocation96_spill]] }
 0x355   : > { %s3233_s17 = sld [smem:[#allocation99_spill]] }
 0x359   : > { %p18_p3 = scmp.ge.s32.totalorder %s3231_s18, 4  }
 0x35a   : > { %s3235_s16 = smov %s3232_s21 }
 0x35b   :  { %20 = sbr.rel (!%p18_p3) target bundleno = 10 (0xa), region = 339 }
 0x360   :  { %801 = vsyncpa [#allocation7], 1 }
 0x361   :  { %803 = vsyncpa [#allocation7 + $0x1], 1 }
 0x362   :  { %804 = vsyncpa [#allocation8], 1 }
 0x363   :  { %806 = vsyncpa [#allocation8 + $0x1], 1 }
 0x364   :  { %807 = vsyncmov [#allocation3] }
 0x367   :  { %s808_s24 = vpop.sfrf %807 }
 0x368   :  { %p1386_p5 = scmp.ne.s32.totalorder %s808_s24, 0 }
 0x36a   :  { %812 = shalt.err (%p1386_p5)  }
 0x36b   :  { %814 = vsyncmov [#allocation3 + $0x1] }
 0x36e   :  { %s815_s23 = vpop.sfrf %814 }
 0x36f   :  { %p1387_p9 = scmp.ne.s32.totalorder %s815_s23, 0 }
 0x371   :  { %819 = shalt.err (%p1387_p9)  }
 0x372   :  { %821 = vsyncmov [#allocation3 + $0x2] }
 0x375   :  { %s822_s5 = vpop.sfrf %821 }
 0x376   :  { %p1388_p4 = scmp.ne.s32.totalorder %s822_s5, 0 }
 0x378   :  { %826 = shalt.err (%p1388_p4)  }
 0x379   :  { %828 = vsyncmov [#allocation3 + $0x3] }
 0x37c   :  { %s829_s7 = vpop.sfrf %828 }
 0x37d   :  { %p1389_p7 = scmp.ne.s32.totalorder %s829_s7, 0 }
 0x37f   :  { %833 = shalt.err (%p1389_p7)  }
 0x380   :  { %835 = vsyncmov [#allocation3 + $0x4] }
 0x383   :  { %s836_s1 = vpop.sfrf %835 }
 0x384   :  { %p1390_p6 = scmp.ne.s32.totalorder %s836_s1, 0 }
 0x386   :  { %840 = shalt.err (%p1390_p6)  }
 0x387   :  { %842 = vsyncmov [#allocation3 + $0x5] }
 0x38a   :  { %s843_s3 = vpop.sfrf %842 }
 0x38b   :  { %p1391_p8 = scmp.ne.s32.totalorder %s843_s3, 0 }
 0x38d   :  { %847 = shalt.err (%p1391_p8)  }
 0x38e   :  { %849 = vsyncmov [#allocation3 + $0x6] }
 0x391   :  { %s850_s16 = vpop.sfrf %849 }
 0x392   :  { %p1392_p10 = scmp.ne.s32.totalorder %s850_s16, 0 }
 0x394   :  { %854 = shalt.err (%p1392_p10)  }
 0x395   :  { %856 = vsyncmov [#allocation3 + $0x7] }
 0x398   :  { %s857_s15 = vpop.sfrf %856 }
 0x399   :  { %p1393_p11 = scmp.ne.s32.totalorder %s857_s15, 0 }
 0x39b   :  { %861 = shalt.err (%p1393_p11)  }
 0x39c   :  { %863 = vsyncmov [#allocation3 + $0x8] }
 0x39f   :  { %s864_s17 = vpop.sfrf %863 }
 0x3a0   :  { %p1394_p12 = scmp.ne.s32.totalorder %s864_s17, 0 }
 0x3a2   :  { %868 = shalt.err (%p1394_p12)  }
 0x3a3   :  { %870 = vsyncmov [#allocation3 + $0x9] }
 0x3a6   :  { %s871_s10 = vpop.sfrf %870 }
 0x3a7   :  { %p1395_p13 = scmp.ne.s32.totalorder %s871_s10, 0 }
 0x3a9   :  { %875 = shalt.err (%p1395_p13)  }
 0x3aa   :  { %877 = vsyncmov [#allocation3 + $0xa] }
 0x3ad   :  { %s878_s20 = vpop.sfrf %877 }
 0x3ae   :  { %p1396_p0 = scmp.ne.s32.totalorder %s878_s20, 0 }
 0x3b0   :  { %882 = shalt.err (%p1396_p0)  }
 0x3b1   :  { %884 = vsyncmov [#allocation3 + $0xb] }
 0x3b4   :  { %s885_s0 = vpop.sfrf %884 }
 0x3b5   :  { %p1397_p1 = scmp.ne.s32.totalorder %s885_s0, 0 }
 0x3b7   :  { %889 = shalt.err (%p1397_p1)  }
 0x3b8   :  { %891 = vsyncmov [#allocation3 + $0xc] }
 0x3bb   :  { %s892_s22 = vpop.sfrf %891 }
 0x3bc   :  { %p1398_p2 = scmp.ne.s32.totalorder %s892_s22, 0 }
 0x3be   :  { %896 = shalt.err (%p1398_p2)  }
 0x3bf   :  { %898 = vsyncmov [#allocation3 + $0xd] }
 0x3c2   :  { %s899_s18 = vpop.sfrf %898 }
 0x3c3   :  { %p1399_p3 = scmp.ne.s32.totalorder %s899_s18, 0 }
 0x3c5   :  { %903 = shalt.err (%p1399_p3)  }
 0x3c6   :  { %905 = vsyncmov [#allocation3 + $0xe] }
 0x3c9   :  { %s906_s11 = vpop.sfrf %905 }
 0x3ca   :  { %p1400_p5 = scmp.ne.s32.totalorder %s906_s11, 0 }
 0x3cc   :  { %910 = shalt.err (%p1400_p5)  }
 0x3cd   :  { %912 = vsyncmov [#allocation3 + $0xf] }
 0x3d0   :  { %s913_s26 = vpop.sfrf %912 }
 0x3d1   :  { %p1401_p9 = scmp.ne.s32.totalorder %s913_s26, 0 }
 0x3d3   :  { %917 = shalt.err (%p1401_p9)  }
 0x3d4   :  { %919 = vsyncmov [#allocation3 + $0x10] }
 0x3d7   :  { %s920_s13 = vpop.sfrf %919 }
 0x3d8   :  { %p1402_p4 = scmp.ne.s32.totalorder %s920_s13, 0 }
 0x3da   :  { %924 = shalt.err (%p1402_p4)  }
 0x3db   :  { %926 = vsyncmov [#allocation3 + $0x11] }
 0x3de   :  { %s927_s27 = vpop.sfrf %926 }
 0x3df   :  { %p1403_p7 = scmp.ne.s32.totalorder %s927_s27, 0 }
 0x3e1   :  { %931 = shalt.err (%p1403_p7)  }
 0x3e2   :  { %933 = vsyncmov [#allocation3 + $0x12] }
 0x3e5   :  { %s934_s6 = vpop.sfrf %933 }
 0x3e6   :  { %p1404_p6 = scmp.ne.s32.totalorder %s934_s6, 0 }
 0x3e8   :  { %938 = shalt.err (%p1404_p6)  }
 0x3e9   :  { %940 = vsyncmov [#allocation3 + $0x13] }
 0x3ec   :  { %s941_s14 = vpop.sfrf %940 }
 0x3ed   :  { %p1405_p8 = scmp.ne.s32.totalorder %s941_s14, 0 }
 0x3ef   :  { %945 = shalt.err (%p1405_p8)  }
 0x3f0   :  { %947 = vsyncmov [#allocation3 + $0x14] }
 0x3f3   :  { %s948_s12 = vpop.sfrf %947 }
 0x3f4   :  { %p1406_p10 = scmp.ne.s32.totalorder %s948_s12, 0 }
 0x3f6   :  { %952 = shalt.err (%p1406_p10)  }
 0x3f7   :  { %954 = vsyncmov [#allocation3 + $0x15] }
 0x3fa   :  { %s955_s25 = vpop.sfrf %954 }
 0x3fb   :  { %p1407_p11 = scmp.ne.s32.totalorder %s955_s25, 0 }
 0x3fd   :  { %959 = shalt.err (%p1407_p11)  }
 0x3fe   :  { %961 = vsyncmov [#allocation3 + $0x16] }
 0x401   :  { %s962_s29 = vpop.sfrf %961 }
 0x402   :  { %p1408_p12 = scmp.ne.s32.totalorder %s962_s29, 0 }
 0x404   :  { %966 = shalt.err (%p1408_p12)  }
 0x405   :  { %968 = vsyncmov [#allocation3 + $0x17] }
 0x408   :  { %s969_s28 = vpop.sfrf %968 }
 0x409   :  { %p1409_p13 = scmp.ne.s32.totalorder %s969_s28, 0 }
 0x40b   :  { %973 = shalt.err (%p1409_p13)  }
 0x40c   :  { %975 = vsyncmov [#allocation3 + $0x18] }
 0x40f   :  { %s976_s4 = vpop.sfrf %975 }
 0x410   :  { %p1410_p0 = scmp.ne.s32.totalorder %s976_s4, 0 }
 0x412   :  { %980 = shalt.err (%p1410_p0)  }
 0x413   :  { %982 = vsyncmov [#allocation3 + $0x19] }
 0x416   :  { %s983_s9 = vpop.sfrf %982 }
 0x417   :  { %p1411_p1 = scmp.ne.s32.totalorder %s983_s9, 0 }
 0x419   :  { %987 = shalt.err (%p1411_p1)  }
 0x41a   :  { %989 = vsyncmov [#allocation3 + $0x1a] }
 0x41d   :  { %s990_s19 = vpop.sfrf %989 }
 0x41e   :  { %p1412_p2 = scmp.ne.s32.totalorder %s990_s19, 0 }
 0x420   :  { %994 = shalt.err (%p1412_p2)  }
 0x421   :  { %996 = vsyncmov [#allocation3 + $0x1b] }
 0x424   :  { %s997_s30 = vpop.sfrf %996 }
 0x425   :  { %p1413_p3 = scmp.ne.s32.totalorder %s997_s30, 0 }
 0x427   :  { %1001 = shalt.err (%p1413_p3)  }
 0x428   :  { %1003 = vsyncmov [#allocation3 + $0x1c] }
 0x42b   :  { %s1004_s2 = vpop.sfrf %1003 }
 0x42c   :  { %p1414_p5 = scmp.ne.s32.totalorder %s1004_s2, 0 }
 0x42e   :  { %1008 = shalt.err (%p1414_p5)  }
 0x42f   :  { %1010 = vsyncmov [#allocation3 + $0x1d] }
 0x432   :  { %s1011_s8 = vpop.sfrf %1010 }
 0x433   :  { %p1415_p9 = scmp.ne.s32.totalorder %s1011_s8, 0 }
 0x435   :  { %1015 = shalt.err (%p1415_p9)  }
 0x436   :  { %1017 = vsyncmov [#allocation3 + $0x1e] }
 0x439   :  { %s1018_s21 = vpop.sfrf %1017 }
 0x43a   :  { %p1416_p4 = scmp.ne.s32.totalorder %s1018_s21, 0 }
 0x43c   :  { %1022 = shalt.err (%p1416_p4)  }
 0x43d   :  { %1024 = vsyncmov [#allocation3 + $0x1f] }
 0x440   :  { %s1025_s24 = vpop.sfrf %1024 }
 0x441   :  { %p1417_p7 = scmp.ne.s32.totalorder %s1025_s24, 0 }
 0x443   :  { %1029 = shalt.err (%p1417_p7)  }

</bundles_post_ra>
